<compile_context>
chip_gen: v6e
topology: v6e:2x2x1
jax: 0.10.0
libtpu: 0.0.40
codegen_flags: <defaults>
</compile_context>

<pallas_src>
import functools

import jax
import jax.numpy as jnp
from jax import lax
from jax.experimental import pallas as pl
from jax.experimental.pallas import tpu as pltpu

BN_EPS = 1e-5
LANE = 128


def _vae_kernel(latent_dim, batch_real, block_batch,
                x_ref, eps_ref,
                w1_ref, w2_ref, wml_ref, dw1_ref, dw2_ref, dw3_ref,
                pvec_ref,
                zml_ref, rec_ref,
                d1_scr, a2_scr):
    L = latent_dim
    BT = block_batch
    enc_h1 = w1_ref.shape[1]
    enc_h2 = w2_ref.shape[1]
    mlp = wml_ref.shape[1]          # padded width of fused z_mean|z_log_var slab
    dec_h1 = dw1_ref.shape[1]
    dec_h2 = dw2_ref.shape[1]
    out_sz = dw3_ref.shape[1]
    Bp = d1_scr.shape[0]            # padded full batch

    phase = pl.program_id(0)
    tile = pl.program_id(1)
    row0 = pl.multiple_of(tile * BT, BT)

    # static lane offsets into the packed small-parameter vector (all x128)
    o_b1 = 0
    o_b2 = o_b1 + enc_h1
    o_bml = o_b2 + enc_h2
    o_db1 = o_bml + mlp
    o_g1 = o_db1 + dec_h1
    o_be1 = o_g1 + dec_h1
    o_db2 = o_be1 + dec_h1
    o_g2 = o_db2 + dec_h2
    o_be2 = o_g2 + dec_h2
    o_db3 = o_be2 + dec_h2

    bf16 = jnp.bfloat16
    f32 = jnp.float32

    # ---- phase 0 (per batch tile): encoder -> sampling -> decoder.fc1 -------
    @pl.when(phase == 0)
    def _encode_tile():
        x = x_ref[...]                                        # (BT, in) bf16
        h = jnp.dot(x, w1_ref[...], preferred_element_type=f32)
        h = jnp.maximum(h + pvec_ref[:, o_b1:o_b1 + enc_h1], 0.0).astype(bf16)
        h = jnp.dot(h, w2_ref[...], preferred_element_type=f32)
        h = jnp.maximum(h + pvec_ref[:, o_b2:o_b2 + enc_h2], 0.0).astype(bf16)

        # lane-dense slab: cols [0:L) = z_mean, [L:2L) = z_log_var, rest 0
        zml = (jnp.dot(h, wml_ref[...], preferred_element_type=f32)
               + pvec_ref[:, o_bml:o_bml + mlp])
        zml_ref[...] = zml

        # Sampling: z = mean + exp(0.5 * log_var) * eps   (f32)
        z = zml[:, :L] + jnp.exp(0.5 * zml[:, L:2 * L]) * eps_ref[:, :L]

        # decoder.fc1 pre-activation, stashed for the full-batch BatchNorm
        d1 = (jnp.dot(z, dw1_ref[...], preferred_element_type=f32)
              + pvec_ref[:, o_db1:o_db1 + dec_h1])
        d1_scr[pl.ds(row0, BT), :] = d1

    # ---- phase 1, tile 0: full-batch BN1 -> ReLU -> fc2 -> BN2 -> ReLU ------
    @pl.when(jnp.logical_and(phase == 1, tile == 0))
    def _full_batch_middle():
        valid = lax.broadcasted_iota(jnp.int32, (Bp, 1), 0) < batch_real
        inv_n = 1.0 / float(batch_real)

        def bn(d, gamma, beta):
            # training-mode BatchNorm1d, biased variance, masked to real rows
            mu = jnp.sum(jnp.where(valid, d, 0.0), axis=0, keepdims=True) * inv_n
            var = jnp.sum(jnp.where(valid, jnp.square(d - mu), 0.0),
                          axis=0, keepdims=True) * inv_n
            return gamma * (d - mu) * lax.rsqrt(var + BN_EPS) + beta

        d1 = d1_scr[...]                                       # (Bp, h1) f32
        a1 = jnp.maximum(bn(d1,
                            pvec_ref[:, o_g1:o_g1 + dec_h1],
                            pvec_ref[:, o_be1:o_be1 + dec_h1]), 0.0).astype(bf16)
        d2 = (jnp.dot(a1, dw2_ref[...], preferred_element_type=f32)
              + pvec_ref[:, o_db2:o_db2 + dec_h2])
        a2 = jnp.maximum(bn(d2,
                            pvec_ref[:, o_g2:o_g2 + dec_h2],
                            pvec_ref[:, o_be2:o_be2 + dec_h2]), 0.0)
        a2_scr[...] = a2.astype(bf16)

    # ---- phase 1 (per batch tile): decoder.fc3 -------------------------------
    @pl.when(phase == 1)
    def _decode_tile():
        a2 = a2_scr[pl.ds(row0, BT), :]                        # (BT, h2) bf16
        rec_ref[...] = (jnp.dot(a2, dw3_ref[...], preferred_element_type=f32)
                        + pvec_ref[:, o_db3:o_db3 + out_sz])


def pack_kernel_params(p):
    """Convert natural (f32, PyTorch-shaped) params into kernel-ready tensors."""
    latent = p["wm"].shape[1]
    enc_h2 = p["wm"].shape[0]
    # fused + lane-padded z_mean / z_log_var projection
    mlp = max(LANE, ((2 * latent + LANE - 1) // LANE) * LANE)
    wml = jnp.zeros((enc_h2, mlp), jnp.float32)
    wml = wml.at[:, :latent].set(p["wm"]).at[:, latent:2 * latent].set(p["wl"])
    bml = jnp.zeros((1, mlp), jnp.float32)
    bml = bml.at[:, :latent].set(p["bm"]).at[:, latent:2 * latent].set(p["bl"])

    # pack all tiny f32 vectors into one array (order must match the kernel)
    pvec = jnp.concatenate(
        [p["b1"], p["b2"], bml,
         p["db1"], p["g1"], p["be1"],
         p["db2"], p["g2"], p["be2"],
         p["db3"]], axis=1)

    bf16 = jnp.bfloat16
    return {
        "latent_dim": latent,
        "w1": p["w1"].astype(bf16),
        "w2": p["w2"].astype(bf16),
        "wml": wml.astype(bf16),
        "dw1": p["dw1"],                 # tiny (latent x h1): keep f32
        "dw2": p["dw2"].astype(bf16),
        "dw3": p["dw3"].astype(bf16),
        "pvec": pvec,                    # f32
    }


def vae_forward(x, eps, kp, *, block_batch=512):
    """Fused VAE forward pass in one batch-tiled Pallas kernel.

    block_batch: batch-tile size.  512 keeps a v7x (64 MiB VMEM) comfortable;
    v5e/v6e can go higher.
    """
    B, in_size = x.shape
    L = kp["latent_dim"]
    mlp = kp["wml"].shape[1]
    dec_h1 = kp["dw1"].shape[1]
    dec_h2 = kp["dw2"].shape[1]
    out_size = kp["dw3"].shape[1]

    # batch tile: multiple of 16 (bf16 sublane packing), pad batch to a multiple
    BT = int(min(block_batch, max(16, -(-B // 16) * 16)))
    BT = max(16, (BT // 16) * 16)
    Bp = -(-B // BT) * BT
    NT = Bp // BT

    xb = jnp.zeros((Bp, in_size), jnp.bfloat16).at[:B].set(x.astype(jnp.bfloat16))
    epsb = jnp.zeros((Bp, LANE), jnp.float32).at[:B, :L].set(
        eps.astype(jnp.float32))

    const2 = lambda p, i: (0, 0)
    tile_or_last = lambda p, i: ((1 - p) * i + p * (NT - 1), 0)

    in_specs = [
        pl.BlockSpec((BT, in_size), tile_or_last),            # x  (phase-0 only)
        pl.BlockSpec((BT, LANE), tile_or_last),                # eps
        pl.BlockSpec(kp["w1"].shape, const2),                  # resident weights
        pl.BlockSpec(kp["w2"].shape, const2),
        pl.BlockSpec(kp["wml"].shape, const2),
        pl.BlockSpec(kp["dw1"].shape, const2),
        pl.BlockSpec(kp["dw2"].shape, const2),
        pl.BlockSpec(kp["dw3"].shape, const2),
        pl.BlockSpec(kp["pvec"].shape, const2),
    ]
    out_specs = (
        pl.BlockSpec((BT, mlp), tile_or_last),                 # zml (phase 0)
        pl.BlockSpec((BT, out_size), lambda p, i: (p * i, 0)), # rec (phase 1)
    )
    scratch_shapes = [
        pltpu.VMEM((Bp, dec_h1), jnp.float32),                 # d1 (full batch)
        pltpu.VMEM((Bp, dec_h2), jnp.bfloat16),                # a2 (full batch)
    ]

    # rough VMEM footprint -> scoped-VMEM limit (double-buffered tiles + weights)
    def nbytes(a):
        return int(a.size) * jnp.dtype(a.dtype).itemsize
    weight_bytes = sum(nbytes(kp[k])
                       for k in ("w1", "w2", "wml", "dw1", "dw2", "dw3", "pvec"))
    tile_bytes = BT * (2 * in_size + 4 * LANE + 4 * mlp + 4 * out_size)
    scratch_bytes = Bp * (4 * dec_h1 + 2 * dec_h2)
    need = 2 * weight_bytes + 2 * tile_bytes + scratch_bytes + (4 << 20)
    vmem_limit = int(min(max(need, 32 << 20), 100 << 20))

    kernel = functools.partial(_vae_kernel, L, B, BT)
    zml, rec = pl.pallas_call(
        kernel,
        grid=(2, NT),
        in_specs=in_specs,
        out_specs=out_specs,
        out_shape=(jax.ShapeDtypeStruct((Bp, mlp), jnp.float32),
                   jax.ShapeDtypeStruct((Bp, out_size), jnp.float32)),
        scratch_shapes=scratch_shapes,
        compiler_params=pltpu.CompilerParams(
            # tile axis must stay sequential: BatchNorm needs full-batch stats
            dimension_semantics=("arbitrary", "arbitrary"),
            vmem_limit_bytes=vmem_limit),
    )(xb, epsb, kp["w1"], kp["w2"], kp["wml"], kp["dw1"], kp["dw2"], kp["dw3"],
      kp["pvec"])

    return zml[:B, :L], zml[:B, L:2 * L], rec[:B]


def init_params(key, input_size=2048, enc_h1=128, enc_h2=128, latent_dim=10,
                dec_h1=128, dec_h2=128, output_size=2048):
    """Deterministic PyTorch-style (uniform +/- 1/sqrt(fan_in)) init, all f32."""
    keys = jax.random.split(key, 8)

    def lin(k, fan_in, fan_out):
        bound = 1.0 / (fan_in ** 0.5)
        kw, kb = jax.random.split(k)
        w = jax.random.uniform(kw, (fan_in, fan_out), jnp.float32, -bound, bound)
        b = jax.random.uniform(kb, (1, fan_out), jnp.float32, -bound, bound)
        return w, b

    p = {}
    # LinearEncoder
    p["w1"], p["b1"] = lin(keys[0], input_size, enc_h1)
    p["w2"], p["b2"] = lin(keys[1], enc_h1, enc_h2)
    p["wm"], p["bm"] = lin(keys[2], enc_h2, latent_dim)
    p["wl"], p["bl"] = lin(keys[3], enc_h2, latent_dim)
    # LinearDecoder (BatchNorm affine defaults: gamma=1, beta=0)
    p["dw1"], p["db1"] = lin(keys[4], latent_dim, dec_h1)
    p["g1"] = jnp.ones((1, dec_h1), jnp.float32)
    p["be1"] = jnp.zeros((1, dec_h1), jnp.float32)
    p["dw2"], p["db2"] = lin(keys[5], dec_h1, dec_h2)
    p["g2"] = jnp.ones((1, dec_h2), jnp.float32)
    p["be2"] = jnp.zeros((1, dec_h2), jnp.float32)
    p["dw3"], p["db3"] = lin(keys[6], dec_h2, output_size)
    return p


def vae_reference(x, eps, p):
    """Pure-JAX reference with the same bf16 matmul-operand casts as the kernel
    (f32 accumulation, f32 BatchNorm / ReLU / sampling, full-batch BN stats)."""
    bf16 = jnp.bfloat16

    def mm(a, w):
        return jnp.dot(a.astype(bf16), w.astype(bf16),
                       preferred_element_type=jnp.float32)

    h = jnp.maximum(mm(x, p["w1"]) + p["b1"], 0.0)
    h = jnp.maximum(mm(h, p["w2"]) + p["b2"], 0.0)
    z_mean = mm(h, p["wm"]) + p["bm"]
    z_log_var = mm(h, p["wl"]) + p["bl"]
    z = z_mean + jnp.exp(0.5 * z_log_var) * eps

    def bn(d, g, b):
        mu = jnp.mean(d, axis=0, keepdims=True)
        var = jnp.mean(jnp.square(d - mu), axis=0, keepdims=True)
        return g * (d - mu) * lax.rsqrt(var + BN_EPS) + b

    d = jnp.maximum(bn(jnp.dot(z, p["dw1"], preferred_element_type=jnp.float32)
                       + p["db1"], p["g1"], p["be1"]), 0.0)
    d = jnp.maximum(bn(mm(d, p["dw2"]) + p["db2"], p["g2"], p["be2"]), 0.0)
    rec = mm(d, p["dw3"]) + p["db3"]
    return z_mean, z_log_var, rec


if __name__ == "__main__":
    B = 48                # not a multiple of the tile -> exercises padding+mask
    INPUT_SIZE = 2048     # default_encoder_config['input_size']
    LATENT_DIM = 10
    OUTPUT_SIZE = 2048    # default_decoder_config['output_size']

    root = jax.random.PRNGKey(0)
    k_param, k_x, k_eps = jax.random.split(root, 3)

    params = init_params(k_param, input_size=INPUT_SIZE, latent_dim=LATENT_DIM,
                         output_size=OUTPUT_SIZE)
    kparams = pack_kernel_params(params)

    x = jax.random.normal(k_x, (B, INPUT_SIZE), jnp.float32)
    eps = jax.random.normal(k_eps, (B, LATENT_DIM), jnp.float32)

    # small block_batch so the demo actually runs a multi-tile grid (2 tiles)
    z_mean, z_log_var, rec = vae_forward(x, eps, kparams, block_batch=32)
    jax.block_until_ready((z_mean, z_log_var, rec))

    # Correctness check against a pure-JAX reference with matching bf16 casts
    # and full-batch BatchNorm statistics.
    zm_ref, zl_ref, rec_ref = vae_reference(x, eps, params)
    assert z_mean.shape == (B, LATENT_DIM)
    assert z_log_var.shape == (B, LATENT_DIM)
    assert rec.shape == (B, OUTPUT_SIZE)
    assert jnp.allclose(z_mean, zm_ref, atol=1e-2, rtol=1e-2)
    assert jnp.allclose(z_log_var, zl_ref, atol=1e-2, rtol=1e-2)
    assert jnp.allclose(rec, rec_ref, atol=1e-2, rtol=1e-2)

    print("KERNEL_OK")
</pallas_src>

<mosaic_0001>
module attributes {stable_mosaic.version = 11 : i64} {
  func.func @_vae_kernel(%arg0: i32, %arg1: i32, %arg2: memref<32x2048xbf16, #tpu.memory_space<vmem>>, %arg3: memref<32x128xf32, #tpu.memory_space<vmem>>, %arg4: memref<2048x128xbf16, #tpu.memory_space<vmem>>, %arg5: memref<128x128xbf16, #tpu.memory_space<vmem>>, %arg6: memref<128x128xbf16, #tpu.memory_space<vmem>>, %arg7: memref<10x128xf32, #tpu.memory_space<vmem>>, %arg8: memref<128x128xbf16, #tpu.memory_space<vmem>>, %arg9: memref<128x2048xbf16, #tpu.memory_space<vmem>>, %arg10: memref<1x3200xf32, #tpu.memory_space<vmem>>, %arg11: memref<32x128xf32, #tpu.memory_space<vmem>>, %arg12: memref<32x2048xf32, #tpu.memory_space<vmem>>, %arg13: memref<64x128xf32, #tpu.memory_space<vmem>>, %arg14: memref<64x128xbf16, #tpu.memory_space<vmem>>) attributes {dimension_semantics = [#tpu.dimension_semantics<arbitrary>, #tpu.dimension_semantics<arbitrary>], iteration_bounds = array<i64: 2, 2>, scalar_prefetch = 0 : i64, scratch_operands = 2 : i64, tpu.core_type = #tpu.core_type<tc>, window_params = [{transform_indices = @transform_0, window_bounds = array<i64: 32, 2048>}, {transform_indices = @transform_1, window_bounds = array<i64: 32, 128>}, {pipeline_mode = #tpu.pipeline_mode<synchronous>, transform_indices = @transform_2, window_bounds = array<i64: 2048, 128>}, {pipeline_mode = #tpu.pipeline_mode<synchronous>, transform_indices = @transform_3, window_bounds = array<i64: 128, 128>}, {pipeline_mode = #tpu.pipeline_mode<synchronous>, transform_indices = @transform_4, window_bounds = array<i64: 128, 128>}, {pipeline_mode = #tpu.pipeline_mode<synchronous>, transform_indices = @transform_5, window_bounds = array<i64: 10, 128>}, {pipeline_mode = #tpu.pipeline_mode<synchronous>, transform_indices = @transform_6, window_bounds = array<i64: 128, 128>}, {pipeline_mode = #tpu.pipeline_mode<synchronous>, transform_indices = @transform_7, window_bounds = array<i64: 128, 2048>}, {pipeline_mode = #tpu.pipeline_mode<synchronous>, transform_indices = @transform_8, window_bounds = array<i64: 1, 3200>}, {transform_indices = @transform_9, window_bounds = array<i64: 32, 128>}, {transform_indices = @transform_10, window_bounds = array<i64: 32, 2048>}]} {
    %c32_i32 = arith.constant 32 : i32
    %0 = arith.muli %arg1, %c32_i32 : i32
    %1 = tpu.assume_multiple %0, 32 : i32
    %c0_i32 = arith.constant 0 : i32
    %2 = arith.cmpi eq, %arg0, %c0_i32 : i32
    %3 = arith.extui %2 : i1 to i32
    %c0_i32_0 = arith.constant 0 : i32
    %4 = arith.cmpi ne, %3, %c0_i32_0 : i32
    scf.if %4 {
      %c0 = arith.constant 0 : index
      %c0_5 = arith.constant 0 : index
      %13 = vector.load %arg2[%c0, %c0_5] : memref<32x2048xbf16, #tpu.memory_space<vmem>>, vector<32x2048xbf16>
      %c0_6 = arith.constant 0 : index
      %c0_7 = arith.constant 0 : index
      %14 = vector.load %arg4[%c0_6, %c0_7] : memref<2048x128xbf16, #tpu.memory_space<vmem>>, vector<2048x128xbf16>
      %cst = arith.constant dense<0.000000e+00> : vector<32x128xf32>
      %15 = tpu.matmul %13, %14, %cst {dimension_numbers = #tpu.dot_dimension_numbers<[1], [0], [0], [1], [0, 0, 1, 1], [], []>} : vector<32x2048xbf16>, vector<2048x128xbf16>, vector<32x128xf32> -> vector<32x128xf32>
      %c0_8 = arith.constant 0 : index
      %c0_9 = arith.constant 0 : index
      %16 = vector.load %arg10[%c0_8, %c0_9] : memref<1x3200xf32, #tpu.memory_space<vmem>>, vector<1x128xf32>
      %17 = vector.broadcast %16 : vector<1x128xf32> to vector<32x128xf32>
      %18 = arith.addf %15, %17 : vector<32x128xf32>
      %cst_10 = arith.constant 0.000000e+00 : f32
      %19 = vector.broadcast %cst_10 : f32 to vector<32x128xf32>
      %20 = arith.maximumf %18, %19 : vector<32x128xf32>
      %21 = arith.truncf %20 : vector<32x128xf32> to vector<32x128xbf16>
      %c0_11 = arith.constant 0 : index
      %c0_12 = arith.constant 0 : index
      %22 = vector.load %arg5[%c0_11, %c0_12] : memref<128x128xbf16, #tpu.memory_space<vmem>>, vector<128x128xbf16>
      %cst_13 = arith.constant dense<0.000000e+00> : vector<32x128xf32>
      %23 = tpu.matmul %21, %22, %cst_13 {dimension_numbers = #tpu.dot_dimension_numbers<[1], [0], [0], [1], [0, 0, 1, 1], [], []>} : vector<32x128xbf16>, vector<128x128xbf16>, vector<32x128xf32> -> vector<32x128xf32>
      %c0_14 = arith.constant 0 : index
      %c128 = arith.constant 128 : index
      %24 = vector.load %arg10[%c0_14, %c128] : memref<1x3200xf32, #tpu.memory_space<vmem>>, vector<1x128xf32>
      %25 = vector.broadcast %24 : vector<1x128xf32> to vector<32x128xf32>
      %26 = arith.addf %23, %25 : vector<32x128xf32>
      %cst_15 = arith.constant 0.000000e+00 : f32
      %27 = vector.broadcast %cst_15 : f32 to vector<32x128xf32>
      %28 = arith.maximumf %26, %27 : vector<32x128xf32>
      %29 = arith.truncf %28 : vector<32x128xf32> to vector<32x128xbf16>
      %c0_16 = arith.constant 0 : index
      %c0_17 = arith.constant 0 : index
      %30 = vector.load %arg6[%c0_16, %c0_17] : memref<128x128xbf16, #tpu.memory_space<vmem>>, vector<128x128xbf16>
      %cst_18 = arith.constant dense<0.000000e+00> : vector<32x128xf32>
      %31 = tpu.matmul %29, %30, %cst_18 {dimension_numbers = #tpu.dot_dimension_numbers<[1], [0], [0], [1], [0, 0, 1, 1], [], []>} : vector<32x128xbf16>, vector<128x128xbf16>, vector<32x128xf32> -> vector<32x128xf32>
      %c0_19 = arith.constant 0 : index
      %c256 = arith.constant 256 : index
      %32 = vector.load %arg10[%c0_19, %c256] : memref<1x3200xf32, #tpu.memory_space<vmem>>, vector<1x128xf32>
      %33 = vector.broadcast %32 : vector<1x128xf32> to vector<32x128xf32>
      %34 = arith.addf %31, %33 : vector<32x128xf32>
      %c0_20 = arith.constant 0 : index
      %c0_21 = arith.constant 0 : index
      %35 = vector.load %arg11[%c0_20, %c0_21] : memref<32x128xf32, #tpu.memory_space<vmem>>, vector<32x128xf32>
      tpu.vector_store %arg11[%c0_20, %c0_21], %34 {strides = array<i32>} : memref<32x128xf32, #tpu.memory_space<vmem>>, vector<32x128xf32>,
      %36 = vector.extract_strided_slice %34 {offsets = [0, 0], sizes = [32, 10], strides = [1, 1]} : vector<32x128xf32> to vector<32x10xf32>
      %37 = vector.extract_strided_slice %34 {offsets = [0, 10], sizes = [32, 10], strides = [1, 1]} : vector<32x128xf32> to vector<32x10xf32>
      %cst_22 = arith.constant 5.000000e-01 : f32
      %38 = vector.broadcast %cst_22 : f32 to vector<32x10xf32>
      %39 = arith.mulf %38, %37 : vector<32x10xf32>
      %40 = math.exp %39 : vector<32x10xf32>
      %c0_23 = arith.constant 0 : index
      %c0_24 = arith.constant 0 : index
      %41 = vector.load %arg3[%c0_23, %c0_24] : memref<32x128xf32, #tpu.memory_space<vmem>>, vector<32x10xf32>
      %42 = arith.mulf %40, %41 : vector<32x10xf32>
      %43 = arith.addf %36, %42 : vector<32x10xf32>
      %c0_25 = arith.constant 0 : index
      %c0_26 = arith.constant 0 : index
      %44 = vector.load %arg7[%c0_25, %c0_26] : memref<10x128xf32, #tpu.memory_space<vmem>>, vector<10x128xf32>
      %cst_27 = arith.constant dense<0.000000e+00> : vector<32x128xf32>
      %45 = tpu.matmul %43, %44, %cst_27 {dimension_numbers = #tpu.dot_dimension_numbers<[1], [0], [0], [1], [0, 0, 1, 1], [], []>} : vector<32x10xf32>, vector<10x128xf32>, vector<32x128xf32> -> vector<32x128xf32>
      %c0_28 = arith.constant 0 : index
      %c384 = arith.constant 384 : index
      %46 = vector.load %arg10[%c0_28, %c384] : memref<1x3200xf32, #tpu.memory_space<vmem>>, vector<1x128xf32>
      %47 = vector.broadcast %46 : vector<1x128xf32> to vector<32x128xf32>
      %48 = arith.addf %45, %47 : vector<32x128xf32>
      %49 = arith.index_cast %1 : i32 to index
      %c0_29 = arith.constant 0 : index
      %50 = vector.load %arg13[%49, %c0_29] : memref<64x128xf32, #tpu.memory_space<vmem>>, vector<32x128xf32>
      tpu.vector_store %arg13[%49, %c0_29], %48 {strides = array<i32>} : memref<64x128xf32, #tpu.memory_space<vmem>>, vector<32x128xf32>,
    } else {
    }
    %c1_i32 = arith.constant 1 : i32
    %5 = arith.cmpi eq, %arg0, %c1_i32 : i32
    %c0_i32_1 = arith.constant 0 : i32
    %6 = arith.cmpi eq, %arg1, %c0_i32_1 : i32
    %7 = arith.andi %5, %6 : i1
    %8 = arith.extui %7 : i1 to i32
    %c0_i32_2 = arith.constant 0 : i32
    %9 = arith.cmpi ne, %8, %c0_i32_2 : i32
    scf.if %9 {
      %13 = tpu.iota {dimensions = array<i32: 0>} : vector<64x1xi32>
      %c48_i32 = arith.constant 48 : i32
      %14 = vector.broadcast %c48_i32 : i32 to vector<64x1xi32>
      %15 = arith.cmpi slt, %13, %14 : vector<64x1xi32>
      %c0 = arith.constant 0 : index
      %c0_5 = arith.constant 0 : index
      %16 = vector.load %arg13[%c0, %c0_5] : memref<64x128xf32, #tpu.memory_space<vmem>>, vector<64x128xf32>
      %c0_6 = arith.constant 0 : index
      %c512 = arith.constant 512 : index
      %17 = vector.load %arg10[%c0_6, %c512] : memref<1x3200xf32, #tpu.memory_space<vmem>>, vector<1x128xf32>
      %c0_7 = arith.constant 0 : index
      %c640 = arith.constant 640 : index
      %18 = vector.load %arg10[%c0_7, %c640] : memref<1x3200xf32, #tpu.memory_space<vmem>>, vector<1x128xf32>
      %cst = arith.constant 0.000000e+00 : f32
      %19 = vector.shape_cast %15 : vector<64x1xi1> to vector<64x1xi1>
      %20 = vector.broadcast %19 : vector<64x1xi1> to vector<64x128xi1>
      %21 = vector.broadcast %cst : f32 to vector<64x128xf32>
      %22 = arith.select %20, %16, %21 : vector<64x128xi1>, vector<64x128xf32>
      %cst_8 = arith.constant dense<0.000000e+00> : vector<128xf32>
      %23 = vector.multi_reduction <add>, %22, %cst_8 [0] : vector<64x128xf32> to vector<128xf32>
      %24 = vector.shape_cast %23 : vector<128xf32> to vector<1x128xf32>
      %cst_9 = arith.constant 0.020833334 : f32
      %25 = vector.broadcast %cst_9 : f32 to vector<1x128xf32>
      %26 = arith.mulf %24, %25 : vector<1x128xf32>
      %27 = vector.broadcast %26 : vector<1x128xf32> to vector<64x128xf32>
      %28 = arith.subf %16, %27 : vector<64x128xf32>
      %29 = arith.mulf %28, %28 : vector<64x128xf32>
      %cst_10 = arith.constant 0.000000e+00 : f32
      %30 = vector.shape_cast %15 : vector<64x1xi1> to vector<64x1xi1>
      %31 = vector.broadcast %30 : vector<64x1xi1> to vector<64x128xi1>
      %32 = vector.broadcast %cst_10 : f32 to vector<64x128xf32>
      %33 = arith.select %31, %29, %32 : vector<64x128xi1>, vector<64x128xf32>
      %cst_11 = arith.constant dense<0.000000e+00> : vector<128xf32>
      %34 = vector.multi_reduction <add>, %33, %cst_11 [0] : vector<64x128xf32> to vector<128xf32>
      %35 = vector.shape_cast %34 : vector<128xf32> to vector<1x128xf32>
      %cst_12 = arith.constant 0.020833334 : f32
      %36 = vector.broadcast %cst_12 : f32 to vector<1x128xf32>
      %37 = arith.mulf %35, %36 : vector<1x128xf32>
      %38 = vector.broadcast %26 : vector<1x128xf32> to vector<64x128xf32>
      %39 = arith.subf %16, %38 : vector<64x128xf32>
      %40 = vector.broadcast %17 : vector<1x128xf32> to vector<64x128xf32>
      %41 = arith.mulf %40, %39 : vector<64x128xf32>
      %cst_13 = arith.constant 9.99999974E-6 : f32
      %42 = vector.broadcast %cst_13 : f32 to vector<1x128xf32>
      %43 = arith.addf %37, %42 : vector<1x128xf32>
      %44 = math.rsqrt %43 : vector<1x128xf32>
      %45 = vector.broadcast %44 : vector<1x128xf32> to vector<64x128xf32>
      %46 = arith.mulf %41, %45 : vector<64x128xf32>
      %47 = vector.broadcast %18 : vector<1x128xf32> to vector<64x128xf32>
      %48 = arith.addf %46, %47 : vector<64x128xf32>
      %cst_14 = arith.constant 0.000000e+00 : f32
      %49 = vector.broadcast %cst_14 : f32 to vector<64x128xf32>
      %50 = arith.maximumf %48, %49 : vector<64x128xf32>
      %51 = arith.truncf %50 : vector<64x128xf32> to vector<64x128xbf16>
      %c0_15 = arith.constant 0 : index
      %c0_16 = arith.constant 0 : index
      %52 = vector.load %arg8[%c0_15, %c0_16] : memref<128x128xbf16, #tpu.memory_space<vmem>>, vector<128x128xbf16>
      %cst_17 = arith.constant dense<0.000000e+00> : vector<64x128xf32>
      %53 = tpu.matmul %51, %52, %cst_17 {dimension_numbers = #tpu.dot_dimension_numbers<[1], [0], [0], [1], [0, 0, 1, 1], [], []>} : vector<64x128xbf16>, vector<128x128xbf16>, vector<64x128xf32> -> vector<64x128xf32>
      %c0_18 = arith.constant 0 : index
      %c768 = arith.constant 768 : index
      %54 = vector.load %arg10[%c0_18, %c768] : memref<1x3200xf32, #tpu.memory_space<vmem>>, vector<1x128xf32>
      %55 = vector.broadcast %54 : vector<1x128xf32> to vector<64x128xf32>
      %56 = arith.addf %53, %55 : vector<64x128xf32>
      %c0_19 = arith.constant 0 : index
      %c896 = arith.constant 896 : index
      %57 = vector.load %arg10[%c0_19, %c896] : memref<1x3200xf32, #tpu.memory_space<vmem>>, vector<1x128xf32>
      %c0_20 = arith.constant 0 : index
      %c1024 = arith.constant 1024 : index
      %58 = vector.load %arg10[%c0_20, %c1024] : memref<1x3200xf32, #tpu.memory_space<vmem>>, vector<1x128xf32>
      %cst_21 = arith.constant 0.000000e+00 : f32
      %59 = vector.shape_cast %15 : vector<64x1xi1> to vector<64x1xi1>
      %60 = vector.broadcast %59 : vector<64x1xi1> to vector<64x128xi1>
      %61 = vector.broadcast %cst_21 : f32 to vector<64x128xf32>
      %62 = arith.select %60, %56, %61 : vector<64x128xi1>, vector<64x128xf32>
      %cst_22 = arith.constant dense<0.000000e+00> : vector<128xf32>
      %63 = vector.multi_reduction <add>, %62, %cst_22 [0] : vector<64x128xf32> to vector<128xf32>
      %64 = vector.shape_cast %63 : vector<128xf32> to vector<1x128xf32>
      %cst_23 = arith.constant 0.020833334 : f32
      %65 = vector.broadcast %cst_23 : f32 to vector<1x128xf32>
      %66 = arith.mulf %64, %65 : vector<1x128xf32>
      %67 = vector.broadcast %66 : vector<1x128xf32> to vector<64x128xf32>
      %68 = arith.subf %56, %67 : vector<64x128xf32>
      %69 = arith.mulf %68, %68 : vector<64x128xf32>
      %cst_24 = arith.constant 0.000000e+00 : f32
      %70 = vector.shape_cast %15 : vector<64x1xi1> to vector<64x1xi1>
      %71 = vector.broadcast %70 : vector<64x1xi1> to vector<64x128xi1>
      %72 = vector.broadcast %cst_24 : f32 to vector<64x128xf32>
      %73 = arith.select %71, %69, %72 : vector<64x128xi1>, vector<64x128xf32>
      %cst_25 = arith.constant dense<0.000000e+00> : vector<128xf32>
      %74 = vector.multi_reduction <add>, %73, %cst_25 [0] : vector<64x128xf32> to vector<128xf32>
      %75 = vector.shape_cast %74 : vector<128xf32> to vector<1x128xf32>
      %cst_26 = arith.constant 0.020833334 : f32
      %76 = vector.broadcast %cst_26 : f32 to vector<1x128xf32>
      %77 = arith.mulf %75, %76 : vector<1x128xf32>
      %78 = vector.broadcast %66 : vector<1x128xf32> to vector<64x128xf32>
      %79 = arith.subf %56, %78 : vector<64x128xf32>
      %80 = vector.broadcast %57 : vector<1x128xf32> to vector<64x128xf32>
      %81 = arith.mulf %80, %79 : vector<64x128xf32>
      %cst_27 = arith.constant 9.99999974E-6 : f32
      %82 = vector.broadcast %cst_27 : f32 to vector<1x128xf32>
      %83 = arith.addf %77, %82 : vector<1x128xf32>
      %84 = math.rsqrt %83 : vector<1x128xf32>
      %85 = vector.broadcast %84 : vector<1x128xf32> to vector<64x128xf32>
      %86 = arith.mulf %81, %85 : vector<64x128xf32>
      %87 = vector.broadcast %58 : vector<1x128xf32> to vector<64x128xf32>
      %88 = arith.addf %86, %87 : vector<64x128xf32>
      %cst_28 = arith.constant 0.000000e+00 : f32
      %89 = vector.broadcast %cst_28 : f32 to vector<64x128xf32>
      %90 = arith.maximumf %88, %89 : vector<64x128xf32>
      %91 = arith.truncf %90 : vector<64x128xf32> to vector<64x128xbf16>
      %c0_29 = arith.constant 0 : index
      %c0_30 = arith.constant 0 : index
      %92 = vector.load %arg14[%c0_29, %c0_30] : memref<64x128xbf16, #tpu.memory_space<vmem>>, vector<64x128xbf16>
      tpu.vector_store %arg14[%c0_29, %c0_30], %91 {strides = array<i32>} : memref<64x128xbf16, #tpu.memory_space<vmem>>, vector<64x128xbf16>,
    } else {
    }
    %c1_i32_3 = arith.constant 1 : i32
    %10 = arith.cmpi eq, %arg0, %c1_i32_3 : i32
    %11 = arith.extui %10 : i1 to i32
    %c0_i32_4 = arith.constant 0 : i32
    %12 = arith.cmpi ne, %11, %c0_i32_4 : i32
    scf.if %12 {
      %13 = arith.index_cast %1 : i32 to index
      %c0 = arith.constant 0 : index
      %14 = vector.load %arg14[%13, %c0] : memref<64x128xbf16, #tpu.memory_space<vmem>>, vector<32x128xbf16>
      %c0_5 = arith.constant 0 : index
      %c0_6 = arith.constant 0 : index
      %15 = vector.load %arg9[%c0_5, %c0_6] : memref<128x2048xbf16, #tpu.memory_space<vmem>>, vector<128x2048xbf16>
      %cst = arith.constant dense<0.000000e+00> : vector<32x2048xf32>
      %16 = tpu.matmul %14, %15, %cst {dimension_numbers = #tpu.dot_dimension_numbers<[1], [0], [0], [1], [0, 0, 1, 1], [], []>} : vector<32x128xbf16>, vector<128x2048xbf16>, vector<32x2048xf32> -> vector<32x2048xf32>
      %c0_7 = arith.constant 0 : index
      %c1152 = arith.constant 1152 : index
      %17 = vector.load %arg10[%c0_7, %c1152] : memref<1x3200xf32, #tpu.memory_space<vmem>>, vector<1x2048xf32>
      %18 = vector.broadcast %17 : vector<1x2048xf32> to vector<32x2048xf32>
      %19 = arith.addf %16, %18 : vector<32x2048xf32>
      %c0_8 = arith.constant 0 : index
      %c0_9 = arith.constant 0 : index
      %20 = vector.load %arg12[%c0_8, %c0_9] : memref<32x2048xf32, #tpu.memory_space<vmem>>, vector<32x2048xf32>
      tpu.vector_store %arg12[%c0_8, %c0_9], %19 {strides = array<i32>} : memref<32x2048xf32, #tpu.memory_space<vmem>>, vector<32x2048xf32>,
    } else {
    }
    return
  }
  func.func @transform_0(%arg0: i32, %arg1: i32) -> (i32, i32) {
    %c1_i32 = arith.constant 1 : i32
    %0 = arith.subi %c1_i32, %arg0 : i32
    %1 = arith.muli %0, %arg1 : i32
    %c1_i32_0 = arith.constant 1 : i32
    %2 = arith.muli %arg0, %c1_i32_0 : i32
    %3 = arith.addi %1, %2 : i32
    %c0_i32 = arith.constant 0 : i32
    %c0_i32_1 = arith.constant 0 : i32
    return %3, %c0_i32 : i32, i32
  }
  func.func @transform_1(%arg0: i32, %arg1: i32) -> (i32, i32) {
    %c1_i32 = arith.constant 1 : i32
    %0 = arith.subi %c1_i32, %arg0 : i32
    %1 = arith.muli %0, %arg1 : i32
    %c1_i32_0 = arith.constant 1 : i32
    %2 = arith.muli %arg0, %c1_i32_0 : i32
    %3 = arith.addi %1, %2 : i32
    %c0_i32 = arith.constant 0 : i32
    %c0_i32_1 = arith.constant 0 : i32
    return %3, %c0_i32 : i32, i32
  }
  func.func @transform_2(%arg0: i32, %arg1: i32) -> (i32, i32) {
    %c0_i32 = arith.constant 0 : i32
    %c0_i32_0 = arith.constant 0 : i32
    %c0_i32_1 = arith.constant 0 : i32
    return %c0_i32, %c0_i32_0 : i32, i32
  }
  func.func @transform_3(%arg0: i32, %arg1: i32) -> (i32, i32) {
    %c0_i32 = arith.constant 0 : i32
    %c0_i32_0 = arith.constant 0 : i32
    %c0_i32_1 = arith.constant 0 : i32
    return %c0_i32, %c0_i32_0 : i32, i32
  }
  func.func @transform_4(%arg0: i32, %arg1: i32) -> (i32, i32) {
    %c0_i32 = arith.constant 0 : i32
    %c0_i32_0 = arith.constant 0 : i32
    %c0_i32_1 = arith.constant 0 : i32
    return %c0_i32, %c0_i32_0 : i32, i32
  }
  func.func @transform_5(%arg0: i32, %arg1: i32) -> (i32, i32) {
    %c0_i32 = arith.constant 0 : i32
    %c0_i32_0 = arith.constant 0 : i32
    %c0_i32_1 = arith.constant 0 : i32
    return %c0_i32, %c0_i32_0 : i32, i32
  }
  func.func @transform_6(%arg0: i32, %arg1: i32) -> (i32, i32) {
    %c0_i32 = arith.constant 0 : i32
    %c0_i32_0 = arith.constant 0 : i32
    %c0_i32_1 = arith.constant 0 : i32
    return %c0_i32, %c0_i32_0 : i32, i32
  }
  func.func @transform_7(%arg0: i32, %arg1: i32) -> (i32, i32) {
    %c0_i32 = arith.constant 0 : i32
    %c0_i32_0 = arith.constant 0 : i32
    %c0_i32_1 = arith.constant 0 : i32
    return %c0_i32, %c0_i32_0 : i32, i32
  }
  func.func @transform_8(%arg0: i32, %arg1: i32) -> (i32, i32) {
    %c0_i32 = arith.constant 0 : i32
    %c0_i32_0 = arith.constant 0 : i32
    %c0_i32_1 = arith.constant 0 : i32
    return %c0_i32, %c0_i32_0 : i32, i32
  }
  func.func @transform_9(%arg0: i32, %arg1: i32) -> (i32, i32) {
    %c1_i32 = arith.constant 1 : i32
    %0 = arith.subi %c1_i32, %arg0 : i32
    %1 = arith.muli %0, %arg1 : i32
    %c1_i32_0 = arith.constant 1 : i32
    %2 = arith.muli %arg0, %c1_i32_0 : i32
    %3 = arith.addi %1, %2 : i32
    %c0_i32 = arith.constant 0 : i32
    %c0_i32_1 = arith.constant 0 : i32
    return %3, %c0_i32 : i32, i32
  }
  func.func @transform_10(%arg0: i32, %arg1: i32) -> (i32, i32) {
    %0 = arith.muli %arg0, %arg1 : i32
    %c0_i32 = arith.constant 0 : i32
    %c0_i32_0 = arith.constant 0 : i32
    return %0, %c0_i32 : i32, i32
  }
}

</mosaic_0001>

<bundles_post_ra>
// kernel: tpu_custom_call.1
= control target key start
LH: loop header
LB: loop body
LE: loop exit
PB: predicated region body
PF: predicated region fallthrough
CT: control target
= control target key end

     0   :  { %s6969_s0 = inlined_call_operand.hbm [shape: bf16[64,2048], index: 0, kind: input, shape index: {}]   ;;  %s6970_s1 = inlined_call_operand.hbm [shape: f32[64,128], index: 1, kind: input, shape index: {}]   ;;  %s6971_s2 = inlined_call_operand.hbm [shape: bf16[2048,128], index: 2, kind: input, shape index: {}]   ;;  %s6972_s3 = inlined_call_operand.hbm [shape: bf16[128,128], index: 3, kind: input, shape index: {}]   ;;  %s6973_s4 = inlined_call_operand.hbm [shape: bf16[128,128], index: 4, kind: input, shape index: {}]   ;;  %s6974_s5 = inlined_call_operand.hbm [shape: f32[10,128], index: 5, kind: input, shape index: {}]   ;;  %s6975_s6 = inlined_call_operand.hbm [shape: bf16[128,128], index: 6, kind: input, shape index: {}]   ;;  %s6976_s7 = inlined_call_operand.hbm [shape: bf16[128,2048], index: 7, kind: input, shape index: {}]   ;;  %s6977_s8 = inlined_call_operand.hbm [shape: f32[1,3200], index: 8, kind: input, shape index: {}]   ;;  %s6978_s9 = inlined_call_operand.hbm [shape: f32[64,128], index: 9, kind: output, shape index: {0}]   ;;  %s6979_s10 = inlined_call_operand.hbm [shape: f32[64,2048], index: 10, kind: output, shape index: {1}]  }
   0x1   :  { %6999 = sst [smem:[#allocation40_spill]] %s6969_s0 }
   0x2   :  { %7000 = sst [smem:[#allocation41_spill]] %s6971_s2 }
   0x3   :  { %7001 = sst [smem:[#allocation42_spill]] %s6972_s3 }
   0x4   :  { %7002 = sst [smem:[#allocation43_spill]] %s6973_s4 }
   0x5   :  { %7003 = sst [smem:[#allocation44_spill]] %s6974_s5 }
   0x6   :  { %7004 = sst [smem:[#allocation45_spill]] %s6975_s6 }
   0x7   :  { %7005 = sst [smem:[#allocation46_spill]] %s6976_s7 }
   0x8   :  { %7006 = sst [smem:[#allocation47_spill]] %s6977_s8 }
   0x9   :  { %7007 = sst [smem:[#allocation48_spill]] %s6978_s9 }
   0xa   :  { %7008 = sst [smem:[#allocation49_spill]] %s6979_s10 }
   0xb   :  { %16 = vsyncpa [#allocation5], 0 }
   0xc   :  { %18 = vsyncpa [#allocation5 + $0x1], 0 }
   0xd   :  { %19 = vsyncpa [#allocation8], 0 }
   0xe   :  { %21 = vsyncpa [#allocation8 + $0x1], 0 }
   0xf   :  { %22 = vsyncpa [#allocation11], 0 }
  0x10   :  { %23 = vsyncpa [#allocation14], 0 }
  0x11   :  { %24 = vsyncpa [#allocation17], 0 }
  0x12   :  { %25 = vsyncpa [#allocation6], 0 }
  0x13   :  { %27 = vsyncpa [#allocation6 + $0x1], 0 }
  0x14   :  { %28 = vsyncpa [#allocation21], 0 }
  0x15   :  { %30 = vsyncpa [#allocation21 + $0x1], 0  ;;  %s6307_s13 = smov 0   ;;  %s6309_s14 = smov 0  }
  0x16   :  { %s6311_s15 = smov 0   ;;  %s6313_s16 = smov 0  }
  0x17   :  { %s6315_s17 = smov 0   ;;  %s6317_s18 = smov 0  }
  0x18   :  { %s6319_s19 = smov 0   ;;  %s6321_s20 = smov 0  }
  0x19   :  { %s6323_s21 = smov 0   ;;  %s6325_s22 = smov 0  }
  0x1a   :  { %s6327_s23 = smov 0  }
  0x1b LB: > { %7009 = sst [smem:[#allocation30_spill]] %s6208_s18  ;;  %s6363_s24 = sadd.s32 4294967295, %s6228_s23   ;;  %s6228_s23 = sphi %s6327_s23, %s36_s23   ;;  %s6224_s22 = sphi %s6325_s22, %s7074_s22   ;;  %s6220_s21 = sphi %s6323_s21, %s7073_s21   ;;  %s6216_s20 = sphi %s6321_s20, %s7072_s20   ;;  %s6212_s19 = sphi %s6319_s19, %s7071_s19   ;;  %s6208_s18 = sphi %s6317_s18, %s7080_s18   ;;  %s6204_s17 = sphi %s6315_s17, %s7079_s17   ;;  %s6200_s16 = sphi %s6313_s16, %s7078_s16   ;;  %s6196_s15 = sphi %s6311_s15, %s7077_s15   ;;  %s6192_s14 = sphi %s6309_s14, %s7076_s14   ;;  %s6188_s13 = sphi %s6307_s13, %s7075_s13  }
  0x1c   : > { %7010 = sst [smem:[#allocation31_spill]] %s6212_s19  ;;  %p4690_p0 = scmp.ge.s32.totalorder %s6228_s23, 1 }
  0x1d   : > { %7011 = sst [smem:[#allocation32_spill]] %s6216_s20  ;;  %p6991_p1 = scmp.eq.s32.totalorder %s6363_s24, 0 }
  0x1e   : > { %7012 = sst [smem:[#allocation33_spill]] %s6220_s21  ;;  %p324_p2 = scmp.lt.s32.totalorder %s6228_s23, 5 }
  0x1f   : > { %7013 = sst [smem:[#allocation34_spill]] %s6224_s22  ;;  %s6230_s26 = smov [#allocation9]  }
  0x20   : > { %p6368_p3 = pnand %p4690_p0, %p324_p2  ;;  %s336_s27 = sshll.u32 %s6230_s26, 4  ;;  %s337_s27 = int_to_ptr.vmem [resolvable:$true] %s336_s27 }
  0x21   : > { %s6231_s29 = smov [#allocation10]   ;;  %s6232_s11 = smov [#allocation13]  }
  0x22   : > { %s7014_s25 = scalar_select %p6368_p3, 1, 0 }
  0x23   : > { %p5496_p4 = pneg %p6368_p3  ;;  %s349_s30 = sshll.u32 %s6231_s29, 4  ;;  %s350_s30 = int_to_ptr.vmem [resolvable:$true] %s349_s30 }
  0x24   : > { %7015 = sst [smem:[#allocation35_spill]] %s7014_s25  ;;  %s375_s12 = sshll.u32 %s6232_s11, 4  ;;  %s376_s12 = int_to_ptr.vmem [resolvable:$true] %s375_s12 }
  0x25   : > { %p6376_p5 = pnand %p5496_p4, %p6991_p1  ;;  %s5831_s26 = scalar_lea.vmem %s337_s27, 16384 }
  0x26   : > { %p5832_p7 = scmp.ne.s32.totalorder %s337_s27, %s5831_s26  ;;  %p5839_p10 = scmp.lt.s32.totalorder %s337_s27, %s337_s27 }
  0x27   : > { %p6382_p6 = pneg %p6376_p5  ;;  %p5840_p11 = scmp.lt.s32.totalorder %s5831_s26, %s5831_s26 }
  0x29   : > { %p5834_p8 = pnand %p5832_p7, %p6382_p6  ;;  %p5841_p12 = por %p5840_p11, %p5839_p10 }
  0x2b   : > { %p5835_p9 = pneg %p5834_p8 }
  0x2d   : > { %p5842_p13 = pnand %p5841_p12, %p5835_p9 }
  0x2f   : > { %5845 = shalt.err (!%p5842_p13)
}
  0x30   : > { %s6990_s29 = smov 64   ;;  %s6985_s11 = smov 4  }
  0x31   : > { %s7018_s2 = sld [smem:[#allocation41_spill]]  ;;  %s5857_s19 = scalar_lea.vmem %s350_s30, 1024 }
  0x32   : > { %p5858_p0 = scmp.ne.s32.totalorder %s350_s30, %s5857_s19  ;;  %p5865_p7 = scmp.lt.s32.totalorder %s350_s30, %s350_s30 }
  0x33   : > { %p5866_p8 = scmp.lt.s32.totalorder %s5857_s19, %s5857_s19 }
  0x34   : > { %p5860_p2 = pnand %p5858_p0, %p6382_p6 }
  0x35   : > { %p5867_p9 = por %p5866_p8, %p5865_p7 }
  0x36   : > { %p5861_p4 = pneg %p5860_p2 }
  0x37   : > { %5499 = dma.hbm_to_vmem [thread:$0]  (!%p6376_p5), %s7018_s2, 16384, %s337_s27, [#allocation8], %s6990_s29, %s6990_s29, %s6985_s11  }
  0x38   : > { %p5868_p10 = pnand %p5867_p9, %p5861_p4 }
  0x3a   : > { %5871 = shalt.err (!%p5868_p10)
}
  0x3b   : > { %s7019_s3 = sld [smem:[#allocation42_spill]]  ;;  %s5883_s9 = scalar_lea.vmem %s376_s12, 256 }
  0x3c   : > { %p5884_p11 = scmp.ne.s32.totalorder %s376_s12, %s5883_s9  ;;  %p5891_p0 = scmp.lt.s32.totalorder %s376_s12, %s376_s12 }
  0x3d   : > { %p5892_p2 = scmp.lt.s32.totalorder %s5883_s9, %s5883_s9 }
  0x3e   : > { %p5886_p12 = pnand %p5884_p11, %p6382_p6 }
  0x3f   : > { %p5893_p4 = por %p5892_p2, %p5891_p0 }
  0x40   : > { %p5887_p13 = pneg %p5886_p12 }
  0x41   : > { %5502 = dma.hbm_to_vmem [thread:$0]  (!%p6376_p5), %s7019_s3, 1024, %s350_s30, [#allocation11], %s6990_s29, %s6990_s29, %s6985_s11  }
  0x42   : > { %p5894_p7 = pnand %p5893_p4, %p5887_p13 }
  0x44   : > { %5897 = shalt.err (!%p5894_p7)
}
  0x45   : > { %s6987_s19 = smov 128   ;;  %s6988_s20 = smov 8  }
  0x46   : > { %s7020_s5 = sld [smem:[#allocation44_spill]]  ;;  %s6237_s30 = smov [#allocation16]  }
  0x47   : > { %s401_s26 = sshll.u32 %s6237_s30, 4  ;;  %s402_s26 = int_to_ptr.vmem [resolvable:$true] %s401_s26 }
  0x48   : > { %s5909_s11 = scalar_lea.vmem %s402_s26, 16384  ;;  %p5917_p11 = scmp.lt.s32.totalorder %s402_s26, %s402_s26 }
  0x49   : > { %p5910_p8 = scmp.ne.s32.totalorder %s402_s26, %s5909_s11  ;;  %p5918_p12 = scmp.lt.s32.totalorder %s5909_s11, %s5909_s11 }
  0x4b   : > { %p5912_p9 = pnand %p5910_p8, %p6382_p6  ;;  %p5919_p13 = por %p5918_p12, %p5917_p11 }
  0x4c   : > { %5508 = dma.hbm_to_vmem [thread:$0]  (!%p6376_p5), %s7020_s5, 256, %s376_s12, [#allocation14], %s6987_s19, %s6987_s19, %s6988_s20  }
  0x4d   : > { %p5913_p10 = pneg %p5912_p9 }
  0x4f   : > { %p5920_p0 = pnand %p5919_p13, %p5913_p10 }
  0x51   : > { %5923 = shalt.err (!%p5920_p0)
}
  0x52   : > { %s6989_s9 = smov 1024   ;;  %s7021_s7 = sld [smem:[#allocation46_spill]] }
  0x53   : > { %s6239_s27 = smov [#allocation12]   ;;  %s6240_s19 = smov [#allocation15]  }
  0x54   : > { %s362_s30 = sshll.u32 %s6239_s27, 4  ;;  %s388_s20 = sshll.u32 %s6240_s19, 4  ;;  %s363_s30 = int_to_ptr.vmem [resolvable:$true] %s362_s30  ;;  %s389_s20 = int_to_ptr.vmem [resolvable:$true] %s388_s20 }
  0x55   : > { %s5935_s11 = scalar_lea.vmem %s363_s30, 1024  ;;  %p5943_p8 = scmp.lt.s32.totalorder %s363_s30, %s363_s30 }
  0x56   : > { %p5936_p2 = scmp.ne.s32.totalorder %s363_s30, %s5935_s11  ;;  %p5944_p9 = scmp.lt.s32.totalorder %s5935_s11, %s5935_s11 }
  0x58   : > { %5514 = dma.hbm_to_vmem [thread:$0]  (!%p6376_p5), %s7021_s7, 16384, %s402_s26, [#allocation17], %s6989_s9, %s6989_s9, %s6990_s29  }
  0x59   : > { %p5938_p4 = pnand %p5936_p2, %p6382_p6  ;;  %p5945_p10 = por %p5944_p9, %p5943_p8 }
  0x5b   : > { %p5939_p7 = pneg %p5938_p4 }
  0x5d   : > { %p5946_p11 = pnand %p5945_p10, %p5939_p7 }
  0x5f   : > { %5949 = shalt.err (!%p5946_p11)
}
  0x60   : > { %s7022_s12 = smov 4   ;;  %s7023_s4 = sld [smem:[#allocation43_spill]] }
  0x61   : > { %s5961_s19 = scalar_lea.vmem %s389_s20, 1024  ;;  %p5969_p2 = scmp.lt.s32.totalorder %s389_s20, %s389_s20 }
  0x62   : > { %p5962_p12 = scmp.ne.s32.totalorder %s389_s20, %s5961_s19  ;;  %p5970_p4 = scmp.lt.s32.totalorder %s5961_s19, %s5961_s19 }
  0x64   : > { %p5964_p13 = pnand %p5962_p12, %p6382_p6  ;;  %p5971_p7 = por %p5970_p4, %p5969_p2 }
  0x66   : > { %5505 = dma.hbm_to_vmem [thread:$0]  (!%p6376_p5), %s7023_s4, 1024, %s363_s30, [#allocation11], %s6990_s29, %s6990_s29, %s7022_s12  }
  0x67   : > { %p5965_p0 = pneg %p5964_p13 }
  0x69   : > { %p5972_p8 = pnand %p5971_p7, %p5965_p0 }
  0x6b   : > { %5975 = shalt.err (!%p5972_p8)
}
  0x6c   : > { %s7024_s6 = sld [smem:[#allocation45_spill]]  ;;  %s6241_s30 = smov [#allocation18]  }
  0x6d   : > { %s415_s26 = sshll.u32 %s6241_s30, 4  ;;  %s416_s26 = int_to_ptr.vmem [resolvable:$true] %s415_s26 }
  0x6e   : > { %s5987_s25 = scalar_lea.vmem %s416_s26, 400  ;;  %s5994_s19 = scalar_lea.vmem %s416_s26, 416 }
  0x6f   : > { %p5988_p9 = scmp.ne.s32.totalorder %s416_s26, %s5987_s25  ;;  %p5995_p12 = scmp.lt.s32.totalorder %s416_s26, %s416_s26 }
  0x70   : > { %p5996_p13 = scmp.lt.s32.totalorder %s5994_s19, %s5987_s25 }
  0x71   : > { %p5990_p10 = pnand %p5988_p9, %p6382_p6 }
  0x72   : > { %5511 = dma.hbm_to_vmem [thread:$0]  (!%p6376_p5), %s7024_s6, 1024, %s389_s20, [#allocation14], %s6990_s29, %s6990_s29, %s7022_s12  }
  0x73   : > { %p5991_p11 = pneg %p5990_p10  ;;  %p5997_p0 = por %p5996_p13, %p5995_p12 }
  0x75   : > { %p5998_p2 = pnand %p5997_p0, %p5991_p11 }
  0x77   : > { %6001 = shalt.err (!%p5998_p2)
}
  0x78   : > { %s7025_s8 = sld [smem:[#allocation47_spill]]  ;;  %s4689_s10 = sadd.s32 4294967294, %s6228_s23  }
  0x79   : > { %s45_s28 = sadd.s32 1, %s6220_s21  ;;  %s48_s20 = sadd.s32 1, %s6224_s22 }
  0x7a   : > { %p46_p6 = scmp.ge.s32.totalorder %s45_s28, 2  ;;  %s52_s9 = ssub.s32 1, %s6224_s22 }
  0x7b   : > { %s61_s12 = sadd.s32 1, %s6208_s18  ;;  %s53_s11 = smul.u32 %s6220_s21, %s52_s9 }
  0x7c   : > { %s7082_s28 = smov (%p46_p6, %s45_s28), 0  ;;  %s7084_s20 = smov (!%p46_p6, %s48_s20), %s6224_s22 }
  0x7d   : > { %7026 = sst [smem:[#allocation36_spill]] %s7082_s28  ;;  %p68_p4 = scmp.ne.s32.totalorder %s6208_s18, %s6204_s17 }
  0x7e   : > { %5517 = dma.hbm_to_vmem [thread:$0]  (!%p6376_p5), %s7025_s8, 400, %s416_s26, [#allocation17]  }
  0x7f   : > { %p50_p7 = scmp.ge.s32.totalorder %s7084_s20, 2  ;;  %p69_p5 = scmp.eq.s32.totalorder %s6228_s23, 0 }
  0x80   : > { %s6466_s30 = sadd.s32 %s6224_s22, %s53_s11  ;;  %p74_p8 = scmp.ne.s32.totalorder %s6204_s17, %s6200_s16 }
  0x81   : > { %s7086_s20 = smov (%p50_p7, %s7084_s20), 0  ;;  %p6472_p9 = por %p69_p5, %p68_p4 }
  0x82   : > { %7027 = sst [smem:[#allocation37_spill]] %s7086_s20  ;;  %p6478_p10 = por %p6991_p1, %p74_p8 }
  0x83   : > { %s55_s19 = ssub.s32 1, %s7086_s20  ;;  %p283_p11 = scmp.eq.s32.totalorder %s6363_s24, 3 }
  0x84   : > { %s56_s27 = smul.u32 %s55_s19, %s7082_s28  ;;  %p6485_p12 = scmp.eq.s32.totalorder %s4689_s10, 3 }
  0x85   : > { %p6491_p13 = por %p283_p11, %p68_p4  ;;  %s295_s29 = smul.u32 %s6220_s21, %s6224_s22 }
  0x86   : > { %s57_s2 = sadd.s32 %s56_s27, %s7086_s20  ;;  %p6500_p0 = por %p6485_p12, %p74_p8 }
  0x87   : > { %s7031_s11 = scalar_select %p6491_p13, 1, 0 }
  0x88   : > { %s7032_s3 = scalar_select %p6500_p0, 1, 0 }
  0x89   : > { %s58_s10 = ssub.s32 %s6466_s30, %s57_s2  ;;  %s296_s19 = smul.u32 %s7086_s20, %s7082_s28 }
  0x8a   : > { %p59_p2 = scmp.eq.s32.totalorder %s58_s10, 0  ;;  %s300_s4 = sadd.s32 1, %s6196_s15 }
  0x8b   : > { %s297_s5 = ssub.s32 %s295_s29, %s296_s19  ;;  %p310_p6 = scmp.ne.s32.totalorder %s6196_s15, %s6192_s14 }
  0x8c   : > { %s6511_s6 = scalar_select %p59_p2, %s6208_s18, %s61_s12  }
  0x8d   : > { %p298_p4 = scmp.eq.s32.totalorder %s297_s5, 0  ;;  %p6515_p7 = por %p310_p6, %p283_p11 }
  0x8e   : > { %7033 = sst [smem:[#allocation38_spill]] %s6511_s6  ;;  %p316_p5 = scmp.ne.s32.totalorder %s6192_s14, %s6188_s13 }
  0x8f   : > { %s7034_s27 = scalar_select %p6515_p7, 1, 0 }
  0x90   : > { %p5539_p8 = scmp.lt.s32.totalorder %s6228_s23, 4  ;;  %p6527_p1 = por %p316_p5, %p6485_p12 }
  0x91   : > { %s6523_s7 = scalar_select %p298_p4, %s6196_s15, %s300_s4  }
  0x92   : > { %s7036_s2 = scalar_select %p6527_p1, 1, 0 }
  0x93   : > { %7035 = sst [smem:[#allocation39_spill]] %s6523_s7  ;;  %s6532_s29 = sand.u32 1, %s6208_s18  }
  0x94   : > { %s4699_s5 = sshll.u32 %s6532_s29, 8  ;;  %s5068_s12 = sshll.u32 %s6466_s30, 12 }
  0x95   : > { %s7037_s0 = sld [smem:[#allocation40_spill]]  ;;  %s430_s4 = scalar_lea.vmem [#allocation4], %s4699_s5 }
  0x96   : > { %s441_s9 = sshll.u32 %s430_s4, 4  ;;  %p6545_p11 = pnand %p5539_p8, %p6472_p9  ;;  %s6541_s9 = int_to_ptr.vmem [resolvable:$true] %s441_s9 }
  0x97   : > { %s4703_s22 = sshll.u32 %s6532_s29, 5  ;;  %s427_s21 = scalar_lea.sflag [#allocation5], %s6532_s29 }
  0x98   : > { %p6004_p2 = pneg %p6545_p11 }
  0x9b   : > { %s6539_s8 = scalar_lea.hbm %s7037_s0, %s5068_s12  ;;  %s6007_s26 = scalar_lea.hbm %s7037_s0, 8192 }
  0x9c   : > { %s6002_s6 = scalar_lea.hbm %s6539_s8, 4096 }
  0x9d   : > { %p6003_p12 = scmp.ne.s32.totalorder %s6539_s8, %s6002_s6  ;;  %p6009_p9 = scmp.lt.s32.totalorder %s6007_s26, %s6002_s6 }
  0x9f   : > { %p6005_p6 = pnand %p6004_p2, %p6003_p12 }
  0xa1   : > { %p6006_p4 = pneg %p6005_p6 }
  0xa3   : > { %p6011_p5 = pnand %p6009_p9, %p6006_p4 }
  0xa5   : > { %6014 = shalt.err (!%p6011_p5)
}
  0xa6   : > { %s6015_s10 = scalar_lea.vmem %s6541_s9, 4096  ;;  %s6242_s19 = smov [#allocation4]  }
  0xa7   : > { %p6016_p8 = scmp.ne.s32.totalorder %s6541_s9, %s6015_s10  ;;  %s6020_s4 = sshll.u32 %s6242_s19, 4  ;;  %s6021_s4 = int_to_ptr.vmem [resolvable:$false] %s6020_s4 }
  0xa8   : > { %s6022_s28 = scalar_lea.vmem %s6021_s4, 8192  ;;  %p6023_p12 = scmp.lt.s32.totalorder %s6541_s9, %s6021_s4 }
  0xa9   : > { %p6018_p1 = pnand %p6016_p8, %p6004_p2  ;;  %p6024_p6 = scmp.lt.s32.totalorder %s6022_s28, %s6015_s10 }
  0xab   : > { %p6019_p0 = pneg %p6018_p1  ;;  %p6025_p7 = por %p6024_p6, %p6023_p12 }
  0xad   : > { %p6026_p13 = pnand %p6025_p7, %p6019_p0 }
  0xaf   : > { %6029 = shalt.err (!%p6026_p13)
}
  0xb0   : > { %s7039_s6 = smov 64   ;;  %s7040_s5 = smov 1024  }
  0xb1   : > { %5521 = dma.hbm_to_vmem [thread:$0]  (!%p6545_p11), %s6539_s8, 4096, %s6541_s9, %s427_s21, %s7040_s5, %s7040_s5, %s7039_s6  }
  0xb2   : > { %s5069_s12 = sshll.u32 %s6466_s30, 9  ;;  %s455_s10 = scalar_lea.vmem [#allocation7], %s4703_s22 }
  0xb3   : > { %s6579_s28 = scalar_lea.hbm %s6970_s1, %s5069_s12  ;;  %s465_s4 = sshll.u32 %s455_s10, 4  ;;  %s466_s4 = int_to_ptr.vmem [resolvable:$true] %s465_s4 }
  0xb4   : > { %s7041_s0 = sand.u32 1, %s6228_s23   ;;  %s6030_s7 = scalar_lea.hbm %s6579_s28, 512 }
  0xb5   : > { %s452_s18 = scalar_lea.sflag [#allocation8], %s7041_s0  ;;  %p6031_p1 = scmp.ne.s32.totalorder %s6579_s28, %s6030_s7 }
  0xb6   : > { %s6035_s30 = scalar_lea.hbm %s6970_s1, 1024 }
  0xb7   : > { %p6033_p13 = pnand %p6031_p1, %p6004_p2  ;;  %p6037_p7 = scmp.lt.s32.totalorder %s6035_s30, %s6030_s7 }
  0xb9   : > { %p6034_p0 = pneg %p6033_p13 }
  0xbb   : > { %p6039_p4 = pnand %p6037_p7, %p6034_p0 }
  0xbd   : > { %6042 = shalt.err (!%p6039_p4)
}
  0xbe   : > { %s6043_s29 = scalar_lea.vmem %s466_s4, 512  ;;  %s6243_s0 = smov [#allocation7]  }
  0xbf   : > { %p6044_p9 = scmp.ne.s32.totalorder %s466_s4, %s6043_s29  ;;  %s6048_s22 = sshll.u32 %s6243_s0, 4  ;;  %s6049_s22 = int_to_ptr.vmem [resolvable:$false] %s6048_s22 }
  0xc0   : > { %s6050_s9 = scalar_lea.vmem %s6049_s22, 1024  ;;  %p6051_p12 = scmp.lt.s32.totalorder %s466_s4, %s6049_s22 }
  0xc1   : > { %p6046_p5 = pnand %p6044_p9, %p6004_p2  ;;  %p6052_p6 = scmp.lt.s32.totalorder %s6050_s9, %s6043_s29 }
  0xc3   : > { %p6047_p8 = pneg %p6046_p5  ;;  %p6053_p1 = por %p6052_p6, %p6051_p12 }
  0xc5   : > { %p6054_p13 = pnand %p6053_p1, %p6047_p8 }
  0xc7   : > { %6057 = shalt.err (!%p6054_p13)
}
  0xc8   : > { %s7042_s7 = smov 8   ;;  %s7043_s6 = smov 128  }
  0xc9   : > { %5524 = dma.hbm_to_vmem [thread:$0]  (!%p6545_p11), %s6579_s28, 512, %s466_s4, %s452_s18, %s7043_s6, %s7043_s6, %s7042_s7  }
  0xca   : > { %477 = sbr.rel (%p6368_p3) target bundleno = 2110 (0x83e), region = 56  ;;  %s6605_s12 = sand.u32 (!%p6368_p3), 1, %s6204_s17  }
  0xcb   : > { %s4707_s26 = sshll.u32 (!%p6368_p3), %s6605_s12, 8  ;;  %s480_s19 = scalar_lea.sflag (!%p6368_p3), [#allocation5], %s6605_s12 }
  0xcc   : > { %s6609_s10 = scalar_lea.vmem (!%p6368_p3), [#allocation4], %s4707_s26 }
  0xcf   : > { %6155 = dma.done.wait (%p6478_p10), %s480_s19, 4096  }
  0xd0   : > { %6157 = vsyncadd (%p6478_p10), %s480_s19, 4294963200  ;;  %s488_s18 = sand.u32 1, %s6363_s24   ;;  %s4708_s20 = sshll.u32 %s6605_s12, 5 }
  0xd1   : > { %s489_s28 = scalar_lea.sflag [#allocation8], %s488_s18  ;;  %s6617_s4 = scalar_lea.vmem [#allocation7], %s4708_s20 }
  0xd2   : > { %6159 = dma.done.wait (%p6478_p10), %s489_s28, 512  }
  0xd3   : > { %6161 = vsyncadd (%p6478_p10), %s489_s28, 4294966784  ;;  %p7045_p3 = scmp.eq.s32.totalorder %s6363_s24, 0 }
  0xd5   : > { %6163 = dma.done.wait (%p7045_p3), [#allocation8], 16384   ;;  %p7046_p11 = pmov %p7045_p3 }
  0xd6   : > { %p7047_p2 = pmov %p7045_p3 }
  0xd7   : > { %6165 = vsyncadd (%p7046_p11), [#allocation8], 4294950912 }
  0xd8   : > { %6167 = dma.done.wait (%p7047_p2), [#allocation11], 2048   ;;  %p7048_p0 = pmov %p7047_p2 }
  0xda   : > { %6169 = vsyncadd (%p7048_p0), [#allocation11], 4294965248  ;;  %p7049_p7 = pmov %p7048_p0 }
  0xdb   : > { %p7050_p4 = pmov %p7048_p0 }
  0xdc   : > { %6171 = dma.done.wait (%p7049_p7), [#allocation14], 1280  }
  0xdd   : > { %6173 = vsyncadd (%p7050_p4), [#allocation14], 4294966016  ;;  %p7051_p10 = pmov %p7048_p0 }
  0xde   : > { %p7052_p9 = pmov %p7048_p0 }
  0xdf   : > { %6175 = dma.done.wait (%p7051_p10), [#allocation17], 16784  }
  0xe0   : > { %6177 = vsyncadd (%p7052_p9), [#allocation17], 4294950512  ;;  %s7053_s25 = sld [smem:[#allocation31_spill]]  ;;  %s564_s8 = sand.u32 1, %s6192_s14  }
  0xe1   : > { %s4717_s21 = sshll.u32 %s564_s8, 9  ;;  %s6643_s29 = scalar_lea.vmem [#allocation19], %s4708_s20 }
  0xe2   : > { %s6645_s0 = scalar_lea.vmem [#allocation20], %s4717_s21  ;;  %s7054_s22 = sld [smem:[#allocation32_spill]] }
  0xe6   : > { %s4718_s30 = sshll.u32 %s7053_s25, 5 }
  0xe8   : > { %p4719_p5 = scmp.ne.s32.totalorder %s7054_s22, 0 }
  0xe9   : > { %s6244_s24 = smov (!%p4719_p5), 10   ;;  %s6245_s9 = smov (!%p4719_p5), 118  }
  0xea   : > { %586 = sbr.rel (%p4719_p5) target bundleno = 1328 (0x530), region = 96  ;;  %s2625_s6 = scalar_lea.vmem (!%p4719_p5), [#allocation2], %s4718_s30 }
  0xef   : > { %v5654_v0 = vld [vmem:[#allocation9 + $0x78] sm:$0xff]   ;;  %v5658_v4 = vld [vmem:[#allocation9 + $0x70] sm:$0xff]   ;;  %v5662_v8 = vld [vmem:[#allocation9 + $0x68] sm:$0xff]   ;;  %vm2536_vm0 = vcmask 1041408   ;;  %vm2523_vm1 = vcmask 80896  }
  0xf0   : > { %v5655_v1 = vld [vmem:[#allocation9 + $0xf8] sm:$0xff]   ;;  %5104 = vmatprep.subr.bf16.mxu0 %v5654_v0  ;;  %v5659_v5 = vld [vmem:[#allocation9 + $0xf0] sm:$0xff]   ;;  %v5663_v9 = vld [vmem:[#allocation9 + $0xe8] sm:$0xff]  }
  0xf1   : > { %v5656_v2 = vld [vmem:[#allocation9 + $0x38] sm:$0xff]   ;;  %5132 = vmatprep.subr.bf16.mxu1 %v5655_v1  ;;  %v5660_v6 = vld [vmem:[#allocation9 + $0x30] sm:$0xff]   ;;  %v5664_v10 = vld [vmem:[#allocation9 + $0x28] sm:$0xff]  }
  0xf2   : > { %v5657_v3 = vld [vmem:[#allocation9 + $0xb8] sm:$0xff]   ;;  %5105 = vmatpush3.bf16.msra.mxu0 %v5656_v2  ;;  %v5661_v7 = vld [vmem:[#allocation9 + $0xb0] sm:$0xff]   ;;  %v5665_v11 = vld [vmem:[#allocation9 + $0xa8] sm:$0xff]  }
  0xf3   : > { %5133 = vmatpush3.bf16.msra.mxu1 %v5657_v3  ;;  %5106 = vmatprep.subr.bf16.mxu0 %v5658_v4  ;;  %v5666_v12 = vld [vmem:[#allocation9 + $0x60] sm:$0xff]   ;;  %v5670_v16 = vld [vmem:[#allocation9 + $0x58] sm:$0xff]   ;;  %v5674_v20 = vld [vmem:[#allocation9 + $0x50] sm:$0xff]  }
  0xf4   : > { %5134 = vmatprep.subr.bf16.mxu1 %v5659_v5  ;;  %v5667_v13 = vld [vmem:[#allocation9 + $0xe0] sm:$0xff]   ;;  %v5671_v17 = vld [vmem:[#allocation9 + $0xd8] sm:$0xff]   ;;  %v5675_v21 = vld [vmem:[#allocation9 + $0xd0] sm:$0xff]  }
  0xf5   : > { %v5668_v14 = vld [vmem:[#allocation9 + $0x20] sm:$0xff]   ;;  %v5672_v18 = vld [vmem:[#allocation9 + $0x18] sm:$0xff]   ;;  %v5676_v22 = vld [vmem:[#allocation9 + $0x10] sm:$0xff]  }
  0xf6   : > { %5107 = vmatpush3.bf16.msra.mxu0 %v5660_v6  ;;  %v5669_v15 = vld [vmem:[#allocation9 + $0xa0] sm:$0xff]   ;;  %v5673_v19 = vld [vmem:[#allocation9 + $0x98] sm:$0xff]   ;;  %v5677_v23 = vld [vmem:[#allocation9 + $0x90] sm:$0xff]  }
  0xf7   : > { %5135 = vmatpush3.bf16.msra.mxu1 %v5661_v7  ;;  %5108 = vmatprep.subr.bf16.mxu0 %v5662_v8  ;;  %v5678_v24 = vld [vmem:[#allocation9 + $0x48] sm:$0xff]   ;;  %v5682_v28 = vld [vmem:[#allocation9 + $0x40] sm:$0xff]   ;;  %v5686_v40 = vld [vmem:[#allocation9 + $0x178] sm:$0xff]  }
  0xf8   : > { %5136 = vmatprep.subr.bf16.mxu1 %v5663_v9  ;;  %v5679_v25 = vld [vmem:[#allocation9 + $0xc8] sm:$0xff]   ;;  %v5683_v29 = vld [vmem:[#allocation9 + $0xc0] sm:$0xff]   ;;  %v5687_v41 = vld [vmem:[#allocation9 + $0x1f8] sm:$0xff]  }
  0xf9   : > { %v5680_v26 = vld [vmem:[#allocation9 + $0x8] sm:$0xff]   ;;  %v5684_v30 = vld [vmem:[#allocation9] sm:$0xff]   ;;  %v5688_v42 = vld [vmem:[#allocation9 + $0x138] sm:$0xff]  }
  0xfa   : > { %5109 = vmatpush3.bf16.msra.mxu0 %v5664_v10  ;;  %v5681_v27 = vld [vmem:[#allocation9 + $0x88] sm:$0xff]   ;;  %v5685_v31 = vld [vmem:[#allocation9 + $0x80] sm:$0xff]   ;;  %v5689_v43 = vld [vmem:[#allocation9 + $0x1b8] sm:$0xff]  }
  0xfb   : > { %5137 = vmatpush3.bf16.msra.mxu1 %v5665_v11  ;;  %5110 = vmatprep.subr.bf16.mxu0 %v5666_v12  ;;  %v587_v32 = vld [vmem:[%s6609_s10] sm:$0xff]  ;;  %v588_v34 = vld [vmem:[%s6609_s10 + $0x8] sm:$0xff]  ;;  %v5690_v44 = vld [vmem:[#allocation9 + $0x170] sm:$0xff]  }
  0xfc   : > { %5138 = vmatprep.subr.bf16.mxu1 %v5667_v13  ;;  %v595_v33 = vld [vmem:[%s6609_s10 + $0x40] sm:$0xff]  ;;  %v596_v37 = vld [vmem:[%s6609_s10 + $0x48] sm:$0xff]  ;;  %v5691_v45 = vld [vmem:[#allocation9 + $0x1f0] sm:$0xff]  }
  0xfd   : > { %v4721_v35 = vcombine.low %v587_v32, %v595_v33  ;;  %v4722_v36 = vcombine.high %v587_v32, %v595_v33  ;;  %v4723_v38 = vcombine.low %v588_v34, %v596_v37  ;;  %v4724_v39 = vcombine.high %v588_v34, %v596_v37  ;;  %v5692_v46 = vld [vmem:[#allocation9 + $0x130] sm:$0xff]   ;;  %v5694_v48 = vld [vmem:[#allocation9 + $0x168] sm:$0xff]   ;;  %v5698_v52 = vld [vmem:[#allocation9 + $0x160] sm:$0xff]  }
  0xfe   : > { %5111 = vmatpush3.bf16.msra.mxu0 %v5668_v14  ;;  %v5693_v47 = vld [vmem:[#allocation9 + $0x1b0] sm:$0xff]   ;;  %v5695_v49 = vld [vmem:[#allocation9 + $0x1e8] sm:$0xff]   ;;  %v5699_v53 = vld [vmem:[#allocation9 + $0x1e0] sm:$0xff]  }
  0xff   : > { %5139 = vmatpush3.bf16.msra.mxu1 %v5669_v15  ;;  %5112 = vmatprep.subr.bf16.mxu0 %v5670_v16  ;;  %v5696_v50 = vld [vmem:[#allocation9 + $0x128] sm:$0xff]   ;;  %v5700_v54 = vld [vmem:[#allocation9 + $0x120] sm:$0xff]   ;;  %v5702_v56 = vld [vmem:[#allocation9 + $0x158] sm:$0xff]  }
 0x100   : > { %5140 = vmatprep.subr.bf16.mxu1 %v5671_v17  ;;  %1842 = vmatprep.mubr.bf16.mxu0 %v4722_v36  ;;  %v5697_v51 = vld [vmem:[#allocation9 + $0x1a8] sm:$0xff]   ;;  %v5701_v55 = vld [vmem:[#allocation9 + $0x1a0] sm:$0xff]   ;;  %v5703_v57 = vld [vmem:[#allocation9 + $0x1d8] sm:$0xff]  }
 0x101   : > { %1891 = vmatprep.mubr.bf16.mxu1 %v4724_v39  ;;  %v5704_v58 = vld [vmem:[#allocation9 + $0x118] sm:$0xff]   ;;  %v603_v60 = vld [vmem:[%s6609_s10 + $0x80] sm:$0xff]  ;;  %v604_v0 = vld [vmem:[%s6609_s10 + $0x88] sm:$0xff] }
 0x102   : > { %5113 = vmatpush3.bf16.msra.mxu0 %v5672_v18  ;;  %v5705_v59 = vld [vmem:[#allocation9 + $0x198] sm:$0xff]   ;;  %v611_v61 = vld [vmem:[%s6609_s10 + $0xc0] sm:$0xff]  ;;  %v612_v1 = vld [vmem:[%s6609_s10 + $0xc8] sm:$0xff] }
 0x103   : > { %5141 = vmatpush3.bf16.msra.mxu1 %v5673_v19  ;;  %5114 = vmatprep.subr.bf16.mxu0 %v5674_v20  ;;  %v4738_v62 = vcombine.high %v603_v60, %v611_v61  ;;  %v4737_v63 = vcombine.low %v603_v60, %v611_v61  ;;  %v4740_v2 = vcombine.high %v604_v0, %v612_v1  ;;  %v5706_v3 = vld [vmem:[#allocation9 + $0x150] sm:$0xff]   ;;  %v5710_v8 = vld [vmem:[#allocation9 + $0x148] sm:$0xff]   ;;  %v5714_v12 = vld [vmem:[#allocation9 + $0x140] sm:$0xff]  }
 0x104   : > { %5142 = vmatprep.subr.bf16.mxu1 %v5675_v21  ;;  %v4739_v4 = vcombine.low %v604_v0, %v612_v1  ;;  %v5707_v5 = vld [vmem:[#allocation9 + $0x1d0] sm:$0xff]   ;;  %v5711_v9 = vld [vmem:[#allocation9 + $0x1c8] sm:$0xff]   ;;  %v5715_v13 = vld [vmem:[#allocation9 + $0x1c0] sm:$0xff]  }
 0x105   : > { %v5708_v6 = vld [vmem:[#allocation9 + $0x110] sm:$0xff]   ;;  %v5712_v10 = vld [vmem:[#allocation9 + $0x108] sm:$0xff]   ;;  %v5716_v14 = vld [vmem:[#allocation9 + $0x100] sm:$0xff]  }
 0x106   : > { %5115 = vmatpush3.bf16.msra.mxu0 %v5676_v22  ;;  %v5709_v7 = vld [vmem:[#allocation9 + $0x190] sm:$0xff]   ;;  %v5713_v11 = vld [vmem:[#allocation9 + $0x188] sm:$0xff]   ;;  %v5717_v15 = vld [vmem:[#allocation9 + $0x180] sm:$0xff]  }
 0x107   : > { %5143 = vmatpush3.bf16.msra.mxu1 %v5677_v23  ;;  %5116 = vmatprep.subr.bf16.mxu0 %v5678_v24  ;;  %v589_v16 = vld [vmem:[%s6609_s10 + $0x10] sm:$0xff]  ;;  %v590_v18 = vld [vmem:[%s6609_s10 + $0x18] sm:$0xff]  ;;  %v5726_v36 = vld [vmem:[#allocation9 + $0x268] sm:$0xff]  }
 0x108   : > { %5144 = vmatprep.subr.bf16.mxu1 %v5679_v25  ;;  %v597_v17 = vld [vmem:[%s6609_s10 + $0x50] sm:$0xff]  ;;  %v598_v19 = vld [vmem:[%s6609_s10 + $0x58] sm:$0xff]  ;;  %v5727_v37 = vld [vmem:[#allocation9 + $0x2e8] sm:$0xff]  }
 0x109   : > { %v4725_v20 = vcombine.low %v589_v16, %v597_v17  ;;  %v4726_v21 = vcombine.high %v589_v16, %v597_v17  ;;  %v4727_v22 = vcombine.low %v590_v18, %v598_v19  ;;  %v4728_v23 = vcombine.high %v590_v18, %v598_v19  ;;  %v5718_v24 = vld [vmem:[#allocation9 + $0x278] sm:$0xff]   ;;  %v605_v32 = vld [vmem:[%s6609_s10 + $0x90] sm:$0xff]  ;;  %v5746_v60 = vld [vmem:[#allocation9 + $0x240] sm:$0xff]  }
 0x10a   : > { %5117 = vmatpush3.bf16.msra.mxu0 %v5680_v26  ;;  %v5719_v25 = vld [vmem:[#allocation9 + $0x2f8] sm:$0xff]   ;;  %v613_v33 = vld [vmem:[%s6609_s10 + $0xd0] sm:$0xff]  ;;  %v5747_v61 = vld [vmem:[#allocation9 + $0x2c0] sm:$0xff]  }
 0x10b   : > { %5145 = vmatpush3.bf16.msra.mxu1 %v5681_v27  ;;  %5118 = vmatprep.subr.bf16.mxu0 %v5682_v28  ;;  %v5720_v26 = vld [vmem:[#allocation9 + $0x238] sm:$0xff]   ;;  %v5722_v28 = vld [vmem:[#allocation9 + $0x270] sm:$0xff]   ;;  %v4742_v34 = vcombine.high %v605_v32, %v613_v33  ;;  %v591_v0 = vld [vmem:[%s6609_s10 + $0x20] sm:$0xff] }
 0x10c   : > { %5146 = vmatprep.subr.bf16.mxu1 %v5683_v29  ;;  %v5721_v27 = vld [vmem:[#allocation9 + $0x2b8] sm:$0xff]   ;;  %v5723_v29 = vld [vmem:[#allocation9 + $0x2f0] sm:$0xff]   ;;  %v599_v1 = vld [vmem:[%s6609_s10 + $0x60] sm:$0xff] }
 0x10d   : > { %v614_v39 = vld [vmem:[%s6609_s10 + $0xd8] sm:$0xff]  ;;  %v607_v16 = vld [vmem:[%s6609_s10 + $0xa0] sm:$0xff] }
 0x10e   : > { %5119 = vmatpush3.bf16.msra.mxu0 %v5684_v30  ;;  %v5724_v30 = vld [vmem:[#allocation9 + $0x230] sm:$0xff]   ;;  %v615_v17 = vld [vmem:[%s6609_s10 + $0xe0] sm:$0xff] }
 0x10f   : > { %5147 = vmatpush3.bf16.msra.mxu1 %v5685_v31  ;;  %5160 = vmatprep.subr.bf16.mxu0 %v5686_v40  ;;  %v5725_v31 = vld [vmem:[#allocation9 + $0x2b0] sm:$0xff]   ;;  %v4746_v18 = vcombine.high %v607_v16, %v615_v17  ;;  %v4745_v19 = vcombine.low %v607_v16, %v615_v17 }
 0x110   : > { %5188 = vmatprep.subr.bf16.mxu1 %v5687_v41  ;;  %v5728_v41 = vld [vmem:[#allocation9 + $0x228] sm:$0xff]  }
 0x111   : > { %1843 = vmatmul.mubr.bf16.vlgmr.msra.gmra.mxu0 %v4721_v35  ;;  %v4741_v35 = vcombine.low %v605_v32, %v613_v33  ;;  %v5766_v32 = vld [vmem:[#allocation9 + $0x358] sm:$0xff]  }
 0x112   : > { %1892 = vmatmul.mubr.bf16.vlgmr.msra.gmra.mxu1 %v4723_v38  ;;  %5161 = vmatpush3.bf16.msra.mxu0 %v5688_v42  ;;  %v606_v38 = vld [vmem:[%s6609_s10 + $0x98] sm:$0xff] }
 0x113   : > { %5189 = vmatpush3.bf16.msra.mxu1 %v5689_v43  ;;  %5162 = vmatprep.subr.bf16.mxu0 %v5690_v44  ;;  %v4744_v40 = vcombine.high %v606_v38, %v614_v39  ;;  %v4743_v42 = vcombine.low %v606_v38, %v614_v39  ;;  %v5729_v43 = vld [vmem:[#allocation9 + $0x2a8] sm:$0xff]   ;;  %v5730_v44 = vld [vmem:[#allocation9 + $0x260] sm:$0xff]   ;;  %v5767_v33 = vld [vmem:[#allocation9 + $0x3d8] sm:$0xff]  }
 0x114   : > { %5190 = vmatprep.subr.bf16.mxu1 %v5691_v45  ;;  %1850 = vmatprep.mubr.bf16.mxu0 %v4738_v62  ;;  %v5731_v45 = vld [vmem:[#allocation9 + $0x2e0] sm:$0xff]   ;;  %v5772_v38 = vld [vmem:[#allocation9 + $0x310] sm:$0xff]  }
 0x115   : > { %1899 = vmatprep.mubr.bf16.mxu1 %v4740_v2  ;;  %v5748_v62 = vld [vmem:[#allocation9 + $0x200] sm:$0xff]   ;;  %v4729_v2 = vcombine.low %v591_v0, %v599_v1  ;;  %v5773_v39 = vld [vmem:[#allocation9 + $0x390] sm:$0xff]  }
 0x116   : > { %5163 = vmatpush3.bf16.msra.mxu0 %v5692_v46  ;;  %v5732_v46 = vld [vmem:[#allocation9 + $0x220] sm:$0xff]  }
 0x117   : > { %5191 = vmatpush3.bf16.msra.mxu1 %v5693_v47  ;;  %5164 = vmatprep.subr.bf16.mxu0 %v5694_v48  ;;  %v5733_v47 = vld [vmem:[#allocation9 + $0x2a0] sm:$0xff]   ;;  %v5734_v48 = vld [vmem:[#allocation9 + $0x258] sm:$0xff]  }
 0x118   : > { %5192 = vmatprep.subr.bf16.mxu1 %v5695_v49  ;;  %v5735_v49 = vld [vmem:[#allocation9 + $0x2d8] sm:$0xff]  }
 0x119   : > { %1851 = vmatmul.mubr.bf16.gmra.mxu0 %v4737_v63  ;;  %v5749_v63 = vld [vmem:[#allocation9 + $0x280] sm:$0xff]  }
 0x11a   : > { %5165 = vmatpush3.bf16.msra.mxu0 %v5696_v50  ;;  %1900 = vmatmul.mubr.bf16.gmra.mxu1 %v4739_v4  ;;  %v5736_v50 = vld [vmem:[#allocation9 + $0x218] sm:$0xff]   ;;  %v592_v4 = vld [vmem:[%s6609_s10 + $0x28] sm:$0xff] }
 0x11b   : > { %5193 = vmatpush3.bf16.msra.mxu1 %v5697_v51  ;;  %5166 = vmatprep.subr.bf16.mxu0 %v5698_v52  ;;  %v5737_v51 = vld [vmem:[#allocation9 + $0x298] sm:$0xff]   ;;  %v5738_v52 = vld [vmem:[#allocation9 + $0x250] sm:$0xff]  }
 0x11c   : > { %5194 = vmatprep.subr.bf16.mxu1 %v5699_v53  ;;  %1940 = vmatprep.mubr.bf16.mxu0 %v4726_v21  ;;  %v5739_v53 = vld [vmem:[#allocation9 + $0x2d0] sm:$0xff]   ;;  %v5759_v21 = vld [vmem:[#allocation9 + $0x3e8] sm:$0xff]  }
 0x11d   : > { %1989 = vmatprep.mubr.bf16.mxu1 %v4728_v23  ;;  %v616_v23 = vld [vmem:[%s6609_s10 + $0xe8] sm:$0xff] }
 0x11e   : > { %5167 = vmatpush3.bf16.msra.mxu0 %v5700_v54  ;;  %v5740_v54 = vld [vmem:[#allocation9 + $0x210] sm:$0xff]  }
 0x11f   : > { %5195 = vmatpush3.bf16.msra.mxu1 %v5701_v55  ;;  %5168 = vmatprep.subr.bf16.mxu0 %v5702_v56  ;;  %v5741_v55 = vld [vmem:[#allocation9 + $0x290] sm:$0xff]   ;;  %v5742_v56 = vld [vmem:[#allocation9 + $0x248] sm:$0xff]  }
 0x120   : > { %5196 = vmatprep.subr.bf16.mxu1 %v5703_v57  ;;  %v5743_v57 = vld [vmem:[#allocation9 + $0x2c8] sm:$0xff]  }
 0x122   : > { %5169 = vmatpush3.bf16.msra.mxu0 %v5704_v58  ;;  %v5744_v58 = vld [vmem:[#allocation9 + $0x208] sm:$0xff]  }
 0x123   : > { %5197 = vmatpush3.bf16.msra.mxu1 %v5705_v59  ;;  %5170 = vmatprep.subr.bf16.mxu0 %v5706_v3  ;;  %v5745_v59 = vld [vmem:[#allocation9 + $0x288] sm:$0xff]   ;;  %v4730_v3 = vcombine.high %v591_v0, %v599_v1  ;;  %v5782_v0 = vld [vmem:[#allocation10 + $0x38] sm:$0xff]   ;;  %v5783_v1 = vld [vmem:[#allocation10 + $0x30] sm:$0xff]  }
 0x124   : > { %5198 = vmatprep.subr.bf16.mxu1 %v5707_v5  ;;  %v600_v5 = vld [vmem:[%s6609_s10 + $0x68] sm:$0xff] }
 0x126   : > { %5171 = vmatpush3.bf16.msra.mxu0 %v5708_v6  ;;  %v4731_v6 = vcombine.low %v592_v4, %v600_v5 }
 0x127   : > { %5199 = vmatpush3.bf16.msra.mxu1 %v5709_v7  ;;  %5172 = vmatprep.subr.bf16.mxu0 %v5710_v8  ;;  %v4732_v7 = vcombine.high %v592_v4, %v600_v5  ;;  %v5750_v8 = vld [vmem:[#allocation9 + $0x378] sm:$0xff]   ;;  %v5787_v5 = vld [vmem:[#allocation10 + $0x10] sm:$0xff]  }
 0x128   : > { %5200 = vmatprep.subr.bf16.mxu1 %v5711_v9  ;;  %v5751_v9 = vld [vmem:[#allocation9 + $0x3f8] sm:$0xff]  }
 0x129   : > { %v5786_v4 = vld [vmem:[#allocation10 + $0x18] sm:$0xff]  }
 0x12a   : > { %5173 = vmatpush3.bf16.msra.mxu0 %v5712_v10  ;;  %v5752_v10 = vld [vmem:[#allocation9 + $0x338] sm:$0xff]  }
 0x12b   : > { %5201 = vmatpush3.bf16.msra.mxu1 %v5713_v11  ;;  %5174 = vmatprep.subr.bf16.mxu0 %v5714_v12  ;;  %v5753_v11 = vld [vmem:[#allocation9 + $0x3b8] sm:$0xff]   ;;  %v5754_v12 = vld [vmem:[#allocation9 + $0x370] sm:$0xff]  }
 0x12c   : > { %5202 = vmatprep.subr.bf16.mxu1 %v5715_v13  ;;  %v5755_v13 = vld [vmem:[#allocation9 + $0x3f0] sm:$0xff]  }
 0x12e   : > { %5175 = vmatpush3.bf16.msra.mxu0 %v5716_v14  ;;  %v5756_v14 = vld [vmem:[#allocation9 + $0x330] sm:$0xff]  }
 0x12f   : > { %5203 = vmatpush3.bf16.msra.mxu1 %v5717_v15  ;;  %5216 = vmatprep.subr.bf16.mxu0 %v5718_v24  ;;  %v5757_v15 = vld [vmem:[#allocation9 + $0x3b0] sm:$0xff]  }
 0x130   : > { %5244 = vmatprep.subr.bf16.mxu1 %v5719_v25  ;;  %v5760_v25 = vld [vmem:[#allocation9 + $0x328] sm:$0xff]  }
 0x131   : > { %1941 = vmatmul.mubr.bf16.vlgmr.msra.gmra.mxu0 %v4725_v20  ;;  %v5758_v20 = vld [vmem:[#allocation9 + $0x368] sm:$0xff]  }
 0x132   : > { %1990 = vmatmul.mubr.bf16.vlgmr.msra.gmra.mxu1 %v4727_v22  ;;  %5217 = vmatpush3.bf16.msra.mxu0 %v5720_v26  ;;  %v608_v22 = vld [vmem:[%s6609_s10 + $0xa8] sm:$0xff] }
 0x133   : > { %5245 = vmatpush3.bf16.msra.mxu1 %v5721_v27  ;;  %5218 = vmatprep.subr.bf16.mxu0 %v5722_v28  ;;  %v4748_v24 = vcombine.high %v608_v22, %v616_v23  ;;  %v4747_v26 = vcombine.low %v608_v22, %v616_v23  ;;  %v5761_v27 = vld [vmem:[#allocation9 + $0x3a8] sm:$0xff]   ;;  %v5762_v28 = vld [vmem:[#allocation9 + $0x360] sm:$0xff]  }
 0x134   : > { %5246 = vmatprep.subr.bf16.mxu1 %v5723_v29  ;;  %1948 = vmatprep.mubr.bf16.mxu0 %v4742_v34  ;;  %v5763_v29 = vld [vmem:[#allocation9 + $0x3e0] sm:$0xff]   ;;  %v5768_v34 = vld [vmem:[#allocation9 + $0x318] sm:$0xff]  }
 0x135   : > { %1997 = vmatprep.mubr.bf16.mxu1 %v4744_v40  ;;  %v5774_v40 = vld [vmem:[#allocation9 + $0x348] sm:$0xff]  }
 0x136   : > { %5219 = vmatpush3.bf16.msra.mxu0 %v5724_v30  ;;  %v5764_v30 = vld [vmem:[#allocation9 + $0x320] sm:$0xff]  }
 0x137   : > { %5247 = vmatpush3.bf16.msra.mxu1 %v5725_v31  ;;  %5220 = vmatprep.subr.bf16.mxu0 %v5726_v36  ;;  %v5765_v31 = vld [vmem:[#allocation9 + $0x3a0] sm:$0xff]   ;;  %v5770_v36 = vld [vmem:[#allocation9 + $0x350] sm:$0xff]  }
 0x138   : > { %5248 = vmatprep.subr.bf16.mxu1 %v5727_v37  ;;  %v5771_v37 = vld [vmem:[#allocation9 + $0x3d0] sm:$0xff]  }
 0x139   : > { %1949 = vmatmul.mubr.bf16.gmra.mxu0 %v4741_v35  ;;  %v5769_v35 = vld [vmem:[#allocation9 + $0x398] sm:$0xff]  }
 0x13a   : > { %5221 = vmatpush3.bf16.msra.mxu0 %v5728_v41  ;;  %1998 = vmatmul.mubr.bf16.gmra.mxu1 %v4743_v42  ;;  %v5775_v41 = vld [vmem:[#allocation9 + $0x3c8] sm:$0xff]  }
 0x13b   : > { %5249 = vmatpush3.bf16.msra.mxu1 %v5729_v43  ;;  %5222 = vmatprep.subr.bf16.mxu0 %v5730_v44  ;;  %v5776_v42 = vld [vmem:[#allocation9 + $0x308] sm:$0xff]   ;;  %v5778_v44 = vld [vmem:[#allocation9 + $0x340] sm:$0xff]  }
 0x13c   : > { %5250 = vmatprep.subr.bf16.mxu1 %v5731_v45  ;;  %2038 = vmatprep.mubr.bf16.mxu0 %v4730_v3  ;;  %v5777_v43 = vld [vmem:[#allocation9 + $0x388] sm:$0xff]   ;;  %v5779_v45 = vld [vmem:[#allocation9 + $0x3c0] sm:$0xff]  }
 0x13d   : > { %2087 = vmatprep.mubr.bf16.mxu1 %v4732_v7  ;;  %v5785_v3 = vld [vmem:[#allocation10 + $0x20] sm:$0xff]  }
 0x13e   : > { %5223 = vmatpush3.bf16.msra.mxu0 %v5732_v46  ;;  %v5780_v46 = vld [vmem:[#allocation9 + $0x300] sm:$0xff]  }
 0x13f   : > { %5251 = vmatpush3.bf16.msra.mxu1 %v5733_v47  ;;  %5224 = vmatprep.subr.bf16.mxu0 %v5734_v48  ;;  %v5781_v47 = vld [vmem:[#allocation9 + $0x380] sm:$0xff]   ;;  %v593_v48 = vld [vmem:[%s6609_s10 + $0x30] sm:$0xff] }
 0x140   : > { %5252 = vmatprep.subr.bf16.mxu1 %v5735_v49  ;;  %v601_v49 = vld [vmem:[%s6609_s10 + $0x70] sm:$0xff]  ;;  %v5789_v7 = vld [vmem:[#allocation10] sm:$0xff]  }
 0x142   : > { %5225 = vmatpush3.bf16.msra.mxu0 %v5736_v50  ;;  %v594_v50 = vld [vmem:[%s6609_s10 + $0x38] sm:$0xff] }
 0x143   : > { %5253 = vmatpush3.bf16.msra.mxu1 %v5737_v51  ;;  %5226 = vmatprep.subr.bf16.mxu0 %v5738_v52  ;;  %v4733_v51 = vcombine.low %v593_v48, %v601_v49  ;;  %v4734_v52 = vcombine.high %v593_v48, %v601_v49 }
 0x144   : > { %5254 = vmatprep.subr.bf16.mxu1 %v5739_v53  ;;  %v602_v53 = vld [vmem:[%s6609_s10 + $0x78] sm:$0xff] }
 0x146   : > { %5227 = vmatpush3.bf16.msra.mxu0 %v5740_v54  ;;  %v609_v54 = vld [vmem:[%s6609_s10 + $0xb0] sm:$0xff] }
 0x147   : > { %5255 = vmatpush3.bf16.msra.mxu1 %v5741_v55  ;;  %5228 = vmatprep.subr.bf16.mxu0 %v5742_v56  ;;  %v617_v55 = vld [vmem:[%s6609_s10 + $0xf0] sm:$0xff]  ;;  %v4735_v56 = vcombine.low %v594_v50, %v602_v53 }
 0x148   : > { %5256 = vmatprep.subr.bf16.mxu1 %v5743_v57  ;;  %v4736_v57 = vcombine.high %v594_v50, %v602_v53  ;;  %v4720_v53 = vld [vmem:[#allocation18] ss:$0 sm:$0xff] }
 0x14a   : > { %5229 = vmatpush3.bf16.msra.mxu0 %v5744_v58  ;;  %v4750_v58 = vcombine.high %v609_v54, %v617_v55 }
 0x14b   : > { %5257 = vmatpush3.bf16.msra.mxu1 %v5745_v59  ;;  %5230 = vmatprep.subr.bf16.mxu0 %v5746_v60  ;;  %v610_v59 = vld [vmem:[%s6609_s10 + $0xb8] sm:$0xff] }
 0x14c   : > { %5258 = vmatprep.subr.bf16.mxu1 %v5747_v61  ;;  %v618_v60 = vld [vmem:[%s6609_s10 + $0xf8] sm:$0xff] }
 0x14d   : > { %v4752_v61 = vcombine.high %v610_v59, %v618_v60 }
 0x14e   : > { %5231 = vmatpush3.bf16.msra.mxu0 %v5748_v62  ;;  %v4749_v62 = vcombine.low %v609_v54, %v617_v55 }
 0x14f   : > { %5259 = vmatpush3.bf16.msra.mxu1 %v5749_v63  ;;  %5272 = vmatprep.subr.bf16.mxu0 %v5750_v8  ;;  %v4751_v63 = vcombine.low %v610_v59, %v618_v60  ;;  %v5790_v8 = vld [vmem:[#allocation12 + $0x38] sm:$0xff]  }
 0x150   : > { %5300 = vmatprep.subr.bf16.mxu1 %v5751_v9  ;;  %v5791_v9 = vld [vmem:[#allocation12 + $0x30] sm:$0xff]  }
 0x151   : > { %2039 = vmatmul.mubr.bf16.vlgmr.msra.gmra.mxu0 %v4729_v2  ;;  %v5784_v2 = vld [vmem:[#allocation10 + $0x28] sm:$0xff]  }
 0x152   : > { %2088 = vmatmul.mubr.bf16.vlgmr.msra.gmra.mxu1 %v4731_v6  ;;  %5273 = vmatpush3.bf16.msra.mxu0 %v5752_v10  ;;  %v5788_v6 = vld [vmem:[#allocation10 + $0x8] sm:$0xff]  }
 0x153   : > { %5301 = vmatpush3.bf16.msra.mxu1 %v5753_v11  ;;  %5274 = vmatprep.subr.bf16.mxu0 %v5754_v12  ;;  %v5792_v10 = vld [vmem:[#allocation12 + $0x28] sm:$0xff]   ;;  %v5793_v11 = vld [vmem:[#allocation12 + $0x20] sm:$0xff]   ;;  %v5794_v12 = vld [vmem:[#allocation12 + $0x18] sm:$0xff]  }
 0x154   : > { %5302 = vmatprep.subr.bf16.mxu1 %v5755_v13  ;;  %2046 = vmatprep.mubr.bf16.mxu0 %v4746_v18 }
 0x155   : > { %2095 = vmatprep.mubr.bf16.mxu1 %v4748_v24 }
 0x156   : > { %5275 = vmatpush3.bf16.msra.mxu0 %v5756_v14 }
 0x157   : > { %5303 = vmatpush3.bf16.msra.mxu1 %v5757_v15  ;;  %5276 = vmatprep.subr.bf16.mxu0 %v5758_v20 }
 0x158   : > { %5304 = vmatprep.subr.bf16.mxu1 %v5759_v21 }
 0x159   : > { %2047 = vmatmul.mubr.bf16.gmra.mxu0 %v4745_v19 }
 0x15a   : > { %5277 = vmatpush3.bf16.msra.mxu0 %v5760_v25  ;;  %2096 = vmatmul.mubr.bf16.gmra.mxu1 %v4747_v26 }
 0x15b   : > { %5305 = vmatpush3.bf16.msra.mxu1 %v5761_v27  ;;  %5278 = vmatprep.subr.bf16.mxu0 %v5762_v28 }
 0x15c   : > { %5306 = vmatprep.subr.bf16.mxu1 %v5763_v29  ;;  %2136 = vmatprep.mubr.bf16.mxu0 %v4734_v52 }
 0x15d   : > { %2185 = vmatprep.mubr.bf16.mxu1 %v4736_v57 }
 0x15e   : > { %5279 = vmatpush3.bf16.msra.mxu0 %v5764_v30 }
 0x15f   : > { %5307 = vmatpush3.bf16.msra.mxu1 %v5765_v31  ;;  %5280 = vmatprep.subr.bf16.mxu0 %v5766_v32 }
 0x160   : > { %5308 = vmatprep.subr.bf16.mxu1 %v5767_v33 }
 0x162   : > { %5281 = vmatpush3.bf16.msra.mxu0 %v5768_v34 }
 0x163   : > { %5309 = vmatpush3.bf16.msra.mxu1 %v5769_v35  ;;  %5282 = vmatprep.subr.bf16.mxu0 %v5770_v36 }
 0x164   : > { %5310 = vmatprep.subr.bf16.mxu1 %v5771_v37 }
 0x166   : > { %5283 = vmatpush3.bf16.msra.mxu0 %v5772_v38 }
 0x167   : > { %5311 = vmatpush3.bf16.msra.mxu1 %v5773_v39  ;;  %5284 = vmatprep.subr.bf16.mxu0 %v5774_v40 }
 0x168   : > { %5312 = vmatprep.subr.bf16.mxu1 %v5775_v41 }
 0x16a   : > { %5285 = vmatpush3.bf16.msra.mxu0 %v5776_v42 }
 0x16b   : > { %5313 = vmatpush3.bf16.msra.mxu1 %v5777_v43  ;;  %5286 = vmatprep.subr.bf16.mxu0 %v5778_v44 }
 0x16c   : > { %5314 = vmatprep.subr.bf16.mxu1 %v5779_v45 }
 0x16e   : > { %5287 = vmatpush3.bf16.msra.mxu0 %v5780_v46 }
 0x16f   : > { %5315 = vmatpush3.bf16.msra.mxu1 %v5781_v47  ;;  %5366 = vmatprep.subr.bf16.mxu0 %v5782_v0 }
 0x170   : > { %5386 = vmatprep.subr.bf16.mxu1 %v5790_v8 }
 0x171   : > { %2137 = vmatmul.mubr.bf16.vlgmr.msra.gmra.mxu0 %v4733_v51 }
 0x172   : > { %2186 = vmatmul.mubr.bf16.vlgmr.msra.gmra.mxu1 %v4735_v56  ;;  %2144 = vmatprep.mubr.bf16.mxu0 %v4750_v58 }
 0x173   : > { %2193 = vmatprep.mubr.bf16.mxu1 %v4752_v61  ;;  %5367 = vmatpush3.bf16.msra.mxu0 %v5782_v0 }
 0x174   : > { %5368 = vmatprep.subr.bf16.mxu0 %v5783_v1  ;;  %5387 = vmatpush3.bf16.msra.mxu1 %v5790_v8 }
 0x175   : > { %5388 = vmatprep.subr.bf16.mxu1 %v5791_v9 }
 0x177   : > { %5369 = vmatpush3.bf16.msra.mxu0 %v5783_v1 }
 0x178   : > { %5370 = vmatprep.subr.bf16.mxu0 %v5784_v2  ;;  %5389 = vmatpush3.bf16.msra.mxu1 %v5791_v9 }
 0x179   : > { %2145 = vmatmul.mubr.bf16.gmra.mxu0 %v4749_v62  ;;  %5390 = vmatprep.subr.bf16.mxu1 %v5792_v10 }
 0x17a   : > { %2194 = vmatmul.mubr.bf16.gmra.mxu1 %v4751_v63 }
 0x17b   : > { %5371 = vmatpush3.bf16.msra.mxu0 %v5784_v2 }
 0x17c   : > { %5372 = vmatprep.subr.bf16.mxu0 %v5785_v3  ;;  %5391 = vmatpush3.bf16.msra.mxu1 %v5792_v10 }
 0x17d   : > { %5392 = vmatprep.subr.bf16.mxu1 %v5793_v11 }
 0x17f   : > { %5373 = vmatpush3.bf16.msra.mxu0 %v5785_v3 }
 0x180   : > { %5374 = vmatprep.subr.bf16.mxu0 %v5786_v4  ;;  %5393 = vmatpush3.bf16.msra.mxu1 %v5793_v11 }
 0x181   : > { %5394 = vmatprep.subr.bf16.mxu1 %v5794_v12 }
 0x183   : > { %5375 = vmatpush3.bf16.msra.mxu0 %v5786_v4 }
 0x184   : > { %5376 = vmatprep.subr.bf16.mxu0 %v5787_v5  ;;  %5395 = vmatpush3.bf16.msra.mxu1 %v5794_v12 }
 0x187   : > { %5377 = vmatpush3.bf16.msra.mxu0 %v5787_v5 }
 0x188   : > { %5378 = vmatprep.subr.bf16.mxu0 %v5788_v6 }
 0x18b   : > { %5379 = vmatpush3.bf16.msra.mxu0 %v5788_v6 }
 0x18c   : > { %5380 = vmatprep.subr.bf16.mxu0 %v5789_v7 }
 0x18f   : > { %5381 = vmatpush3.bf16.msra.mxu0 %v5789_v7 }
 0x1d1   : > { %v5120_v13 = vpop.f32.mrf.mxu0 }
 0x1d2   : > { %v5148_v15 = vpop.f32.mrf.mxu1 }
 0x1d3   : > { %v5121_v14 = vpop.f32.mrf.mxu0 }
 0x1d4   : > { %v5149_v17 = vpop.f32.mrf.mxu1  ;;  %v5122_v52 = vadd.f32 %v5121_v14, %v5120_v13 }
 0x1d5   : > { %v5123_v16 = vpop.f32.mrf.mxu0  ;;  %v5150_v57 = vadd.f32 %v5149_v17, %v5148_v15 }
 0x1d6   : > { %v5151_v19 = vpop.f32.mrf.mxu1  ;;  %v1845_v56 = vadd.f32 %v5122_v52, %v4720_v53 }
 0x1d7   : > { %v5124_v18 = vpop.f32.mrf.mxu0 }
 0x1d8   : > { %v5152_v21 = vpop.f32.mrf.mxu1  ;;  %v5125_v58 = vadd.f32 %v5124_v18, %v5123_v16  ;;  %v1894_v63 = vadd.f32 %v5150_v57, %v1845_v56 }
 0x1d9   : > { %v5126_v20 = vpop.f32.mrf.mxu0  ;;  %v5153_v2 = vadd.f32 %v5152_v21, %v5151_v19 }
 0x1da   : > { %v5154_v23 = vpop.f32.mrf.mxu1  ;;  %v1848_v0 = vadd.f32 %v5125_v58, %v4720_v53 }
 0x1db   : > { %v5127_v22 = vpop.f32.mrf.mxu0 }
 0x1dc   : > { %v5155_v25 = vpop.f32.mrf.mxu1  ;;  %v5128_v61 = vadd.f32 %v5127_v22, %v5126_v20  ;;  %v1897_v10 = vadd.f32 %v5153_v2, %v1848_v0 }
 0x1dd   : > { %v5129_v24 = vpop.f32.mrf.mxu0  ;;  %v5156_v7 = vadd.f32 %v5155_v25, %v5154_v23 }
 0x1de   : > { %v5157_v27 = vpop.f32.mrf.mxu1  ;;  %v1853_v6 = vadd.f32 %v5128_v61, %v4720_v53 }
 0x1df   : > { %v5130_v26 = vpop.f32.mrf.mxu0 }
 0x1e0   : > { %v5158_v29 = vpop.f32.mrf.mxu1  ;;  %v5131_v8 = vadd.f32 %v5130_v26, %v5129_v24  ;;  %v1902_v16 = vadd.f32 %v5156_v7, %v1853_v6 }
 0x1e1   : > { %v5159_v18 = vadd.f32 %v5158_v29, %v5157_v27 }
 0x1e2   : > { %v1856_v17 = vadd.f32 %v5131_v8, %v4720_v53 }
 0x1f1   : > { %v5176_v28 = vpop.f32.mrf.mxu0 }
 0x1f2   : > { %v5204_v31 = vpop.f32.mrf.mxu1 }
 0x1f3   : > { %v5177_v30 = vpop.f32.mrf.mxu0 }
 0x1f4   : > { %v5205_v33 = vpop.f32.mrf.mxu1  ;;  %v5178_v60 = vadd.f32 %v5177_v30, %v5176_v28 }
 0x1f5   : > { %v5179_v32 = vpop.f32.mrf.mxu0  ;;  %v5206_v4 = vadd.f32 %v5205_v33, %v5204_v31 }
 0x1f6   : > { %v5207_v35 = vpop.f32.mrf.mxu1  ;;  %v1943_v3 = vadd.f32 %v5178_v60, %v1894_v63 }
 0x1f7   : > { %v5180_v34 = vpop.f32.mrf.mxu0 }
 0x1f8   : > { %v5208_v37 = vpop.f32.mrf.mxu1  ;;  %v5181_v5 = vadd.f32 %v5180_v34, %v5179_v32  ;;  %v1992_v14 = vadd.f32 %v5206_v4, %v1943_v3 }
 0x1f9   : > { %v5182_v36 = vpop.f32.mrf.mxu0  ;;  %v5209_v22 = vadd.f32 %v5208_v37, %v5207_v35 }
 0x1fa   : > { %v5210_v38 = vpop.f32.mrf.mxu1  ;;  %v1946_v15 = vadd.f32 %v5181_v5, %v1897_v10 }
 0x1fb   : > { %v5183_v39 = vpop.f32.mrf.mxu0 }
 0x1fc   : > { %v5211_v40 = vpop.f32.mrf.mxu1  ;;  %v5184_v13 = vadd.f32 %v5183_v39, %v5182_v36  ;;  %v1995_v24 = vadd.f32 %v5209_v22, %v1946_v15  ;;  %v1905_v36 = vadd.f32 %v5159_v18, %v1856_v17  ;;  %v5795_v22 = vld [vmem:[#allocation12 + $0x10] sm:$0xff]  }
 0x1fd   : > { %v5185_v41 = vpop.f32.mrf.mxu0  ;;  %v5212_v32 = vadd.f32 %v5211_v40, %v5210_v38  ;;  %5396 = vmatprep.subr.bf16.mxu1 %v5795_v22 }
 0x1fe   : > { %v6680_v42 = vpop.f32.mrf.mxu1  ;;  %v1951_v31 = vadd.f32 %v5184_v13, %v1902_v16  ;;  %5397 = vmatpush3.bf16.msra.mxu1 %v5795_v22 }
 0x1ff   : > { %v5186_v43 = vpop.f32.mrf.mxu0 }
 0x200   : > { %v5214_v45 = vpop.f32.mrf.mxu1  ;;  %v5187_v25 = vadd.f32 %v5186_v43, %v5185_v41  ;;  %v2000_v27 = vadd.f32 %v5212_v32, %v1951_v31  ;;  %v2472_v31 = vld [vmem:[%s6617_s4 + $0x10] sm:$0xff]  ;;  %v2473_v32 = vld [vmem:[%s6617_s4 + $0x18] sm:$0xff] }
 0x201   : > { %v5215_v37 = vadd.f32 %v5214_v45, %v6680_v42 }
 0x202   : > { %v1954_v35 = vadd.f32 %v5187_v25, %v1905_v36  ;;  %v4881_v25 = vld [vmem:[#allocation18 + $0x1] ss:$0 sm:$0xff] }
 0x204   : > { %v2003_v58 = vadd.f32 %v5215_v37, %v1954_v35 }
 0x211   : > { %v5232_v44 = vpop.f32.mrf.mxu0 }
 0x212   : > { %v5260_v46 = vpop.f32.mrf.mxu1 }
 0x213   : > { %v5233_v47 = vpop.f32.mrf.mxu0 }
 0x214   : > { %v5261_v48 = vpop.f32.mrf.mxu1  ;;  %v5234_v11 = vadd.f32 %v5233_v47, %v5232_v44 }
 0x215   : > { %v5235_v49 = vpop.f32.mrf.mxu0  ;;  %v5262_v19 = vadd.f32 %v5261_v48, %v5260_v46 }
 0x216   : > { %v5263_v50 = vpop.f32.mrf.mxu1  ;;  %v2041_v28 = vadd.f32 %v5234_v11, %v1992_v14 }
 0x217   : > { %v5236_v51 = vpop.f32.mrf.mxu0 }
 0x218   : > { %v5264_v54 = vpop.f32.mrf.mxu1  ;;  %v5237_v21 = vadd.f32 %v5236_v51, %v5235_v49  ;;  %v2090_v39 = vadd.f32 %v5262_v19, %v2041_v28  ;;  %v5796_v28 = vld [vmem:[#allocation12 + $0x8] sm:$0xff]   ;;  %v5797_v19 = vld [vmem:[#allocation12] sm:$0xff]  }
 0x219   : > { %v5238_v55 = vpop.f32.mrf.mxu0  ;;  %v5265_v46 = vadd.f32 %v5264_v54, %v5263_v50  ;;  %5398 = vmatprep.subr.bf16.mxu1 %v5796_v28 }
 0x21a   : > { %v5266_v59 = vpop.f32.mrf.mxu1  ;;  %v2044_v44 = vadd.f32 %v5237_v21, %v1995_v24  ;;  %5399 = vmatpush3.bf16.msra.mxu1 %v5796_v28  ;;  %v2470_v21 = vld [vmem:[%s6617_s4] sm:$0xff] }
 0x21b   : > { %v5239_v62 = vpop.f32.mrf.mxu0  ;;  %5400 = vmatprep.subr.bf16.mxu1 %v5797_v19  ;;  %2478 = vrot.lane.b32.xlu0 %v2470_v21, %s6244_s24 }
 0x21c   : > { %v5267_v1 = vpop.f32.mrf.mxu1  ;;  %v5240_v33 = vadd.f32 %v5239_v62, %v5238_v55  ;;  %v2093_v41 = vadd.f32 %v5265_v46, %v2044_v44  ;;  %v2515_v46 = vld [vmem:[#allocation13 + $0x8] sm:$0x3] }
 0x21d   : > { %v5241_v9 = vpop.f32.mrf.mxu0  ;;  %v5268_v40 = vadd.f32 %v5267_v1, %v5266_v59  ;;  %5406 = vmatprep.subr.msk.mxu0 %vm2536_vm0, %v2515_v46 }
 0x21e   : > { %v5269_v12 = vpop.f32.mrf.mxu1  ;;  %v2049_v38 = vadd.f32 %v5240_v33, %v2000_v27  ;;  %5401 = vmatpush3.bf16.msra.mxu1 %v5797_v19 }
 0x21f   : > { %v5242_v20 = vpop.f32.mrf.mxu0  ;;  %2482 = vrot.lane.b32.xlu0 %v2472_v31, %s6244_s24  ;;  %5440 = vmatprep.subr.msk.mxu1 %vm2536_vm0, %v2515_v46 }
 0x220   : > { %v5270_v30 = vpop.f32.mrf.mxu1  ;;  %v5243_v43 = vadd.f32 %v5242_v20, %v5241_v9  ;;  %v2098_v0 = vadd.f32 %v5268_v40, %v2049_v38 }
 0x221   : > { %v5271_v45 = vadd.f32 %v5270_v30, %v5269_v12  ;;  %v2471_v30 = vld [vmem:[%s6617_s4 + $0x8] sm:$0xff] }
 0x222   : > { %v2052_v42 = vadd.f32 %v5243_v43, %v2003_v58  ;;  %2480 = vrot.lane.b32.xlu1 %v2471_v30, %s6244_s24 }
 0x224   : > { %v2101_v8 = vadd.f32 %v5271_v45, %v2052_v42  ;;  %v2514_v42 = vld [vmem:[#allocation13] sm:$0xff] }
 0x226   : > { %2484 = vrot.lane.b32.xlu1 %v2473_v32, %s6244_s24 }
 0x231   : > { %v5288_v23 = vpop.f32.mrf.mxu0 }
 0x232   : > { %v5316_v26 = vpop.f32.mrf.mxu1 }
 0x233   : > { %v5289_v34 = vpop.f32.mrf.mxu0 }
 0x234   : > { %v5290_v47 = vadd.f32 %v5289_v34, %v5288_v23  ;;  %v5317_v52 = vpop.f32.mrf.mxu1 }
 0x235   : > { %v5291_v29 = vpop.f32.mrf.mxu0  ;;  %v5318_v53 = vadd.f32 %v5317_v52, %v5316_v26 }
 0x236   : > { %v2139_v48 = vadd.f32 %v5290_v47, %v2090_v39  ;;  %v5319_v49 = vpop.f32.mrf.mxu1 }
 0x237   : > { %v5292_v51 = vpop.f32.mrf.mxu0 }
 0x238   : > { %v5293_v55 = vadd.f32 %v5292_v51, %v5291_v29  ;;  %v5320_v56 = vpop.f32.mrf.mxu1  ;;  %v2188_v60 = vadd.f32 %v5318_v53, %v2139_v48  ;;  %v4890_v48 = vld [vmem:[#allocation18 + $0x2] ss:$0 sm:$0xff] }
 0x239   : > { %v5294_v57 = vpop.f32.mrf.mxu0  ;;  %v5321_v62 = vadd.f32 %v5320_v56, %v5319_v49 }
 0x23a   : > { %v2142_v61 = vadd.f32 %v5293_v55, %v2093_v41  ;;  %v5322_v63 = vpop.f32.mrf.mxu1  ;;  %v2202_v1 = vmax.f32 %v2188_v60, 0.0 }
 0x23b   : > { %v5295_v2 = vpop.f32.mrf.mxu0 }
 0x23c   : > { %v2191_v50 = vadd.f32 %v5321_v62, %v2142_v61  ;;  %v5296_v54 = vadd.f32 %v5295_v2, %v5294_v57  ;;  %v5323_v3 = vpop.f32.mrf.mxu1 }
 0x23d   : > { %v5297_v59 = vpop.f32.mrf.mxu0  ;;  %v5324_v9 = vadd.f32 %v5323_v3, %v5322_v63 }
 0x23e   : > { %v2203_v4 = vmax.f32 %v2191_v50, 0.0  ;;  %v2147_v5 = vadd.f32 %v5296_v54, %v2098_v0  ;;  %v5325_v6 = vpop.f32.mrf.mxu1 }
 0x23f   : > { %v5298_v7 = vpop.f32.mrf.mxu0 }
 0x240   : > { %v5299_v10 = vadd.f32 %v5298_v7, %v5297_v59  ;;  %v5326_v11 = vpop.f32.mrf.mxu1  ;;  %v2206_v13 = vpack.c.bf16 %v2203_v4, %v2202_v1  ;;  %v2196_v14 = vadd.f32 %v5324_v9, %v2147_v5 }
 0x241   : > { %v5327_v16 = vadd.f32 %v5326_v11, %v5325_v6 }
 0x242   : > { %v2150_v15 = vadd.f32 %v5299_v10, %v2101_v8  ;;  %5382 = vmatprep.mubr.bf16.mxu0 %v2206_v13  ;;  %v2204_v17 = vmax.f32 %v2196_v14, 0.0 }
 0x244   : > { %v2199_v12 = vadd.f32 %v5327_v16, %v2150_v15 }
 0x246   : > { %v2205_v18 = vmax.f32 %v2199_v12, 0.0 }
 0x248   : > { %v2207_v20 = vpack.c.bf16 %v2205_v18, %v2204_v17  ;;  %v4899_v17 = vld [vmem:[#allocation18 + $0x3] ss:$0 sm:$0xff] }
 0x24a   : > { %5383 = vmatmul.mubr.bf16.vlgmr.msra.gmra.mxu0 %v2207_v20 }
 0x24b   : > { %5407 = vmatpush3.msk.msra.mxu0 %vm2536_vm0, %v2515_v46 }
 0x24c   : > { %5408 = vmatprep.subr.mxu0 %v2514_v42 }
 0x24d   : > { %5409 = vmatpush3.msra.mxu0 %v2514_v42 }
 0x28d   : > { %v2479_v2 = vpop.permute.xlu0 %2478 }
 0x291   : > { %v2483_v50 = vpop.permute.xlu0 %2482 }
 0x294   : > { %v2481_v45 = vpop.permute.xlu1 %2480 }
 0x298   : > { %v2485_v1 = vpop.permute.xlu1 %2484 }
 0x30a   : > { %v5384_v23 = vpop.f32.mrf.mxu0 }
 0x30b   : > { %v2322_v36 = vadd.f32 %v5384_v23, %v4881_v25 }
 0x30c   : > { %v2313_v24 = vpop.f32.mrf.mxu0 }
 0x30d   : > { %v2314_v33 = vadd.f32 %v4881_v25, %v2313_v24  ;;  %v2330_v29 = vmax.f32 %v2322_v36, 0.0 }
 0x30e   : > { %v5385_v26 = vpop.f32.mrf.mxu0 }
 0x30f   : > { %v2325_v34 = vadd.f32 %v5385_v26, %v4881_v25  ;;  %v2328_v52 = vmax.f32 %v2314_v33, 0.0 }
 0x310   : > { %v2316_v39 = vpop.f32.mrf.mxu0 }
 0x311   : > { %v2317_v44 = vadd.f32 %v4881_v25, %v2316_v39  ;;  %v2331_v47 = vmax.f32 %v2325_v34, 0.0 }
 0x313   : > { %v2329_v27 = vmax.f32 %v2317_v44, 0.0  ;;  %v2333_v37 = vpack.c.bf16 %v2331_v47, %v2330_v29 }
 0x315   : > { %v2332_v35 = vpack.c.bf16 %v2329_v27, %v2328_v52 }
 0x317   : > { %5402 = vmatprep.mubr.bf16.mxu1 %v2332_v35 }
 0x318   : > { %5403 = vmatmul.mubr.bf16.vlgmr.msra.gmra.mxu1 %v2333_v37 }
 0x319   : > { %5442 = vmatpush3.msk.msra.mxu1 %vm2536_vm0, %v2515_v46 }
 0x31a   : > { %5441 = vmatprep.subr.mxu1 %v2514_v42 }
 0x31b   : > { %5443 = vmatpush3.msra.mxu1 %v2514_v42 }
 0x3d8   : > { %v5404_v49 = vpop.f32.mrf.mxu1 }
 0x3d9   : > { %v2448_v38 = vadd.f32 %v5404_v49, %v4890_v48 }
 0x3da   : > { %v2439_v40 = vpop.f32.mrf.mxu1 }
 0x3db   : > { %2456 = vst [vmem:[%s6643_s29 + $0x10] sm:$0xff] %v2448_v38  ;;  %v2460_v51 = vmul.f32 0.5, %v2448_v38  ;;  %v2440_v41 = vadd.f32 %v4890_v48, %v2439_v40 }
 0x3dc   : > { %v5405_v43 = vpop.f32.mrf.mxu1 }
 0x3dd   : > { %v2466_v53 = vmul.f32 1.442695, %v2460_v51  ;;  %2454 = vst [vmem:[%s6643_s29] sm:$0xff] %v2440_v41  ;;  %v2458_v55 = vmul.f32 0.5, %v2440_v41  ;;  %v2451_v56 = vadd.f32 %v5405_v43, %v4890_v48 }
 0x3de   : > { %v2442_v57 = vpop.f32.mrf.mxu1 }
 0x3df   : > { %5798 = vpow2.f32 %v2466_v53  ;;  %v2462_v58 = vmul.f32 1.442695, %v2458_v55  ;;  %2457 = vst [vmem:[%s6643_s29 + $0x18] sm:$0xff] %v2451_v56  ;;  %v2461_v60 = vmul.f32 0.5, %v2451_v56  ;;  %v2443_v61 = vadd.f32 %v4890_v48, %v2442_v57 }
 0x3e1   : > { %5800 = vpow2.f32 %v2462_v58  ;;  %v2468_v62 = vmul.f32 1.442695, %v2461_v60  ;;  %2455 = vst [vmem:[%s6643_s29 + $0x8] sm:$0xff] %v2443_v61  ;;  %v2459_v63 = vmul.f32 0.5, %v2443_v61 }
 0x3e3   : > { %5802 = vpow2.f32 %v2468_v62  ;;  %v2464_v0 = vmul.f32 1.442695, %v2459_v63 }
 0x3e5   : > { %5804 = vpow2.f32 %v2464_v0 }
 0x3ec   : > { %v5799_v54 = vpop.eup %5798 }
 0x3ed   : > { %v2492_v3 = vmul.f32 %v5799_v54, %v2483_v50 }
 0x3ee   : > { %v5801_v59 = vpop.eup %5800 }
 0x3ef   : > { %v2490_v4 = vmul.f32 %v5801_v59, %v2479_v2  ;;  %2502 = vrot.lane.b32.xlu1 %v2492_v3, %s6245_s9 }
 0x3f0   : > { %v5803_v5 = vpop.eup %5802 }
 0x3f1   : > { %v2493_v6 = vmul.f32 %v5803_v5, %v2485_v1  ;;  %2498 = vrot.lane.b32.xlu0 %v2490_v4, %s6245_s9 }
 0x3f2   : > { %v5805_v7 = vpop.eup %5804 }
 0x3f3   : > { %v2491_v8 = vmul.f32 %v5805_v7, %v2481_v45  ;;  %2504 = vrot.lane.b32.xlu1 %v2493_v6, %s6245_s9 }
 0x3f5   : > { %2500 = vrot.lane.b32.xlu0 %v2491_v8, %s6245_s9 }
 0x461   : > { %v2503_v9 = vpop.permute.xlu1 %2502 }
 0x462   : > { %v2512_v10 = vadd.f32 %v2503_v9, %v2448_v38 }
 0x463   : > { %v2499_v11 = vpop.permute.xlu0 %2498 }
 0x464   : > { %v2510_v13 = vadd.f32 %v2499_v11, %v2440_v41  ;;  %5413 = vmatprep.mubr.msk.f32.mxu1 %vm2523_vm1, %v2512_v10 }
 0x465   : > { %v2505_v14 = vpop.permute.xlu1 %2504 }
 0x466   : > { %v2513_v15 = vadd.f32 %v2505_v14, %v2451_v56  ;;  %5410 = vmatprep.mubr.msk.f32.mxu0 %vm2523_vm1, %v2510_v13 }
 0x467   : > { %v2501_v16 = vpop.permute.xlu0 %2500 }
 0x468   : > { %v2511_v12 = vadd.f32 %v2501_v16, %v2443_v61  ;;  %5414 = vmatmul.mubr.msk.f32.vlgmr.msra.gmra.mxu1 %vm2523_vm1, %v2513_v15 }
 0x46a   : > { %5411 = vmatmul.mubr.msk.f32.vlgmr.msra.gmra.mxu0 %vm2523_vm1, %v2511_v12 }
 0x528   : > { %v5415_v18 = vpop.f32.mrf.mxu1 }
 0x529   : > { %v2622_v20 = vadd.f32 %v5415_v18, %v4899_v17 }
 0x52a   : > { %v5412_v22 = vpop.f32.mrf.mxu0  ;;  %v2616_v28 = vpop.f32.mrf.mxu1 }
 0x52b   : > { %2629 = vst [vmem:[%s2625_s6 + $0x18] sm:$0xff] %v2622_v20  ;;  %v2612_v19 = vadd.f32 %v5412_v22, %v4899_v17  ;;  %v2617_v21 = vadd.f32 %v4899_v17, %v2616_v28 }
 0x52c   : > { %v2606_v30 = vpop.f32.mrf.mxu0 }
 0x52d   : > { %2627 = vst [vmem:[%s2625_s6 + $0x8] sm:$0xff] %v2612_v19  ;;  %2628 = vst [vmem:[%s2625_s6 + $0x10] sm:$0xff] %v2617_v21  ;;  %v2607_v31 = vadd.f32 %v4899_v17, %v2606_v30 }
 0x52f   : > { %2626 = vst [vmem:[%s2625_s6] sm:$0xff] %v2607_v31 }
 0x530 PF: > { %s7056_s5 = sld [smem:[#allocation32_spill]] }
 0x531   : > { %s7057_s26 = sld [smem:[#allocation31_spill]] }
 0x536   : > { %p2630_p8 = scmp.eq.s32.totalorder %s7056_s5, 1 }
 0x537   : > { %p2631_p12 = scmp.eq.s32.totalorder %s7057_s26, 0 }
 0x539   : > { %p2632_p6 = pnand %p2631_p12, %p2630_p8 }
 0x53b   : > { %2635 = sbr.rel (%p2632_p6) target bundleno = 1702 (0x6a6), region = 100 }
 0x540   : > { %v5806_v32 = vld [vmem:[#allocation15 + $0x38] sm:$0xff]   ;;  %v5807_v23 = vld [vmem:[#allocation15 + $0x30] sm:$0xff]   ;;  %v5808_v24 = vld [vmem:[#allocation15 + $0x28] sm:$0xff]  }
 0x541   : > { %5416 = vmatprep.subr.bf16.mxu0 %v5806_v32  ;;  %5444 = vmatprep.subr.bf16.mxu1 %v5806_v32  ;;  %v5809_v25 = vld [vmem:[#allocation15 + $0x20] sm:$0xff]   ;;  %v2653_v26 = vld [vmem:[#allocation2] sm:$0xff]  ;;  %v2654_v33 = vld [vmem:[#allocation2 + $0x8] sm:$0xff] }
 0x542   : > { %5417 = vmatpush3.bf16.msra.mxu0 %v5806_v32  ;;  %5452 = vmatpush3.bf16.msra.mxu1 %v5806_v32  ;;  %v2655_v34 = vld [vmem:[#allocation2 + $0x10] sm:$0xff]  ;;  %v2687_v36 = vadd.f32 %v2654_v33, %v2653_v26  ;;  %v2656_v39 = vld [vmem:[#allocation2 + $0x18] sm:$0xff]  ;;  %v5810_v47 = vld [vmem:[#allocation15 + $0x18] sm:$0xff]  }
 0x543   : > { %5418 = vmatprep.subr.bf16.mxu0 %v5807_v23  ;;  %5445 = vmatprep.subr.bf16.mxu1 %v5807_v23  ;;  %v2657_v52 = vld [vmem:[#allocation2 + $0x20] sm:$0xff]  ;;  %v2658_v29 = vld [vmem:[#allocation2 + $0x28] sm:$0xff]  ;;  %v5812_v49 = vld [vmem:[#allocation15 + $0x8] sm:$0xff]  }
 0x544   : > { %v2688_v44 = vadd.f32 %v2687_v36, %v2655_v34  ;;  %v5811_v37 = vld [vmem:[#allocation15 + $0x10] sm:$0xff]   ;;  %v5813_v51 = vld [vmem:[#allocation15] sm:$0xff]   ;;  %v2660_v15 = vld [vmem:[#allocation2 + $0x38] sm:$0xff] }
 0x545   : > { %v2659_v14 = vld [vmem:[#allocation2 + $0x30] sm:$0xff] }
 0x546   : > { %5419 = vmatpush3.bf16.msra.mxu0 %v5807_v23  ;;  %5453 = vmatpush3.bf16.msra.mxu1 %v5807_v23  ;;  %v2689_v27 = vadd.f32 %v2688_v44, %v2656_v39  ;;  %v4905_v16 = vld [vmem:[#allocation18 + $0x4] ss:$0 sm:$0xff]  ;;  %v4906_v23 = vld [vmem:[#allocation18 + $0x5] ss:$0 sm:$0xff] }
 0x547   : > { %5420 = vmatprep.subr.bf16.mxu0 %v5808_v24  ;;  %5446 = vmatprep.subr.bf16.mxu1 %v5808_v24 }
 0x548   : > { %v2690_v35 = vadd.f32 %v2689_v27, %v2657_v52 }
 0x54a   : > { %5421 = vmatpush3.bf16.msra.mxu0 %v5808_v24  ;;  %5454 = vmatpush3.bf16.msra.mxu1 %v5808_v24  ;;  %v2691_v46 = vadd.f32 %v2690_v35, %v2658_v29 }
 0x54b   : > { %5422 = vmatprep.subr.bf16.mxu0 %v5809_v25  ;;  %5447 = vmatprep.subr.bf16.mxu1 %v5809_v25 }
 0x54c   : > { %v2694_v48 = vrot.slane %v2691_v46, 4 }
 0x54e   : > { %5423 = vmatpush3.bf16.msra.mxu0 %v5809_v25  ;;  %5455 = vmatpush3.bf16.msra.mxu1 %v5809_v25  ;;  %v2695_v38 = vadd.f32 %v2694_v48, %v2691_v46 }
 0x54f   : > { %5424 = vmatprep.subr.bf16.mxu0 %v5810_v47  ;;  %5448 = vmatprep.subr.bf16.mxu1 %v5810_v47 }
 0x550   : > { %v2696_v40 = vrot.slane %v2695_v38, 2 }
 0x552   : > { %5425 = vmatpush3.bf16.msra.mxu0 %v5810_v47  ;;  %5456 = vmatpush3.bf16.msra.mxu1 %v5810_v47  ;;  %v2697_v41 = vadd.f32 %v2696_v40, %v2695_v38 }
 0x553   : > { %5426 = vmatprep.subr.bf16.mxu0 %v5811_v37  ;;  %5449 = vmatprep.subr.bf16.mxu1 %v5811_v37 }
 0x554   : > { %v2698_v43 = vrot.slane %v2697_v41, 1 }
 0x556   : > { %5427 = vmatpush3.bf16.msra.mxu0 %v5811_v37  ;;  %5457 = vmatpush3.bf16.msra.mxu1 %v5811_v37  ;;  %v2699_v53 = vadd.f32 %v2698_v43, %v2697_v41 }
 0x557   : > { %5428 = vmatprep.subr.bf16.mxu0 %v5812_v49  ;;  %5450 = vmatprep.subr.bf16.mxu1 %v5812_v49 }
 0x558   : > { %v2700_v55 = vmul.f32 0.020833334, %v2699_v53 }
 0x55a   : > { %5429 = vmatpush3.bf16.msra.mxu0 %v5812_v49  ;;  %5458 = vmatpush3.bf16.msra.mxu1 %v5812_v49  ;;  %v2701_v56 = vsub.f32 %v2653_v26, %v2700_v55  ;;  %v2702_v57 = vsub.f32 %v2654_v33, %v2700_v55  ;;  %v2703_v58 = vsub.f32 %v2655_v34, %v2700_v55 }
 0x55b   : > { %5430 = vmatprep.subr.bf16.mxu0 %v5813_v51  ;;  %5451 = vmatprep.subr.bf16.mxu1 %v5813_v51  ;;  %v2704_v60 = vsub.f32 %v2656_v39, %v2700_v55  ;;  %v2705_v61 = vsub.f32 %v2657_v52, %v2700_v55  ;;  %v2706_v2 = vsub.f32 %v2658_v29, %v2700_v55 }
 0x55c   : > { %v2709_v62 = vmul.f32 %v2701_v56, %v2701_v56  ;;  %v2710_v63 = vmul.f32 %v2702_v57, %v2702_v57  ;;  %v2711_v0 = vmul.f32 %v2703_v58, %v2703_v58  ;;  %v2707_v12 = vsub.f32 %v2659_v14, %v2700_v55 }
 0x55d   : > { %v2712_v42 = vmul.f32 %v2704_v60, %v2704_v60  ;;  %v2713_v50 = vmul.f32 %v2705_v61, %v2705_v61  ;;  %v2714_v3 = vmul.f32 %v2706_v2, %v2706_v2  ;;  %v2708_v17 = vsub.f32 %v2660_v15, %v2700_v55 }
 0x55e   : > { %5431 = vmatpush3.bf16.msra.mxu0 %v5813_v51  ;;  %5459 = vmatpush3.bf16.msra.mxu1 %v5813_v51  ;;  %v2725_v45 = vadd.f32 %v2710_v63, %v2709_v62  ;;  %v2745_v18 = vmul.f32 %v4905_v16, %v2701_v56  ;;  %v2746_v20 = vmul.f32 %v4905_v16, %v2702_v57 }
 0x55f   : > { %v2747_v22 = vmul.f32 %v4905_v16, %v2703_v58  ;;  %v2748_v28 = vmul.f32 %v4905_v16, %v2704_v60  ;;  %v2749_v19 = vmul.f32 %v4905_v16, %v2705_v61  ;;  %v2750_v21 = vmul.f32 %v4905_v16, %v2706_v2 }
 0x560   : > { %v2726_v54 = vadd.f32 %v2725_v45, %v2711_v0  ;;  %v2751_v30 = vmul.f32 %v4905_v16, %v2707_v12  ;;  %v2752_v31 = vmul.f32 %v4905_v16, %v2708_v17 }
 0x562   : > { %v2727_v59 = vadd.f32 %v2726_v54, %v2712_v42  ;;  %v4907_v42 = vld [vmem:[#allocation18 + $0x6] ss:$0 sm:$0xff] }
 0x564   : > { %v2728_v1 = vadd.f32 %v2727_v59, %v2713_v50 }
 0x566   : > { %v2729_v4 = vadd.f32 %v2728_v1, %v2714_v3 }
 0x568   : > { %v2732_v5 = vrot.slane %v2729_v4, 4 }
 0x56a   : > { %v2733_v6 = vadd.f32 %v2732_v5, %v2729_v4 }
 0x56c   : > { %v2734_v7 = vrot.slane %v2733_v6, 2 }
 0x56e   : > { %v2735_v8 = vadd.f32 %v2734_v7, %v2733_v6 }
 0x570   : > { %v2736_v9 = vrot.slane %v2735_v8, 1 }
 0x572   : > { %v2737_v10 = vadd.f32 %v2736_v9, %v2735_v8 }
 0x574   : > { %v2738_v11 = vmul.f32 0.020833334, %v2737_v10 }
 0x576   : > { %v2753_v13 = vadd.f32 1e-05, %v2738_v11 }
 0x578   : > { %5814 = vrsqrt.f32 %v2753_v13 }
 0x585   : > { %v5815_v32 = vpop.eup %5814 }
 0x586   : > { %v2755_v24 = vmul.f32 %v5815_v32, %v2745_v18  ;;  %v2756_v25 = vmul.f32 %v5815_v32, %v2746_v20  ;;  %v2757_v26 = vmul.f32 %v5815_v32, %v2747_v22  ;;  %v2758_v33 = vmul.f32 %v5815_v32, %v2748_v28 }
 0x587   : > { %v2759_v34 = vmul.f32 %v5815_v32, %v2749_v19  ;;  %v2760_v36 = vmul.f32 %v5815_v32, %v2750_v21  ;;  %v2761_v39 = vmul.f32 %v5815_v32, %v2751_v30  ;;  %v2762_v44 = vmul.f32 %v5815_v32, %v2752_v31 }
 0x588   : > { %v2769_v47 = vadd.f32 %v4906_v23, %v2755_v24  ;;  %v2770_v52 = vadd.f32 %v4906_v23, %v2756_v25  ;;  %v2771_v27 = vadd.f32 %v4906_v23, %v2757_v26  ;;  %v2772_v29 = vadd.f32 %v4906_v23, %v2758_v33 }
 0x589   : > { %v2773_v35 = vadd.f32 %v4906_v23, %v2759_v34  ;;  %v2774_v37 = vadd.f32 %v4906_v23, %v2760_v36  ;;  %v2775_v46 = vadd.f32 %v4906_v23, %v2761_v39  ;;  %v2776_v48 = vadd.f32 %v4906_v23, %v2762_v44 }
 0x58a   : > { %v2777_v49 = vmax.f32 %v2769_v47, 0.0  ;;  %v2778_v38 = vmax.f32 %v2770_v52, 0.0  ;;  %v2779_v40 = vmax.f32 %v2771_v27, 0.0  ;;  %v2780_v51 = vmax.f32 %v2772_v29, 0.0 }
 0x58b   : > { %v2781_v41 = vmax.f32 %v2773_v35, 0.0  ;;  %v2782_v43 = vmax.f32 %v2774_v37, 0.0  ;;  %v2783_v53 = vmax.f32 %v2775_v46, 0.0  ;;  %v2784_v55 = vmax.f32 %v2776_v48, 0.0 }
 0x58c   : > { %v2785_v56 = vpack.c.bf16 %v2778_v38, %v2777_v49  ;;  %v2786_v57 = vpack.c.bf16 %v2780_v51, %v2779_v40  ;;  %v4916_v40 = vld [vmem:[#allocation18 + $0x7] ss:$0 sm:$0xff] }
 0x58d   : > { %v2787_v58 = vpack.c.bf16 %v2782_v43, %v2781_v41  ;;  %v2788_v60 = vpack.c.bf16 %v2784_v55, %v2783_v53 }
 0x58e   : > { %5432 = vmatprep.mubr.bf16.mxu0 %v2785_v56 }
 0x58f   : > { %5433 = vmatmul.mubr.bf16.vlgmr.msra.gmra.mxu0 %v2786_v57  ;;  %5436 = vmatprep.mubr.bf16.mxu1 %v2787_v58  ;;  %v4917_v58 = vld [vmem:[#allocation18 + $0x8] ss:$0 sm:$0xff] }
 0x590   : > { %5437 = vmatmul.mubr.bf16.vlgmr.msra.gmra.mxu1 %v2788_v60 }
 0x64f   : > { %v5434_v61 = vpop.f32.mrf.mxu0 }
 0x650   : > { %v5438_v62 = vpop.f32.mrf.mxu1  ;;  %v2903_v59 = vadd.f32 %v5434_v61, %v4907_v42 }
 0x651   : > { %v2894_v63 = vpop.f32.mrf.mxu0  ;;  %v2919_v49 = vadd.f32 %v5438_v62, %v4907_v42 }
 0x652   : > { %v2910_v2 = vpop.f32.mrf.mxu1  ;;  %v2895_v50 = vadd.f32 %v4907_v42, %v2894_v63 }
 0x653   : > { %v5435_v0 = vpop.f32.mrf.mxu0  ;;  %v2911_v7 = vadd.f32 %v4907_v42, %v2910_v2 }
 0x654   : > { %v5439_v3 = vpop.f32.mrf.mxu1  ;;  %v2906_v4 = vadd.f32 %v5435_v0, %v4907_v42 }
 0x655   : > { %v2897_v45 = vpop.f32.mrf.mxu0  ;;  %v2922_v38 = vadd.f32 %v5439_v3, %v4907_v42 }
 0x656   : > { %v2898_v54 = vadd.f32 %v4907_v42, %v2897_v45  ;;  %v2913_v6 = vpop.f32.mrf.mxu1 }
 0x657   : > { %v2914_v9 = vadd.f32 %v4907_v42, %v2913_v6 }
 0x658   : > { %v2935_v1 = vadd.f32 %v2898_v54, %v2895_v50 }
 0x65a   : > { %v2936_v5 = vadd.f32 %v2935_v1, %v2903_v59 }
 0x65c   : > { %v2937_v8 = vadd.f32 %v2936_v5, %v2906_v4 }
 0x65e   : > { %v2938_v10 = vadd.f32 %v2937_v8, %v2911_v7 }
 0x660   : > { %v2939_v11 = vadd.f32 %v2938_v10, %v2914_v9 }
 0x662   : > { %v2942_v13 = vrot.slane %v2939_v11, 4 }
 0x664   : > { %v2943_v14 = vadd.f32 %v2942_v13, %v2939_v11 }
 0x666   : > { %v2944_v15 = vrot.slane %v2943_v14, 2 }
 0x668   : > { %v2945_v16 = vadd.f32 %v2944_v15, %v2943_v14 }
 0x66a   : > { %v2946_v12 = vrot.slane %v2945_v16, 1 }
 0x66c   : > { %v2947_v17 = vadd.f32 %v2946_v12, %v2945_v16 }
 0x66e   : > { %v2948_v18 = vmul.f32 0.020833334, %v2947_v17 }
 0x670   : > { %v2949_v20 = vsub.f32 %v2895_v50, %v2948_v18  ;;  %v2950_v22 = vsub.f32 %v2898_v54, %v2948_v18  ;;  %v2951_v28 = vsub.f32 %v2903_v59, %v2948_v18  ;;  %v2952_v19 = vsub.f32 %v2906_v4, %v2948_v18 }
 0x671   : > { %v2953_v31 = vsub.f32 %v2911_v7, %v2948_v18  ;;  %v2954_v24 = vsub.f32 %v2914_v9, %v2948_v18  ;;  %v2955_v51 = vsub.f32 %v2919_v49, %v2948_v18  ;;  %v2956_v41 = vsub.f32 %v2922_v38, %v2948_v18 }
 0x672   : > { %v2957_v21 = vmul.f32 %v2949_v20, %v2949_v20  ;;  %v2958_v30 = vmul.f32 %v2950_v22, %v2950_v22  ;;  %v2959_v32 = vmul.f32 %v2951_v28, %v2951_v28  ;;  %v2960_v25 = vmul.f32 %v2952_v19, %v2952_v19 }
 0x673   : > { %v2961_v33 = vmul.f32 %v2953_v31, %v2953_v31  ;;  %v2962_v36 = vmul.f32 %v2954_v24, %v2954_v24  ;;  %v2993_v43 = vmul.f32 %v4916_v40, %v2949_v20  ;;  %v2994_v53 = vmul.f32 %v4916_v40, %v2950_v22 }
 0x674   : > { %v2973_v23 = vadd.f32 %v2958_v30, %v2957_v21  ;;  %v2995_v55 = vmul.f32 %v4916_v40, %v2951_v28  ;;  %v2996_v56 = vmul.f32 %v4916_v40, %v2952_v19  ;;  %v2997_v60 = vmul.f32 %v4916_v40, %v2953_v31 }
 0x675   : > { %v2998_v61 = vmul.f32 %v4916_v40, %v2954_v24  ;;  %v2999_v63 = vmul.f32 %v4916_v40, %v2955_v51  ;;  %v3000_v0 = vmul.f32 %v4916_v40, %v2956_v41 }
 0x676   : > { %v2974_v26 = vadd.f32 %v2973_v23, %v2959_v32 }
 0x678   : > { %v2975_v34 = vadd.f32 %v2974_v26, %v2960_v25 }
 0x67a   : > { %v2976_v39 = vadd.f32 %v2975_v34, %v2961_v33 }
 0x67c   : > { %v2977_v44 = vadd.f32 %v2976_v39, %v2962_v36 }
 0x67e   : > { %v2980_v47 = vrot.slane %v2977_v44, 4 }
 0x680   : > { %v2981_v52 = vadd.f32 %v2980_v47, %v2977_v44 }
 0x682   : > { %v2982_v27 = vrot.slane %v2981_v52, 2 }
 0x684   : > { %v2983_v29 = vadd.f32 %v2982_v27, %v2981_v52 }
 0x686   : > { %v2984_v35 = vrot.slane %v2983_v29, 1 }
 0x688   : > { %v2985_v37 = vadd.f32 %v2984_v35, %v2983_v29 }
 0x68a   : > { %v2986_v46 = vmul.f32 0.020833334, %v2985_v37 }
 0x68c   : > { %v3001_v48 = vadd.f32 1e-05, %v2986_v46 }
 0x68e   : > { %5816 = vrsqrt.f32 %v3001_v48 }
 0x69b   : > { %v5817_v57 = vpop.eup %5816 }
 0x69c   : > { %v3003_v2 = vmul.f32 %v5817_v57, %v2993_v43  ;;  %v3004_v45 = vmul.f32 %v5817_v57, %v2994_v53  ;;  %v3005_v50 = vmul.f32 %v5817_v57, %v2995_v55  ;;  %v3006_v54 = vmul.f32 %v5817_v57, %v2996_v56 }
 0x69d   : > { %v3007_v59 = vmul.f32 %v5817_v57, %v2997_v60  ;;  %v3008_v62 = vmul.f32 %v5817_v57, %v2998_v61  ;;  %v3009_v42 = vmul.f32 %v5817_v57, %v2999_v63  ;;  %v3010_v3 = vmul.f32 %v5817_v57, %v3000_v0 }
 0x69e   : > { %v3017_v1 = vadd.f32 %v4917_v58, %v3003_v2  ;;  %v3018_v4 = vadd.f32 %v4917_v58, %v3004_v45  ;;  %v3019_v5 = vadd.f32 %v4917_v58, %v3005_v50  ;;  %v3020_v6 = vadd.f32 %v4917_v58, %v3006_v54 }
 0x69f   : > { %v3021_v7 = vadd.f32 %v4917_v58, %v3007_v59  ;;  %v3022_v8 = vadd.f32 %v4917_v58, %v3008_v62  ;;  %v3023_v9 = vadd.f32 %v4917_v58, %v3009_v42  ;;  %v3024_v10 = vadd.f32 %v4917_v58, %v3010_v3 }
 0x6a0   : > { %v3025_v11 = vmax.f32 %v3017_v1, 0.0  ;;  %v3026_v13 = vmax.f32 %v3018_v4, 0.0  ;;  %v3027_v14 = vmax.f32 %v3019_v5, 0.0  ;;  %v3028_v15 = vmax.f32 %v3020_v6, 0.0 }
 0x6a1   : > { %v3029_v16 = vmax.f32 %v3021_v7, 0.0  ;;  %v3030_v12 = vmax.f32 %v3022_v8, 0.0  ;;  %v3031_v17 = vmax.f32 %v3023_v9, 0.0  ;;  %v3032_v18 = vmax.f32 %v3024_v10, 0.0 }
 0x6a2   : > { %v5084_v20 = vpack.c.bf16 %v3026_v13, %v3025_v11  ;;  %v5089_v22 = vpack.c.bf16 %v3028_v15, %v3027_v14 }
 0x6a3   : > { %v5094_v28 = vpack.c.bf16 %v3030_v12, %v3029_v16  ;;  %v5099_v19 = vpack.c.bf16 %v3032_v18, %v3031_v17 }
 0x6a4   : > { %5085 = vst [vmem:[#allocation3] sm:$0xff] %v5084_v20   ;;  %5101 = vst [vmem:[#allocation3 + $0x8] sm:$0xff] %v5089_v22  }
 0x6a5   : > { %5102 = vst [vmem:[#allocation3 + $0x10] sm:$0xff] %v5094_v28   ;;  %5103 = vst [vmem:[#allocation3 + $0x18] sm:$0xff] %v5099_v19  }
 0x6a6 PF: > { %s7058_s19 = sld [smem:[#allocation32_spill]] }
 0x6ac   : > { %p4926_p1 = scmp.ne.s32.totalorder %s7058_s19, 1 }
 0x6ad   : > { %s3076_s18 = sshra.s32 (!%p4926_p1), %s4718_s30, 3 }
 0x6ae   : > { %3075 = sbr.rel (%p4926_p1) target bundleno = 2057 (0x809), region = 104  ;;  %s4927_s20 = sshll.u32 (!%p4926_p1), %s3076_s18, 2 }
 0x6af   : > { %s6700_s28 = scalar_lea.vmem (!%p4926_p1), [#allocation3], %s4927_s20 }
 0x6b3   : > { %v3196_v21 = vld [vmem:[#allocation16 + $0x380] sm:$0xff]  ;;  %v3197_v31 = vld [vmem:[#allocation16 + $0x388] sm:$0xff]  ;;  %v6246_v33 = vmov 0   ;;  %v3198_v19 = vld [vmem:[#allocation16 + $0x390] sm:$0xff] }
 0x6b4   : > { %v3204_v30 = vld [vmem:[#allocation16 + $0x3c0] sm:$0xff]  ;;  %v3205_v23 = vld [vmem:[#allocation16 + $0x3c8] sm:$0xff]  ;;  %3980 = vmatprep.mubr.bf16.mxu0 %v6246_v33  ;;  %4033 = vmatprep.mubr.bf16.mxu1 %v6246_v33 }
 0x6b5   : > { %v5043_v32 = vcombine.high %v3196_v21, %v3204_v30  ;;  %v5042_v24 = vcombine.low %v3196_v21, %v3204_v30  ;;  %v3180_v25 = vld [vmem:[#allocation16 + $0x300] sm:$0xff]  ;;  %v5045_v34 = vcombine.high %v3197_v31, %v3205_v23  ;;  %v5044_v36 = vcombine.low %v3197_v31, %v3205_v23  ;;  %v3181_v44 = vld [vmem:[#allocation16 + $0x308] sm:$0xff]  ;;  %v3206_v21 = vld [vmem:[#allocation16 + $0x3d0] sm:$0xff] }
 0x6b6   : > { %v3188_v26 = vld [vmem:[#allocation16 + $0x340] sm:$0xff]  ;;  %v3189_v47 = vld [vmem:[#allocation16 + $0x348] sm:$0xff]  ;;  %v3199_v30 = vld [vmem:[#allocation16 + $0x398] sm:$0xff] }
 0x6b7   : > { %v5027_v39 = vcombine.high %v3180_v25, %v3188_v26  ;;  %v3164_v52 = vld [vmem:[#allocation16 + $0x280] sm:$0xff]  ;;  %3948 = vmatprep.subr.bf16.mxu0 %v5043_v32  ;;  %v5029_v27 = vcombine.high %v3181_v44, %v3189_v47  ;;  %v3165_v35 = vld [vmem:[#allocation16 + $0x288] sm:$0xff]  ;;  %4001 = vmatprep.subr.bf16.mxu1 %v5045_v34  ;;  %v5026_v46 = vcombine.low %v3180_v25, %v3188_v26  ;;  %v3207_v31 = vld [vmem:[#allocation16 + $0x3d8] sm:$0xff] }
 0x6b8   : > { %v3172_v29 = vld [vmem:[#allocation16 + $0x2c0] sm:$0xff]  ;;  %v3173_v37 = vld [vmem:[#allocation16 + $0x2c8] sm:$0xff]  ;;  %3949 = vmatpush1.bf16.msra.mxu0 %v5042_v24  ;;  %4002 = vmatpush1.bf16.msra.mxu1 %v5044_v36  ;;  %v5028_v48 = vcombine.low %v3181_v44, %v3189_v47  ;;  %v5047_v24 = vcombine.high %v3198_v19, %v3206_v21  ;;  %v5049_v25 = vcombine.high %v3199_v30, %v3207_v31  ;;  %v3182_v26 = vld [vmem:[#allocation16 + $0x310] sm:$0xff] }
 0x6b9   : > { %3950 = vmatprep.subr.bf16.mxu0 %v5027_v39  ;;  %v5011_v49 = vcombine.high %v3164_v52, %v3172_v29  ;;  %4003 = vmatprep.subr.bf16.mxu1 %v5029_v27  ;;  %v5013_v38 = vcombine.high %v3165_v35, %v3173_v37  ;;  %v3148_v40 = vld [vmem:[#allocation16 + $0x200] sm:$0xff]  ;;  %v3149_v41 = vld [vmem:[#allocation16 + $0x208] sm:$0xff]  ;;  %v5010_v53 = vcombine.low %v3164_v52, %v3172_v29  ;;  %v3190_v34 = vld [vmem:[#allocation16 + $0x350] sm:$0xff] }
 0x6ba   : > { %v3156_v51 = vld [vmem:[#allocation16 + $0x240] sm:$0xff]  ;;  %v3157_v43 = vld [vmem:[#allocation16 + $0x248] sm:$0xff]  ;;  %v5012_v55 = vcombine.low %v3165_v35, %v3173_v37  ;;  %v6703_v36 = vld [vmem:[%s6700_s28] sm:$0xff]   ;;  %v5046_v47 = vcombine.low %v3198_v19, %v3206_v21  ;;  %v5048_v52 = vcombine.low %v3199_v30, %v3207_v31  ;;  %v5031_v27 = vcombine.high %v3182_v26, %v3190_v34 }
 0x6bb   : > { %v4995_v56 = vcombine.high %v3148_v40, %v3156_v51  ;;  %v4997_v57 = vcombine.high %v3149_v41, %v3157_v43  ;;  %v3132_v58 = vld [vmem:[#allocation16 + $0x180] sm:$0xff]  ;;  %v3133_v61 = vld [vmem:[#allocation16 + $0x188] sm:$0xff]  ;;  %v4994_v0 = vcombine.low %v3148_v40, %v3156_v51  ;;  %v4996_v2 = vcombine.low %v3149_v41, %v3157_v43  ;;  %v3183_v39 = vld [vmem:[#allocation16 + $0x318] sm:$0xff] }
 0x6bc   : > { %3951 = vmatpush1.bf16.msra.mxu0 %v5026_v46  ;;  %4004 = vmatpush1.bf16.msra.mxu1 %v5028_v48  ;;  %v3140_v60 = vld [vmem:[#allocation16 + $0x1c0] sm:$0xff]  ;;  %v3141_v63 = vld [vmem:[#allocation16 + $0x1c8] sm:$0xff]  ;;  %v3191_v44 = vld [vmem:[#allocation16 + $0x358] sm:$0xff] }
 0x6bd   : > { %3952 = vmatprep.subr.bf16.mxu0 %v5011_v49  ;;  %4005 = vmatprep.subr.bf16.mxu1 %v5013_v38  ;;  %v4979_v45 = vcombine.high %v3132_v58, %v3140_v60  ;;  %v4981_v50 = vcombine.high %v3133_v61, %v3141_v63  ;;  %v3116_v54 = vld [vmem:[#allocation16 + $0x100] sm:$0xff]  ;;  %v3117_v62 = vld [vmem:[#allocation16 + $0x108] sm:$0xff]  ;;  %v4978_v3 = vcombine.low %v3132_v58, %v3140_v60  ;;  %v3166_v35 = vld [vmem:[#allocation16 + $0x290] sm:$0xff] }
 0x6be   : > { %v3124_v59 = vld [vmem:[#allocation16 + $0x140] sm:$0xff]  ;;  %v3125_v42 = vld [vmem:[#allocation16 + $0x148] sm:$0xff]  ;;  %v4980_v1 = vcombine.low %v3133_v61, %v3141_v63  ;;  %v5033_v29 = vcombine.high %v3183_v39, %v3191_v44  ;;  %v3174_v37 = vld [vmem:[#allocation16 + $0x2d0] sm:$0xff]  ;;  %v5030_v49 = vcombine.low %v3182_v26, %v3190_v34  ;;  %v5032_v38 = vcombine.low %v3183_v39, %v3191_v44 }
 0x6bf   : > { %v4963_v4 = vcombine.high %v3116_v54, %v3124_v59  ;;  %v3100_v5 = vld [vmem:[#allocation16 + $0x80] sm:$0xff]  ;;  %v4965_v6 = vcombine.high %v3117_v62, %v3125_v42  ;;  %v3101_v8 = vld [vmem:[#allocation16 + $0x88] sm:$0xff]  ;;  %v4962_v10 = vcombine.low %v3116_v54, %v3124_v59  ;;  %v4964_v11 = vcombine.low %v3117_v62, %v3125_v42  ;;  %v3167_v46 = vld [vmem:[#allocation16 + $0x298] sm:$0xff] }
 0x6c0   : > { %3953 = vmatpush1.bf16.msra.mxu0 %v5010_v53  ;;  %4006 = vmatpush1.bf16.msra.mxu1 %v5012_v55  ;;  %v3108_v7 = vld [vmem:[#allocation16 + $0xc0] sm:$0xff]  ;;  %v3109_v9 = vld [vmem:[#allocation16 + $0xc8] sm:$0xff]  ;;  %v3175_v48 = vld [vmem:[#allocation16 + $0x2d8] sm:$0xff]  ;;  %v5015_v40 = vcombine.high %v3166_v35, %v3174_v37 }
 0x6c1   : > { %3954 = vmatprep.subr.bf16.mxu0 %v4995_v56  ;;  %4007 = vmatprep.subr.bf16.mxu1 %v4997_v57  ;;  %v4947_v13 = vcombine.high %v3100_v5, %v3108_v7  ;;  %v4949_v14 = vcombine.high %v3101_v8, %v3109_v9  ;;  %v3084_v15 = vld [vmem:[#allocation16] sm:$0xff]  ;;  %v3085_v12 = vld [vmem:[#allocation16 + $0x8] sm:$0xff]  ;;  %v4946_v18 = vcombine.low %v3100_v5, %v3108_v7  ;;  %v3150_v41 = vld [vmem:[#allocation16 + $0x210] sm:$0xff] }
 0x6c2   : > { %v3092_v16 = vld [vmem:[#allocation16 + $0x40] sm:$0xff]  ;;  %v3093_v17 = vld [vmem:[#allocation16 + $0x48] sm:$0xff]  ;;  %v4948_v20 = vcombine.low %v3101_v8, %v3109_v9  ;;  %v5017_v51 = vcombine.high %v3167_v46, %v3175_v48  ;;  %v3158_v43 = vld [vmem:[#allocation16 + $0x250] sm:$0xff]  ;;  %v5014_v57 = vcombine.low %v3166_v35, %v3174_v37  ;;  %v5016_v58 = vcombine.low %v3167_v46, %v3175_v48 }
 0x6c3   : > { %v4931_v22 = vcombine.high %v3084_v15, %v3092_v16  ;;  %v4933_v28 = vcombine.high %v3085_v12, %v3093_v17  ;;  %v4930_v32 = vcombine.low %v3084_v15, %v3092_v16  ;;  %v4932_v23 = vcombine.low %v3085_v12, %v3093_v17  ;;  %v3151_v53 = vld [vmem:[#allocation16 + $0x218] sm:$0xff]  ;;  %v3134_v63 = vld [vmem:[#allocation16 + $0x190] sm:$0xff]  ;;  %v3200_v31 = vld [vmem:[#allocation16 + $0x3a0] sm:$0xff] }
 0x6c4   : > { %3955 = vmatpush1.bf16.msra.mxu0 %v4994_v0  ;;  %4008 = vmatpush1.bf16.msra.mxu1 %v4996_v2  ;;  %v3159_v55 = vld [vmem:[#allocation16 + $0x258] sm:$0xff]  ;;  %v4999_v60 = vcombine.high %v3150_v41, %v3158_v43  ;;  %v3142_v0 = vld [vmem:[#allocation16 + $0x1d0] sm:$0xff]  ;;  %v3184_v44 = vld [vmem:[#allocation16 + $0x320] sm:$0xff] }
 0x6c5   : > { %3956 = vmatprep.subr.bf16.mxu0 %v4979_v45  ;;  %4009 = vmatprep.subr.bf16.mxu1 %v4981_v50  ;;  %v6710_v56 = vld [vmem:[%s6700_s28 + $0x8] sm:$0xff]   ;;  %v5001_v61 = vcombine.high %v3151_v53, %v3159_v55  ;;  %v4998_v50 = vcombine.low %v3150_v41, %v3158_v43  ;;  %v5000_v54 = vcombine.low %v3151_v53, %v3159_v55  ;;  %v3118_v42 = vld [vmem:[#allocation16 + $0x110] sm:$0xff]  ;;  %v3168_v48 = vld [vmem:[#allocation16 + $0x2a0] sm:$0xff] }
 0x6c6   : > { %v3135_v2 = vld [vmem:[#allocation16 + $0x198] sm:$0xff]  ;;  %v4983_v59 = vcombine.high %v3134_v63, %v3142_v0  ;;  %v4982_v5 = vcombine.low %v3134_v63, %v3142_v0  ;;  %v3102_v9 = vld [vmem:[#allocation16 + $0x90] sm:$0xff]  ;;  %v3152_v55 = vld [vmem:[#allocation16 + $0x220] sm:$0xff] }
 0x6c7   : > { %v3143_v45 = vld [vmem:[#allocation16 + $0x1d8] sm:$0xff]  ;;  %v3086_v17 = vld [vmem:[#allocation16 + $0x10] sm:$0xff] }
 0x6c8   : > { %3957 = vmatpush1.bf16.msra.mxu0 %v4978_v3  ;;  %4010 = vmatpush1.bf16.msra.mxu1 %v4980_v1  ;;  %v4985_v62 = vcombine.high %v3135_v2, %v3143_v45  ;;  %v3126_v3 = vld [vmem:[#allocation16 + $0x150] sm:$0xff]  ;;  %v3119_v1 = vld [vmem:[#allocation16 + $0x118] sm:$0xff] }
 0x6c9   : > { %3958 = vmatprep.subr.bf16.mxu0 %v4963_v4  ;;  %4011 = vmatprep.subr.bf16.mxu1 %v4965_v6  ;;  %v3127_v4 = vld [vmem:[#allocation16 + $0x158] sm:$0xff]  ;;  %v4984_v6 = vcombine.low %v3135_v2, %v3143_v45  ;;  %v4967_v7 = vcombine.high %v3118_v42, %v3126_v3  ;;  %v3136_v45 = vld [vmem:[#allocation16 + $0x1a0] sm:$0xff] }
 0x6ca   : > { %v4969_v8 = vcombine.high %v3119_v1, %v3127_v4  ;;  %v4968_v15 = vcombine.low %v3119_v1, %v3127_v4  ;;  %v3120_v4 = vld [vmem:[#allocation16 + $0x120] sm:$0xff] }
 0x6cc   : > { %3959 = vmatpush1.bf16.msra.mxu0 %v4962_v10  ;;  %4012 = vmatpush1.bf16.msra.mxu1 %v4964_v11  ;;  %v3110_v10 = vld [vmem:[#allocation16 + $0xd0] sm:$0xff]  ;;  %v3103_v11 = vld [vmem:[#allocation16 + $0x98] sm:$0xff] }
 0x6cd   : > { %3960 = vmatprep.subr.bf16.mxu0 %v4947_v13  ;;  %4013 = vmatprep.subr.bf16.mxu1 %v4949_v14  ;;  %v3111_v13 = vld [vmem:[#allocation16 + $0xd8] sm:$0xff]  ;;  %v4966_v14 = vcombine.low %v3118_v42, %v3126_v3  ;;  %v4951_v16 = vcombine.high %v3102_v9, %v3110_v10 }
 0x6ce   : > { %v4953_v12 = vcombine.high %v3103_v11, %v3111_v13  ;;  %v4952_v19 = vcombine.low %v3103_v11, %v3111_v13  ;;  %v3104_v13 = vld [vmem:[#allocation16 + $0xa0] sm:$0xff] }
 0x6d0   : > { %3961 = vmatpush1.bf16.msra.mxu0 %v4946_v18  ;;  %4014 = vmatpush1.bf16.msra.mxu1 %v4948_v20  ;;  %v3094_v18 = vld [vmem:[#allocation16 + $0x50] sm:$0xff]  ;;  %v3087_v20 = vld [vmem:[#allocation16 + $0x18] sm:$0xff] }
 0x6d1   : > { %3962 = vmatprep.subr.bf16.mxu0 %v4931_v22  ;;  %4015 = vmatprep.subr.bf16.mxu1 %v4933_v28  ;;  %v3095_v22 = vld [vmem:[#allocation16 + $0x58] sm:$0xff]  ;;  %v4950_v28 = vcombine.low %v3102_v9, %v3110_v10  ;;  %v4935_v21 = vcombine.high %v3086_v17, %v3094_v18 }
 0x6d2   : > { %v4937_v30 = vcombine.high %v3087_v20, %v3095_v22  ;;  %v4936_v26 = vcombine.low %v3087_v20, %v3095_v22  ;;  %v3088_v22 = vld [vmem:[#allocation16 + $0x20] sm:$0xff] }
 0x6d4   : > { %3963 = vmatpush1.bf16.msra.mxu0 %v4930_v32  ;;  %4016 = vmatpush1.bf16.msra.mxu1 %v4932_v23  ;;  %v3208_v32 = vld [vmem:[#allocation16 + $0x3e0] sm:$0xff]  ;;  %v3201_v23 = vld [vmem:[#allocation16 + $0x3a8] sm:$0xff] }
 0x6d5   : > { %4054 = vmatprep.subr.bf16.mxu0 %v5047_v24  ;;  %4107 = vmatprep.subr.bf16.mxu1 %v5049_v25  ;;  %v3209_v24 = vld [vmem:[#allocation16 + $0x3e8] sm:$0xff]  ;;  %v4934_v25 = vcombine.low %v3086_v17, %v3094_v18  ;;  %v5051_v34 = vcombine.high %v3200_v31, %v3208_v32 }
 0x6d6   : > { %v5053_v39 = vcombine.high %v3201_v23, %v3209_v24  ;;  %v5052_v35 = vcombine.low %v3201_v23, %v3209_v24  ;;  %v3202_v24 = vld [vmem:[#allocation16 + $0x3b0] sm:$0xff] }
 0x6d7   : > { %3981 = vmatmul.mubr.bf16.vlgmr.msra.gmra.mxu0 %v6703_v36  ;;  %4034 = vmatmul.mubr.bf16.vlgmr.msra.gmra.mxu1 %v6703_v36 }
 0x6d8   : > { %4055 = vmatpush1.bf16.msra.mxu0 %v5046_v47  ;;  %4108 = vmatpush1.bf16.msra.mxu1 %v5048_v52  ;;  %v3192_v47 = vld [vmem:[#allocation16 + $0x360] sm:$0xff]  ;;  %v3185_v52 = vld [vmem:[#allocation16 + $0x328] sm:$0xff] }
 0x6d9   : > { %4056 = vmatprep.subr.bf16.mxu0 %v5031_v27  ;;  %4109 = vmatprep.subr.bf16.mxu1 %v5033_v29  ;;  %v3193_v27 = vld [vmem:[#allocation16 + $0x368] sm:$0xff]  ;;  %v5050_v29 = vcombine.low %v3200_v31, %v3208_v32  ;;  %v5035_v37 = vcombine.high %v3184_v44, %v3192_v47 }
 0x6da   : > { %3990 = vmatprep.mubr.bf16.mxu0 %v6246_v33  ;;  %4043 = vmatprep.mubr.bf16.mxu1 %v6246_v33  ;;  %v5037_v46 = vcombine.high %v3185_v52, %v3193_v27  ;;  %v5036_v41 = vcombine.low %v3185_v52, %v3193_v27  ;;  %v3186_v27 = vld [vmem:[#allocation16 + $0x330] sm:$0xff] }
 0x6dc   : > { %4057 = vmatpush1.bf16.msra.mxu0 %v5030_v49  ;;  %4110 = vmatpush1.bf16.msra.mxu1 %v5032_v38  ;;  %v3176_v49 = vld [vmem:[#allocation16 + $0x2e0] sm:$0xff]  ;;  %v3169_v38 = vld [vmem:[#allocation16 + $0x2a8] sm:$0xff] }
 0x6dd   : > { %4058 = vmatprep.subr.bf16.mxu0 %v5015_v40  ;;  %4111 = vmatprep.subr.bf16.mxu1 %v5017_v51  ;;  %v3177_v40 = vld [vmem:[#allocation16 + $0x2e8] sm:$0xff]  ;;  %v5034_v51 = vcombine.low %v3184_v44, %v3192_v47  ;;  %v5019_v43 = vcombine.high %v3168_v48, %v3176_v49 }
 0x6de   : > { %v5021_v53 = vcombine.high %v3169_v38, %v3177_v40  ;;  %v5020_v63 = vcombine.low %v3169_v38, %v3177_v40  ;;  %v3170_v40 = vld [vmem:[#allocation16 + $0x2b0] sm:$0xff] }
 0x6df   : > { %3991 = vmatmul.mubr.bf16.gmra.mxu0 %v6710_v56  ;;  %4044 = vmatmul.mubr.bf16.gmra.mxu1 %v6710_v56 }
 0x6e0   : > { %4059 = vmatpush1.bf16.msra.mxu0 %v5014_v57  ;;  %4112 = vmatpush1.bf16.msra.mxu1 %v5016_v58  ;;  %v3160_v57 = vld [vmem:[#allocation16 + $0x260] sm:$0xff]  ;;  %v3153_v58 = vld [vmem:[#allocation16 + $0x228] sm:$0xff] }
 0x6e1   : > { %4060 = vmatprep.subr.bf16.mxu0 %v4999_v60  ;;  %4113 = vmatprep.subr.bf16.mxu1 %v5001_v61  ;;  %v3161_v60 = vld [vmem:[#allocation16 + $0x268] sm:$0xff]  ;;  %v5018_v61 = vcombine.low %v3168_v48, %v3176_v49  ;;  %v5003_v0 = vcombine.high %v3152_v55, %v3160_v57 }
 0x6e2   : > { %4086 = vmatprep.mubr.bf16.mxu0 %v6246_v33  ;;  %4139 = vmatprep.mubr.bf16.mxu1 %v6246_v33  ;;  %v5005_v2 = vcombine.high %v3153_v58, %v3161_v60  ;;  %v5004_v42 = vcombine.low %v3153_v58, %v3161_v60  ;;  %v3154_v60 = vld [vmem:[#allocation16 + $0x230] sm:$0xff] }
 0x6e4   : > { %4061 = vmatpush1.bf16.msra.mxu0 %v4998_v50  ;;  %4114 = vmatpush1.bf16.msra.mxu1 %v5000_v54  ;;  %v3144_v50 = vld [vmem:[#allocation16 + $0x1e0] sm:$0xff]  ;;  %v3137_v54 = vld [vmem:[#allocation16 + $0x1a8] sm:$0xff] }
 0x6e5   : > { %4062 = vmatprep.subr.bf16.mxu0 %v4983_v59  ;;  %4115 = vmatprep.subr.bf16.mxu1 %v4985_v62  ;;  %v3145_v59 = vld [vmem:[#allocation16 + $0x1e8] sm:$0xff]  ;;  %v5002_v62 = vcombine.low %v3152_v55, %v3160_v57  ;;  %v4987_v3 = vcombine.high %v3136_v45, %v3144_v50 }
 0x6e6   : > { %v4989_v1 = vcombine.high %v3137_v54, %v3145_v59  ;;  %v4988_v9 = vcombine.low %v3137_v54, %v3145_v59  ;;  %v3138_v59 = vld [vmem:[#allocation16 + $0x1b0] sm:$0xff] }
 0x6e8   : > { %4063 = vmatpush1.bf16.msra.mxu0 %v4982_v5  ;;  %4116 = vmatpush1.bf16.msra.mxu1 %v4984_v6  ;;  %v3128_v5 = vld [vmem:[#allocation16 + $0x160] sm:$0xff]  ;;  %v3121_v6 = vld [vmem:[#allocation16 + $0x128] sm:$0xff] }
 0x6e9   : > { %4064 = vmatprep.subr.bf16.mxu0 %v4967_v7  ;;  %4117 = vmatprep.subr.bf16.mxu1 %v4969_v8  ;;  %v3129_v7 = vld [vmem:[#allocation16 + $0x168] sm:$0xff]  ;;  %v4986_v8 = vcombine.low %v3136_v45, %v3144_v50  ;;  %v4971_v10 = vcombine.high %v3120_v4, %v3128_v5 }
 0x6ea   : > { %v4973_v11 = vcombine.high %v3121_v6, %v3129_v7  ;;  %v4972_v17 = vcombine.low %v3121_v6, %v3129_v7  ;;  %v3122_v7 = vld [vmem:[#allocation16 + $0x130] sm:$0xff] }
 0x6ec   : > { %4065 = vmatpush1.bf16.msra.mxu0 %v4966_v14  ;;  %4118 = vmatpush1.bf16.msra.mxu1 %v4968_v15  ;;  %v3112_v14 = vld [vmem:[#allocation16 + $0xe0] sm:$0xff]  ;;  %v3105_v15 = vld [vmem:[#allocation16 + $0xa8] sm:$0xff] }
 0x6ed   : > { %4066 = vmatprep.subr.bf16.mxu0 %v4951_v16  ;;  %4119 = vmatprep.subr.bf16.mxu1 %v4953_v12  ;;  %v3113_v16 = vld [vmem:[#allocation16 + $0xe8] sm:$0xff]  ;;  %v4970_v12 = vcombine.low %v3120_v4, %v3128_v5  ;;  %v4955_v18 = vcombine.high %v3104_v13, %v3112_v14 }
 0x6ee   : > { %v4957_v20 = vcombine.high %v3105_v15, %v3113_v16  ;;  %v4956_v31 = vcombine.low %v3105_v15, %v3113_v16  ;;  %v3106_v16 = vld [vmem:[#allocation16 + $0xb0] sm:$0xff] }
 0x6f0   : > { %4067 = vmatpush1.bf16.msra.mxu0 %v4950_v28  ;;  %4120 = vmatpush1.bf16.msra.mxu1 %v4952_v19  ;;  %v3096_v28 = vld [vmem:[#allocation16 + $0x60] sm:$0xff]  ;;  %v3089_v19 = vld [vmem:[#allocation16 + $0x28] sm:$0xff] }
 0x6f1   : > { %4068 = vmatprep.subr.bf16.mxu0 %v4935_v21  ;;  %4121 = vmatprep.subr.bf16.mxu1 %v4937_v30  ;;  %v3097_v21 = vld [vmem:[#allocation16 + $0x68] sm:$0xff]  ;;  %v4954_v30 = vcombine.low %v3104_v13, %v3112_v14  ;;  %v4939_v32 = vcombine.high %v3088_v22, %v3096_v28 }
 0x6f2   : > { %v4941_v23 = vcombine.high %v3089_v19, %v3097_v21  ;;  %v4940_v44 = vcombine.low %v3089_v19, %v3097_v21  ;;  %v3090_v21 = vld [vmem:[#allocation16 + $0x30] sm:$0xff] }
 0x6f4   : > { %4069 = vmatpush1.bf16.msra.mxu0 %v4934_v25  ;;  %4122 = vmatpush1.bf16.msra.mxu1 %v4936_v26  ;;  %v3210_v25 = vld [vmem:[#allocation16 + $0x3f0] sm:$0xff]  ;;  %v3203_v26 = vld [vmem:[#allocation16 + $0x3b8] sm:$0xff] }
 0x6f5   : > { %4160 = vmatprep.subr.bf16.mxu0 %v5051_v34  ;;  %4213 = vmatprep.subr.bf16.mxu1 %v5053_v39  ;;  %v3211_v34 = vld [vmem:[#allocation16 + $0x3f8] sm:$0xff]  ;;  %v4938_v39 = vcombine.low %v3088_v22, %v3096_v28  ;;  %v5055_v47 = vcombine.high %v3202_v24, %v3210_v25 }
 0x6f6   : > { %v5057_v52 = vcombine.high %v3203_v26, %v3211_v34  ;;  %v5056_v48 = vcombine.low %v3203_v26, %v3211_v34 }
 0x6f7   : > { %4087 = vmatmul.mubr.bf16.vlgmr.msra.gmra.mxu0 %v6703_v36  ;;  %4140 = vmatmul.mubr.bf16.vlgmr.msra.gmra.mxu1 %v6703_v36 }
 0x6f8   : > { %4161 = vmatpush1.bf16.msra.mxu0 %v5050_v29  ;;  %4214 = vmatpush1.bf16.msra.mxu1 %v5052_v35  ;;  %v3194_v29 = vld [vmem:[#allocation16 + $0x370] sm:$0xff]  ;;  %v3187_v35 = vld [vmem:[#allocation16 + $0x338] sm:$0xff] }
 0x6f9   : > { %4162 = vmatprep.subr.bf16.mxu0 %v5035_v37  ;;  %4215 = vmatprep.subr.bf16.mxu1 %v5037_v46  ;;  %v3195_v37 = vld [vmem:[#allocation16 + $0x378] sm:$0xff]  ;;  %v5054_v46 = vcombine.low %v3202_v24, %v3210_v25  ;;  %v5039_v49 = vcombine.high %v3186_v27, %v3194_v29 }
 0x6fa   : > { %4096 = vmatprep.mubr.bf16.mxu0 %v6246_v33  ;;  %4149 = vmatprep.mubr.bf16.mxu1 %v6246_v33  ;;  %v5041_v38 = vcombine.high %v3187_v35, %v3195_v37  ;;  %v5040_v55 = vcombine.low %v3187_v35, %v3195_v37 }
 0x6fc   : > { %4163 = vmatpush1.bf16.msra.mxu0 %v5034_v51  ;;  %4216 = vmatpush1.bf16.msra.mxu1 %v5036_v41  ;;  %v3178_v51 = vld [vmem:[#allocation16 + $0x2f0] sm:$0xff]  ;;  %v3171_v41 = vld [vmem:[#allocation16 + $0x2b8] sm:$0xff] }
 0x6fd   : > { %4164 = vmatprep.subr.bf16.mxu0 %v5019_v43  ;;  %4217 = vmatprep.subr.bf16.mxu1 %v5021_v53  ;;  %v3179_v43 = vld [vmem:[#allocation16 + $0x2f8] sm:$0xff]  ;;  %v5038_v53 = vcombine.low %v3186_v27, %v3194_v29  ;;  %v5023_v57 = vcombine.high %v3170_v40, %v3178_v51  ;;  %v6741_v27 = vld [vmem:[#allocation18 + $0x9] sm:$0xff] }
 0x6fe   : > { %v5025_v58 = vcombine.high %v3171_v41, %v3179_v43  ;;  %v5024_v45 = vcombine.low %v3171_v41, %v3179_v43 }
 0x6ff   : > { %4097 = vmatmul.mubr.bf16.gmra.mxu0 %v6710_v56  ;;  %4150 = vmatmul.mubr.bf16.gmra.mxu1 %v6710_v56 }
 0x700   : > { %4165 = vmatpush1.bf16.msra.mxu0 %v5018_v61  ;;  %4218 = vmatpush1.bf16.msra.mxu1 %v5020_v63  ;;  %v3162_v61 = vld [vmem:[#allocation16 + $0x270] sm:$0xff]  ;;  %v3155_v63 = vld [vmem:[#allocation16 + $0x238] sm:$0xff] }
 0x701   : > { %4166 = vmatprep.subr.bf16.mxu0 %v5003_v0  ;;  %4219 = vmatprep.subr.bf16.mxu1 %v5005_v2  ;;  %v3163_v0 = vld [vmem:[#allocation16 + $0x278] sm:$0xff]  ;;  %v5022_v2 = vcombine.low %v3170_v40, %v3178_v51  ;;  %v5007_v50 = vcombine.high %v3154_v60, %v3162_v61 }
 0x702   : > { %4192 = vmatprep.mubr.bf16.mxu0 %v6246_v33  ;;  %4245 = vmatprep.mubr.bf16.mxu1 %v6246_v33  ;;  %v5009_v54 = vcombine.high %v3155_v63, %v3163_v0  ;;  %v5008_v4 = vcombine.low %v3155_v63, %v3163_v0 }
 0x704   : > { %4167 = vmatpush1.bf16.msra.mxu0 %v5002_v62  ;;  %4220 = vmatpush1.bf16.msra.mxu1 %v5004_v42  ;;  %v3146_v62 = vld [vmem:[#allocation16 + $0x1f0] sm:$0xff]  ;;  %v3139_v42 = vld [vmem:[#allocation16 + $0x1b8] sm:$0xff] }
 0x705   : > { %4168 = vmatprep.subr.bf16.mxu0 %v4987_v3  ;;  %4221 = vmatprep.subr.bf16.mxu1 %v4989_v1  ;;  %v3147_v3 = vld [vmem:[#allocation16 + $0x1f8] sm:$0xff]  ;;  %v5006_v1 = vcombine.low %v3154_v60, %v3162_v61  ;;  %v4991_v5 = vcombine.high %v3138_v59, %v3146_v62 }
 0x706   : > { %v4993_v6 = vcombine.high %v3139_v42, %v3147_v3  ;;  %v4992_v13 = vcombine.low %v3139_v42, %v3147_v3 }
 0x708   : > { %4169 = vmatpush1.bf16.msra.mxu0 %v4986_v8  ;;  %4222 = vmatpush1.bf16.msra.mxu1 %v4988_v9  ;;  %v3130_v8 = vld [vmem:[#allocation16 + $0x170] sm:$0xff]  ;;  %v3123_v9 = vld [vmem:[#allocation16 + $0x138] sm:$0xff] }
 0x709   : > { %4170 = vmatprep.subr.bf16.mxu0 %v4971_v10  ;;  %4223 = vmatprep.subr.bf16.mxu1 %v4973_v11  ;;  %v3131_v10 = vld [vmem:[#allocation16 + $0x178] sm:$0xff]  ;;  %v4990_v11 = vcombine.low %v3138_v59, %v3146_v62  ;;  %v4975_v14 = vcombine.high %v3122_v7, %v3130_v8 }
 0x70a   : > { %v4977_v15 = vcombine.high %v3123_v9, %v3131_v10  ;;  %v4976_v22 = vcombine.low %v3123_v9, %v3131_v10 }
 0x70c   : > { %4171 = vmatpush1.bf16.msra.mxu0 %v4970_v12  ;;  %4224 = vmatpush1.bf16.msra.mxu1 %v4972_v17  ;;  %v3114_v12 = vld [vmem:[#allocation16 + $0xf0] sm:$0xff]  ;;  %v3107_v17 = vld [vmem:[#allocation16 + $0xb8] sm:$0xff] }
 0x70d   : > { %4172 = vmatprep.subr.bf16.mxu0 %v4955_v18  ;;  %4225 = vmatprep.subr.bf16.mxu1 %v4957_v20  ;;  %v3115_v18 = vld [vmem:[#allocation16 + $0xf8] sm:$0xff]  ;;  %v4974_v20 = vcombine.low %v3122_v7, %v3130_v8  ;;  %v4959_v28 = vcombine.high %v3106_v16, %v3114_v12 }
 0x70e   : > { %v4961_v19 = vcombine.high %v3107_v17, %v3115_v18  ;;  %v4960_v24 = vcombine.low %v3107_v17, %v3115_v18 }
 0x710   : > { %4173 = vmatpush1.bf16.msra.mxu0 %v4954_v30  ;;  %4226 = vmatpush1.bf16.msra.mxu1 %v4956_v31  ;;  %v3098_v30 = vld [vmem:[#allocation16 + $0x70] sm:$0xff]  ;;  %v3091_v31 = vld [vmem:[#allocation16 + $0x38] sm:$0xff] }
 0x711   : > { %4174 = vmatprep.subr.bf16.mxu0 %v4939_v32  ;;  %4227 = vmatprep.subr.bf16.mxu1 %v4941_v23  ;;  %v3099_v32 = vld [vmem:[#allocation16 + $0x78] sm:$0xff]  ;;  %v4958_v23 = vcombine.low %v3106_v16, %v3114_v12  ;;  %v4943_v25 = vcombine.high %v3090_v21, %v3098_v30  ;;  %v4942_v34 = vcombine.low %v3090_v21, %v3098_v30 }
 0x712   : > { %v4945_v26 = vcombine.high %v3091_v31, %v3099_v32 }
 0x714   : > { %4175 = vmatpush1.bf16.msra.mxu0 %v4938_v39  ;;  %4228 = vmatpush1.bf16.msra.mxu1 %v4940_v44  ;;  %v4944_v39 = vcombine.low %v3091_v31, %v3099_v32  ;;  %v3216_v44 = vlaneseq }
 0x715   : > { %4266 = vmatprep.subr.bf16.mxu0 %v5055_v47  ;;  %4319 = vmatprep.subr.bf16.mxu1 %v5057_v52 }
 0x716   : > { %v6738_v47 = vshrl.u32 %v3216_v44, 7 }
 0x717   : > { %4193 = vmatmul.mubr.bf16.vlgmr.msra.gmra.mxu0 %v6703_v36  ;;  %4246 = vmatmul.mubr.bf16.vlgmr.msra.gmra.mxu1 %v6703_v36 }
 0x718   : > { %4267 = vmatpush1.bf16.msra.mxu0 %v5054_v46  ;;  %4320 = vmatpush1.bf16.msra.mxu1 %v5056_v48  ;;  %v3218_v52 = vsub.s32 0, %v6738_v47  ;;  %v3226_v29 = vsub.s32 2, %v6738_v47  ;;  %v3230_v35 = vsub.s32 3, %v6738_v47  ;;  %v3246_v16 = vsub.s32 7, %v6738_v47 }
 0x719   : > { %4268 = vmatprep.subr.bf16.mxu0 %v5039_v49  ;;  %4321 = vmatprep.subr.bf16.mxu1 %v5041_v38 }
 0x71a   : > { %4202 = vmatprep.mubr.bf16.mxu0 %v6246_v33  ;;  %4255 = vmatprep.mubr.bf16.mxu1 %v6246_v33  ;;  %v3231_v48 = vrot.slane %v6741_v27, %v3230_v35 }
 0x71c   : > { %4269 = vmatpush1.bf16.msra.mxu0 %v5038_v53  ;;  %4322 = vmatpush1.bf16.msra.mxu1 %v5040_v55 }
 0x71d   : > { %4270 = vmatprep.subr.bf16.mxu0 %v5023_v57  ;;  %4323 = vmatprep.subr.bf16.mxu1 %v5025_v58 }
 0x71f   : > { %4203 = vmatmul.mubr.bf16.gmra.mxu0 %v6710_v56  ;;  %4256 = vmatmul.mubr.bf16.gmra.mxu1 %v6710_v56 }
 0x720   : > { %4271 = vmatpush1.bf16.msra.mxu0 %v5022_v2  ;;  %4324 = vmatpush1.bf16.msra.mxu1 %v5024_v45 }
 0x721   : > { %4272 = vmatprep.subr.bf16.mxu0 %v5007_v50  ;;  %4325 = vmatprep.subr.bf16.mxu1 %v5009_v54 }
 0x722   : > { %4298 = vmatprep.mubr.bf16.mxu0 %v6246_v33  ;;  %4351 = vmatprep.mubr.bf16.mxu1 %v6246_v33 }
 0x724   : > { %4273 = vmatpush1.bf16.msra.mxu0 %v5006_v1  ;;  %4326 = vmatpush1.bf16.msra.mxu1 %v5008_v4 }
 0x725   : > { %4274 = vmatprep.subr.bf16.mxu0 %v4991_v5  ;;  %4327 = vmatprep.subr.bf16.mxu1 %v4993_v6 }
 0x728   : > { %4275 = vmatpush1.bf16.msra.mxu0 %v4990_v11  ;;  %4328 = vmatpush1.bf16.msra.mxu1 %v4992_v13  ;;  %v3234_v13 = vsub.s32 4, %v6738_v47 }
 0x729   : > { %4276 = vmatprep.subr.bf16.mxu0 %v4975_v14  ;;  %4329 = vmatprep.subr.bf16.mxu1 %v4977_v15  ;;  %v3242_v14 = vsub.s32 6, %v6738_v47  ;;  %v3238_v15 = vsub.s32 5, %v6738_v47 }
 0x72a   : > { %v3235_v12 = vrot.slane %v6741_v27, %v3234_v13 }
 0x72b   : > { %v3243_v17 = vrot.slane %v6741_v27, %v3242_v14  ;;  %v3239_v18 = vrot.slane %v6741_v27, %v3238_v15 }
 0x72c   : > { %4277 = vmatpush1.bf16.msra.mxu0 %v4974_v20  ;;  %4330 = vmatpush1.bf16.msra.mxu1 %v4976_v22  ;;  %v3247_v22 = vrot.slane %v6741_v27, %v3246_v16 }
 0x72d   : > { %4278 = vmatprep.subr.bf16.mxu0 %v4959_v28  ;;  %4331 = vmatprep.subr.bf16.mxu1 %v4961_v19 }
 0x730   : > { %4279 = vmatpush1.bf16.msra.mxu0 %v4958_v23  ;;  %4332 = vmatpush1.bf16.msra.mxu1 %v4960_v24 }
 0x731   : > { %4280 = vmatprep.subr.bf16.mxu0 %v4943_v25  ;;  %4333 = vmatprep.subr.bf16.mxu1 %v4945_v26 }
 0x734   : > { %4281 = vmatpush1.bf16.msra.mxu0 %v4942_v34  ;;  %4334 = vmatpush1.bf16.msra.mxu1 %v4944_v39 }
 0x737   : > { %4299 = vmatmul.mubr.bf16.vlgmr.msra.gmra.mxu0 %v6703_v36  ;;  %4352 = vmatmul.mubr.bf16.vlgmr.msra.gmra.mxu1 %v6703_v36  ;;  %v3222_v36 = vsub.s32 1, %v6738_v47 }
 0x738   : > { %4308 = vmatprep.mubr.bf16.mxu0 %v6246_v33  ;;  %4361 = vmatprep.mubr.bf16.mxu1 %v6246_v33  ;;  %v3219_v33 = vrot.slane %v6741_v27, %v3218_v52 }
 0x739   : > { %v3223_v37 = vrot.slane %v6741_v27, %v3222_v36 }
 0x73f   : > { %4309 = vmatmul.mubr.bf16.gmra.mxu0 %v6710_v56  ;;  %4362 = vmatmul.mubr.bf16.gmra.mxu1 %v6710_v56  ;;  %v3227_v56 = vrot.slane %v6741_v27, %v3226_v29 }
 0x797   : > { %v3982_v46 = vpop.f32.mrf.mxu0  ;;  %v4035_v38 = vpop.f32.mrf.mxu1 }
 0x798   : > { %v3983_v49 = vadd.f32 %v3982_v46, %v3219_v33  ;;  %v4036_v40 = vadd.f32 %v4035_v38, %v3227_v56 }
 0x799   : > { %v3984_v51 = vpop.f32.mrf.mxu0  ;;  %v4037_v43 = vpop.f32.mrf.mxu1 }
 0x79a   : > { %4372 = vst [vmem:[%s6645_s0] sm:$0xff] %v3983_v49  ;;  %v3985_v41 = vadd.f32 %v3984_v51, %v3223_v37  ;;  %4374 = vst [vmem:[%s6645_s0 + $0x10] sm:$0xff] %v4036_v40  ;;  %v4038_v53 = vadd.f32 %v4037_v43, %v3231_v48 }
 0x79b   : > { %v3986_v55 = vpop.f32.mrf.mxu0  ;;  %v4039_v58 = vpop.f32.mrf.mxu1 }
 0x79c   : > { %4373 = vst [vmem:[%s6645_s0 + $0x8] sm:$0xff] %v3985_v41  ;;  %v3987_v57 = vadd.f32 %v3986_v55, %v3219_v33  ;;  %4375 = vst [vmem:[%s6645_s0 + $0x18] sm:$0xff] %v4038_v53  ;;  %v4040_v60 = vadd.f32 %v4039_v58, %v3227_v56 }
 0x79d   : > { %v3988_v61 = vpop.f32.mrf.mxu0  ;;  %v4041_v0 = vpop.f32.mrf.mxu1 }
 0x79e   : > { %4388 = vst [vmem:[%s6645_s0 + $0x80] sm:$0xff] %v3987_v57  ;;  %v3989_v63 = vadd.f32 %v3988_v61, %v3223_v37  ;;  %4390 = vst [vmem:[%s6645_s0 + $0x90] sm:$0xff] %v4040_v60  ;;  %v4042_v2 = vadd.f32 %v4041_v0, %v3231_v48 }
 0x79f   : > { %v3992_v45 = vpop.f32.mrf.mxu0  ;;  %v4045_v54 = vpop.f32.mrf.mxu1 }
 0x7a0   : > { %4389 = vst [vmem:[%s6645_s0 + $0x88] sm:$0xff] %v3989_v63  ;;  %v3993_v50 = vadd.f32 %v3992_v45, %v3219_v33  ;;  %4391 = vst [vmem:[%s6645_s0 + $0x98] sm:$0xff] %v4042_v2  ;;  %v4046_v59 = vadd.f32 %v4045_v54, %v3227_v56  ;;  %v3213_v63 = vld [vmem:[#allocation18 + $0x11] sm:$0xff] }
 0x7a1   : > { %v3994_v62 = vpop.f32.mrf.mxu0  ;;  %v4047_v3 = vpop.f32.mrf.mxu1  ;;  %v3251_v0 = vrot.slane %v3213_v63, %v3218_v52  ;;  %v3259_v2 = vrot.slane %v3213_v63, %v3226_v29  ;;  %v3255_v45 = vrot.slane %v3213_v63, %v3222_v36  ;;  %v3263_v54 = vrot.slane %v3213_v63, %v3230_v35 }
 0x7a2   : > { %4404 = vst [vmem:[%s6645_s0 + $0x100] sm:$0xff] %v3993_v50  ;;  %v3995_v42 = vadd.f32 %v3994_v62, %v3223_v37  ;;  %4406 = vst [vmem:[%s6645_s0 + $0x110] sm:$0xff] %v4046_v59  ;;  %v4048_v1 = vadd.f32 %v4047_v3, %v3231_v48 }
 0x7a3   : > { %v3996_v4 = vpop.f32.mrf.mxu0  ;;  %v4049_v6 = vpop.f32.mrf.mxu1 }
 0x7a4   : > { %4405 = vst [vmem:[%s6645_s0 + $0x108] sm:$0xff] %v3995_v42  ;;  %v3997_v5 = vadd.f32 %v3996_v4, %v3219_v33  ;;  %4407 = vst [vmem:[%s6645_s0 + $0x118] sm:$0xff] %v4048_v1  ;;  %v4050_v7 = vadd.f32 %v4049_v6, %v3227_v56 }
 0x7a5   : > { %v3998_v8 = vpop.f32.mrf.mxu0  ;;  %v4051_v10 = vpop.f32.mrf.mxu1 }
 0x7a6   : > { %4420 = vst [vmem:[%s6645_s0 + $0x180] sm:$0xff] %v3997_v5  ;;  %v3999_v9 = vadd.f32 %v3998_v8, %v3223_v37  ;;  %4422 = vst [vmem:[%s6645_s0 + $0x190] sm:$0xff] %v4050_v7  ;;  %v4052_v11 = vadd.f32 %v4051_v10, %v3231_v48 }
 0x7a8   : > { %4421 = vst [vmem:[%s6645_s0 + $0x188] sm:$0xff] %v3999_v9  ;;  %4423 = vst [vmem:[%s6645_s0 + $0x198] sm:$0xff] %v4052_v11 }
 0x7b7   : > { %v4088_v20 = vpop.f32.mrf.mxu0  ;;  %v4141_v19 = vpop.f32.mrf.mxu1 }
 0x7b8   : > { %v4089_v28 = vadd.f32 %v4088_v20, %v3235_v12  ;;  %v4142_v21 = vadd.f32 %v4141_v19, %v3243_v17 }
 0x7b9   : > { %v4090_v30 = vpop.f32.mrf.mxu0  ;;  %v4143_v32 = vpop.f32.mrf.mxu1 }
 0x7ba   : > { %4376 = vst [vmem:[%s6645_s0 + $0x20] sm:$0xff] %v4089_v28  ;;  %v4091_v31 = vadd.f32 %v4090_v30, %v3239_v18  ;;  %4378 = vst [vmem:[%s6645_s0 + $0x30] sm:$0xff] %v4142_v21  ;;  %v4144_v23 = vadd.f32 %v4143_v32, %v3247_v22 }
 0x7bb   : > { %v4092_v24 = vpop.f32.mrf.mxu0  ;;  %v4145_v26 = vpop.f32.mrf.mxu1 }
 0x7bc   : > { %4377 = vst [vmem:[%s6645_s0 + $0x28] sm:$0xff] %v4091_v31  ;;  %v4093_v25 = vadd.f32 %v4092_v24, %v3235_v12  ;;  %4379 = vst [vmem:[%s6645_s0 + $0x38] sm:$0xff] %v4144_v23  ;;  %v4146_v34 = vadd.f32 %v4145_v26, %v3243_v17  ;;  %v3267_v26 = vrot.slane %v3213_v63, %v3234_v13 }
 0x7bd   : > { %v4094_v39 = vpop.f32.mrf.mxu0  ;;  %v4147_v27 = vpop.f32.mrf.mxu1 }
 0x7be   : > { %4392 = vst [vmem:[%s6645_s0 + $0xa0] sm:$0xff] %v4093_v25  ;;  %v4095_v44 = vadd.f32 %v4094_v39, %v3239_v18  ;;  %4394 = vst [vmem:[%s6645_s0 + $0xb0] sm:$0xff] %v4146_v34  ;;  %v4148_v33 = vadd.f32 %v4147_v27, %v3247_v22  ;;  %v3275_v34 = vrot.slane %v3213_v63, %v3242_v14 }
 0x7bf   : > { %v4098_v56 = vpop.f32.mrf.mxu0  ;;  %v4151_v46 = vpop.f32.mrf.mxu1  ;;  %v3271_v39 = vrot.slane %v3213_v63, %v3238_v15  ;;  %v3279_v27 = vrot.slane %v3213_v63, %v3246_v16 }
 0x7c0   : > { %4393 = vst [vmem:[%s6645_s0 + $0xa8] sm:$0xff] %v4095_v44  ;;  %v4099_v37 = vadd.f32 %v4098_v56, %v3235_v12  ;;  %4395 = vst [vmem:[%s6645_s0 + $0xb8] sm:$0xff] %v4148_v33  ;;  %v4152_v48 = vadd.f32 %v4151_v46, %v3243_v17 }
 0x7c1   : > { %v4100_v49 = vpop.f32.mrf.mxu0  ;;  %v4153_v40 = vpop.f32.mrf.mxu1 }
 0x7c2   : > { %4408 = vst [vmem:[%s6645_s0 + $0x120] sm:$0xff] %v4099_v37  ;;  %v4101_v38 = vadd.f32 %v4100_v49, %v3239_v18  ;;  %4410 = vst [vmem:[%s6645_s0 + $0x130] sm:$0xff] %v4152_v48  ;;  %v4154_v51 = vadd.f32 %v4153_v40, %v3247_v22 }
 0x7c3   : > { %v4102_v41 = vpop.f32.mrf.mxu0  ;;  %v4155_v53 = vpop.f32.mrf.mxu1 }
 0x7c4   : > { %4409 = vst [vmem:[%s6645_s0 + $0x128] sm:$0xff] %v4101_v38  ;;  %v4103_v43 = vadd.f32 %v4102_v41, %v3235_v12  ;;  %4411 = vst [vmem:[%s6645_s0 + $0x138] sm:$0xff] %v4154_v51  ;;  %v4156_v55 = vadd.f32 %v4155_v53, %v3243_v17 }
 0x7c5   : > { %v4104_v57 = vpop.f32.mrf.mxu0  ;;  %v4157_v60 = vpop.f32.mrf.mxu1 }
 0x7c6   : > { %4424 = vst [vmem:[%s6645_s0 + $0x1a0] sm:$0xff] %v4103_v43  ;;  %v4105_v58 = vadd.f32 %v4104_v57, %v3239_v18  ;;  %4426 = vst [vmem:[%s6645_s0 + $0x1b0] sm:$0xff] %v4156_v55  ;;  %v4158_v61 = vadd.f32 %v4157_v60, %v3247_v22 }
 0x7c8   : > { %4425 = vst [vmem:[%s6645_s0 + $0x1a8] sm:$0xff] %v4105_v58  ;;  %4427 = vst [vmem:[%s6645_s0 + $0x1b8] sm:$0xff] %v4158_v61 }
 0x7d7   : > { %v4194_v50 = vpop.f32.mrf.mxu0  ;;  %v4247_v62 = vpop.f32.mrf.mxu1 }
 0x7d8   : > { %v4195_v59 = vadd.f32 %v4194_v50, %v3251_v0  ;;  %v4248_v42 = vadd.f32 %v4247_v62, %v3259_v2 }
 0x7d9   : > { %v4196_v3 = vpop.f32.mrf.mxu0  ;;  %v4249_v52 = vpop.f32.mrf.mxu1 }
 0x7da   : > { %4380 = vst [vmem:[%s6645_s0 + $0x40] sm:$0xff] %v4195_v59  ;;  %v4197_v1 = vadd.f32 %v4196_v3, %v3255_v45  ;;  %4382 = vst [vmem:[%s6645_s0 + $0x50] sm:$0xff] %v4248_v42  ;;  %v4250_v29 = vadd.f32 %v4249_v52, %v3263_v54 }
 0x7db   : > { %v4198_v4 = vpop.f32.mrf.mxu0  ;;  %v4251_v5 = vpop.f32.mrf.mxu1 }
 0x7dc   : > { %4381 = vst [vmem:[%s6645_s0 + $0x48] sm:$0xff] %v4197_v1  ;;  %v4199_v36 = vadd.f32 %v4198_v4, %v3251_v0  ;;  %4383 = vst [vmem:[%s6645_s0 + $0x58] sm:$0xff] %v4250_v29  ;;  %v4252_v35 = vadd.f32 %v4251_v5, %v3259_v2 }
 0x7dd   : > { %v4200_v6 = vpop.f32.mrf.mxu0  ;;  %v4253_v8 = vpop.f32.mrf.mxu1 }
 0x7de   : > { %4396 = vst [vmem:[%s6645_s0 + $0xc0] sm:$0xff] %v4199_v36  ;;  %v4201_v7 = vadd.f32 %v4200_v6, %v3255_v45  ;;  %4398 = vst [vmem:[%s6645_s0 + $0xd0] sm:$0xff] %v4252_v35  ;;  %v4254_v9 = vadd.f32 %v4253_v8, %v3263_v54 }
 0x7df   : > { %v4204_v10 = vpop.f32.mrf.mxu0  ;;  %v4257_v12 = vpop.f32.mrf.mxu1 }
 0x7e0   : > { %4397 = vst [vmem:[%s6645_s0 + $0xc8] sm:$0xff] %v4201_v7  ;;  %v4205_v11 = vadd.f32 %v4204_v10, %v3251_v0  ;;  %4399 = vst [vmem:[%s6645_s0 + $0xd8] sm:$0xff] %v4254_v9  ;;  %v4258_v17 = vadd.f32 %v4257_v12, %v3259_v2 }
 0x7e1   : > { %v4206_v18 = vpop.f32.mrf.mxu0  ;;  %v4259_v22 = vpop.f32.mrf.mxu1 }
 0x7e2   : > { %4412 = vst [vmem:[%s6645_s0 + $0x140] sm:$0xff] %v4205_v11  ;;  %v4207_v20 = vadd.f32 %v4206_v18, %v3255_v45  ;;  %4414 = vst [vmem:[%s6645_s0 + $0x150] sm:$0xff] %v4258_v17  ;;  %v4260_v28 = vadd.f32 %v4259_v22, %v3263_v54 }
 0x7e3   : > { %v4208_v19 = vpop.f32.mrf.mxu0  ;;  %v4261_v30 = vpop.f32.mrf.mxu1 }
 0x7e4   : > { %4413 = vst [vmem:[%s6645_s0 + $0x148] sm:$0xff] %v4207_v20  ;;  %v4209_v21 = vadd.f32 %v4208_v19, %v3251_v0  ;;  %4415 = vst [vmem:[%s6645_s0 + $0x158] sm:$0xff] %v4260_v28  ;;  %v4262_v31 = vadd.f32 %v4261_v30, %v3259_v2 }
 0x7e5   : > { %v4210_v32 = vpop.f32.mrf.mxu0  ;;  %v4263_v24 = vpop.f32.mrf.mxu1 }
 0x7e6   : > { %4428 = vst [vmem:[%s6645_s0 + $0x1c0] sm:$0xff] %v4209_v21  ;;  %v4211_v23 = vadd.f32 %v4210_v32, %v3255_v45  ;;  %4430 = vst [vmem:[%s6645_s0 + $0x1d0] sm:$0xff] %v4262_v31  ;;  %v4264_v25 = vadd.f32 %v4263_v24, %v3263_v54 }
 0x7e8   : > { %4429 = vst [vmem:[%s6645_s0 + $0x1c8] sm:$0xff] %v4211_v23  ;;  %4431 = vst [vmem:[%s6645_s0 + $0x1d8] sm:$0xff] %v4264_v25 }
 0x7f7   : > { %v4300_v44 = vpop.f32.mrf.mxu0  ;;  %v4353_v56 = vpop.f32.mrf.mxu1 }
 0x7f8   : > { %v4301_v33 = vadd.f32 %v4300_v44, %v3267_v26  ;;  %v4354_v37 = vadd.f32 %v4353_v56, %v3275_v34 }
 0x7f9   : > { %v4302_v46 = vpop.f32.mrf.mxu0  ;;  %v4355_v13 = vpop.f32.mrf.mxu1 }
 0x7fa   : > { %4384 = vst [vmem:[%s6645_s0 + $0x60] sm:$0xff] %v4301_v33  ;;  %v4303_v48 = vadd.f32 %v4302_v46, %v3271_v39  ;;  %4386 = vst [vmem:[%s6645_s0 + $0x70] sm:$0xff] %v4354_v37  ;;  %v4356_v14 = vadd.f32 %v4355_v13, %v3279_v27 }
 0x7fb   : > { %v4304_v49 = vpop.f32.mrf.mxu0  ;;  %v4357_v38 = vpop.f32.mrf.mxu1 }
 0x7fc   : > { %4385 = vst [vmem:[%s6645_s0 + $0x68] sm:$0xff] %v4303_v48  ;;  %v4305_v15 = vadd.f32 %v4304_v49, %v3267_v26  ;;  %4387 = vst [vmem:[%s6645_s0 + $0x78] sm:$0xff] %v4356_v14  ;;  %v4358_v47 = vadd.f32 %v4357_v38, %v3275_v34 }
 0x7fd   : > { %v4306_v16 = vpop.f32.mrf.mxu0  ;;  %v4359_v51 = vpop.f32.mrf.mxu1 }
 0x7fe   : > { %4400 = vst [vmem:[%s6645_s0 + $0xe0] sm:$0xff] %v4305_v15  ;;  %v4307_v40 = vadd.f32 %v4306_v16, %v3271_v39  ;;  %4402 = vst [vmem:[%s6645_s0 + $0xf0] sm:$0xff] %v4358_v47  ;;  %v4360_v41 = vadd.f32 %v4359_v51, %v3279_v27 }
 0x7ff   : > { %v4310_v43 = vpop.f32.mrf.mxu0  ;;  %v4363_v55 = vpop.f32.mrf.mxu1 }
 0x800   : > { %4401 = vst [vmem:[%s6645_s0 + $0xe8] sm:$0xff] %v4307_v40  ;;  %v4311_v53 = vadd.f32 %v4310_v43, %v3267_v26  ;;  %4403 = vst [vmem:[%s6645_s0 + $0xf8] sm:$0xff] %v4360_v41  ;;  %v4364_v57 = vadd.f32 %v4363_v55, %v3275_v34 }
 0x801   : > { %v4312_v58 = vpop.f32.mrf.mxu0  ;;  %v4365_v61 = vpop.f32.mrf.mxu1 }
 0x802   : > { %4416 = vst [vmem:[%s6645_s0 + $0x160] sm:$0xff] %v4311_v53  ;;  %v4313_v60 = vadd.f32 %v4312_v58, %v3271_v39  ;;  %4418 = vst [vmem:[%s6645_s0 + $0x170] sm:$0xff] %v4364_v57  ;;  %v4366_v63 = vadd.f32 %v4365_v61, %v3279_v27 }
 0x803   : > { %v4314_v0 = vpop.f32.mrf.mxu0  ;;  %v4367_v45 = vpop.f32.mrf.mxu1 }
 0x804   : > { %4417 = vst [vmem:[%s6645_s0 + $0x168] sm:$0xff] %v4313_v60  ;;  %v4315_v2 = vadd.f32 %v4314_v0, %v3267_v26  ;;  %4419 = vst [vmem:[%s6645_s0 + $0x178] sm:$0xff] %v4366_v63  ;;  %v4368_v50 = vadd.f32 %v4367_v45, %v3275_v34 }
 0x805   : > { %v4316_v54 = vpop.f32.mrf.mxu0  ;;  %v4369_v62 = vpop.f32.mrf.mxu1 }
 0x806   : > { %4432 = vst [vmem:[%s6645_s0 + $0x1e0] sm:$0xff] %v4315_v2  ;;  %v4317_v59 = vadd.f32 %v4316_v54, %v3271_v39  ;;  %4434 = vst [vmem:[%s6645_s0 + $0x1f0] sm:$0xff] %v4368_v50  ;;  %v4370_v42 = vadd.f32 %v4369_v62, %v3279_v27 }
 0x808   : > { %4433 = vst [vmem:[%s6645_s0 + $0x1e8] sm:$0xff] %v4317_v59  ;;  %4435 = vst [vmem:[%s6645_s0 + $0x1f8] sm:$0xff] %v4370_v42 }
 0x809 PF: > { %s7060_s4 = sld [smem:[#allocation32_spill]]  ;;  %s4458_s22 = sshll.u32 %s6643_s29, 4  ;;  %s6857_s22 = int_to_ptr.vmem [resolvable:$true] %s4458_s22 }
 0x80a   : > { %s7061_s25 = sld [smem:[#allocation31_spill]]  ;;  %s4437_s10 = scalar_lea.sflag [#allocation6], %s6605_s12 }
 0x80b   : > { %s7062_s5 = sld [smem:[#allocation48_spill]]  ;;  %s6058_s18 = scalar_lea.vmem %s6857_s22, 512 }
 0x80c   : > { %p6059_p13 = scmp.ne.s32.totalorder %s6857_s22, %s6058_s18  ;;  %p7063_p3 = scmp.ne.s32.totalorder %s7031_s11, 0 }
 0x80d   : > { %s6247_s29 = smov [#allocation19]  }
 0x80e   : > { %p6060_p11 = pnand %p6059_p13, %p7063_p3  ;;  %s6062_s20 = sshll.u32 %s6247_s29, 4  ;;  %s6063_s20 = int_to_ptr.vmem [resolvable:$false] %s6062_s20 }
 0x80f   : > { %s4449_s21 = ssub.s32 1, %s7060_s4  ;;  %s6064_s28 = scalar_lea.vmem %s6063_s20, 1024 }
 0x810   : > { %s4450_s30 = smul.u32 %s7061_s25, %s4449_s21  ;;  %p6061_p2 = pneg %p6060_p11 }
 0x811   : > { %s4468_s19 = smul.u32 %s7061_s25, %s7060_s4  ;;  %p6065_p0 = scmp.lt.s32.totalorder %s6857_s22, %s6063_s20 }
 0x812   : > { %s4451_s24 = sadd.s32 %s7060_s4, %s4450_s30  ;;  %p6066_p7 = scmp.lt.s32.totalorder %s6064_s28, %s6058_s18 }
 0x813   : > { %s5078_s9 = sshll.u32 %s4451_s24, 9 }
 0x814   : > { %s6863_s26 = scalar_lea.hbm %s7062_s5, %s5078_s9  ;;  %p6067_p4 = por %p6066_p7, %p6065_p0 }
 0x816   : > { %p6068_p10 = pnand %p6067_p4, %p6061_p2 }
 0x818   : > { %6071 = shalt.err (!%p6068_p10)
}
 0x819   : > { %s6072_s21 = scalar_lea.hbm %s6863_s26, 512  ;;  %s6076_s9 = scalar_lea.hbm %s7062_s5, 1024 }
 0x81a   : > { %p6073_p9 = scmp.ne.s32.totalorder %s6863_s26, %s6072_s21  ;;  %p6077_p12 = scmp.lt.s32.totalorder %s6863_s26, %s7062_s5 }
 0x81b   : > { %p6078_p6 = scmp.lt.s32.totalorder %s6076_s9, %s6072_s21 }
 0x81c   : > { %p6074_p5 = pnand %p6073_p9, %p7063_p3 }
 0x81d   : > { %p6079_p1 = por %p6078_p6, %p6077_p12 }
 0x81e   : > { %p6075_p8 = pneg %p6074_p5 }
 0x820   : > { %p6080_p13 = pnand %p6079_p1, %p6075_p8 }
 0x822   : > { %6083 = shalt.err (!%p6080_p13)
}
 0x823   : > { %s6248_s18 = smov 128   ;;  %s6249_s29 = smov 8  }
 0x824   : > { %5492 = dma.vmem_to_hbm [thread:$0]  (%p7063_p3), %s6857_s22, 512, %s6863_s26, %s4437_s10, %s6248_s18, %s6248_s18, %s6249_s29  }
 0x825   : > { %s5080_s20 = sshll.u32 %s4468_s19, 13  ;;  %s4476_s28 = sshll.u32 %s6645_s0, 4  ;;  %s6901_s28 = int_to_ptr.vmem [resolvable:$true] %s4476_s28 }
 0x826   : > { %s7064_s24 = sld [smem:[#allocation49_spill]]  ;;  %s6905_s7 = scalar_lea.sflag [#allocation21], %s564_s8 }
 0x827   : > { %s6084_s11 = scalar_lea.vmem %s6901_s28, 8192  ;;  %p7065_p2 = scmp.ne.s32.totalorder %s7034_s27, 0 }
 0x828   : > { %p6085_p11 = scmp.ne.s32.totalorder %s6901_s28, %s6084_s11  ;;  %s6250_s12 = smov [#allocation20]  }
 0x829   : > { %s6088_s0 = sshll.u32 %s6250_s12, 4  ;;  %s6089_s0 = int_to_ptr.vmem [resolvable:$false] %s6088_s0 }
 0x82a   : > { %p6086_p3 = pnand %p6085_p11, %p7065_p2  ;;  %s6090_s4 = scalar_lea.vmem %s6089_s0, 16384 }
 0x82b   : > { %p6091_p7 = scmp.lt.s32.totalorder %s6901_s28, %s6089_s0  ;;  %p6092_p4 = scmp.lt.s32.totalorder %s6090_s4, %s6084_s11 }
 0x82c   : > { %s6899_s9 = scalar_lea.hbm %s7064_s24, %s5080_s20  ;;  %p6087_p0 = pneg %p6086_p3 }
 0x82d   : > { %p6093_p10 = por %p6092_p4, %p6091_p7 }
 0x82f   : > { %p6094_p9 = pnand %p6093_p10, %p6087_p0 }
 0x831   : > { %6097 = shalt.err (!%p6094_p9)
}
 0x832   : > { %s6098_s8 = scalar_lea.hbm %s6899_s9, 8192  ;;  %s6102_s26 = scalar_lea.hbm %s7064_s24, 16384 }
 0x833   : > { %p6099_p5 = scmp.ne.s32.totalorder %s6899_s9, %s6098_s8  ;;  %p6103_p6 = scmp.lt.s32.totalorder %s6899_s9, %s7064_s24 }
 0x834   : > { %p6104_p1 = scmp.lt.s32.totalorder %s6102_s26, %s6098_s8 }
 0x835   : > { %p6100_p8 = pnand %p6099_p5, %p7065_p2 }
 0x836   : > { %p6105_p13 = por %p6104_p1, %p6103_p6 }
 0x837   : > { %p6101_p12 = pneg %p6100_p8 }
 0x839   : > { %p6106_p11 = pnand %p6105_p13, %p6101_p12 }
 0x83b   : > { %6109 = shalt.err (!%p6106_p11)
}
 0x83c   : > { %s6251_s6 = smov 2048  }
 0x83d   : > { %5493 = dma.vmem_to_hbm [thread:$0]  (%p7065_p2), %s6901_s28, 8192, %s6899_s9, %s6905_s7, %s6251_s6, %s6251_s6, %s6248_s18  }
 0x83e PF: > { %p5547_p3 = scmp.ge.s32.totalorder %s6228_s23, 2  ;;  %s4491_s29 = sand.u32 1, %s6200_s16  }
 0x83f   : > { %p7066_p0 = scmp.ne.s32.totalorder %s7032_s3, 0  ;;  %s4492_s20 = scalar_lea.sflag [#allocation6], %s4491_s29 }
 0x841   : > { %p5526_p7 = pnand %p5547_p3, %p7066_p0 }
 0x843   : > { %p5527_p4 = pneg %p5526_p7 }
 0x845   : > { %6179 = dma.done.wait (%p5527_p4), %s4492_s20, 512  }
 0x846   : > { %6181 = vsyncadd (%p5527_p4), %s4492_s20, 4294966784  ;;  %s4500_s27 = sand.u32 1, %s6188_s13   ;;  %p7067_p10 = scmp.ne.s32.totalorder %s7036_s2, 0 }
 0x847   : > { %s4501_s21 = scalar_lea.sflag [#allocation21], %s4500_s27 }
 0x848   : > { %p5529_p9 = pnand %p5547_p3, %p7067_p10 }
 0x84a   : > { %p5530_p5 = pneg %p5529_p9 }
 0x84c   : > { %6183 = dma.done.wait (%p5530_p5), %s4501_s21, 8192  }
 0x84d   : > { %6185 = vsyncadd (%p5530_p5), %s4501_s21, 4294959104  ;;  %s36_s23 = sadd.s32 1, %s6228_s23   ;;  %s7068_s3 = sld [smem:[#allocation39_spill]] }
 0x84e   : > { %p33_p2 = scmp.ge.s32.totalorder %s36_s23, 6   ;;  %s7069_s18 = sld [smem:[#allocation30_spill]] }
 0x84f   : > { %s7070_s28 = sld [smem:[#allocation38_spill]]  ;;  %s7075_s13 = smov %s6192_s14 }
 0x850   : > { %s7071_s19 = sld [smem:[#allocation33_spill]]  ;;  %s7076_s14 = smov %s6196_s15 }
 0x851   : > { %s7072_s20 = sld [smem:[#allocation34_spill]]  ;;  %s7078_s16 = smov %s6204_s17 }
 0x852   : > { %s7073_s21 = sld [smem:[#allocation36_spill]]  ;;  %35 = sbr.rel (!%p33_p2) target bundleno = 27 (0x1b), region = 173 }
 0x853   : > { %s7074_s22 = sld [smem:[#allocation37_spill]]  ;;  %s7077_s15 = smov %s7068_s3 }
 0x854   : > { %s7079_s17 = smov %s7069_s18 }
 0x855   : > { %s7080_s18 = smov %s7070_s28 }
 0x857   :  { %4506 = vsyncpa [#allocation5], 1 }
 0x858   :  { %4508 = vsyncpa [#allocation5 + $0x1], 1 }
 0x859   :  { %4509 = vsyncpa [#allocation8], 1 }
 0x85a   :  { %4511 = vsyncpa [#allocation8 + $0x1], 1 }
 0x85b   :  { %4512 = vsyncpa [#allocation11], 1 }
 0x85c   :  { %4513 = vsyncpa [#allocation14], 1 }
 0x85d   :  { %4514 = vsyncpa [#allocation17], 1 }
 0x85e   :  { %4515 = vsyncpa [#allocation6], 1 }
 0x85f   :  { %4517 = vsyncpa [#allocation6 + $0x1], 1 }
 0x860   :  { %4518 = vsyncpa [#allocation21], 1 }
 0x861   :  { %4520 = vsyncpa [#allocation21 + $0x1], 1 }

</bundles_post_ra>
